<compile_context>
chip_gen: v7x
topology: tpu7x:2x2x1
jax: 0.10.0
libtpu: 0.0.40
codegen_flags: <defaults>
</compile_context>

<pallas_src>
import functools
import math

import jax
import jax.numpy as jnp
import numpy as np
from jax.experimental import pallas as pl
from jax.experimental.pallas import tpu as pltpu


# --------------------------------------------------------------------------
# Parameter setup (mirrors gaussian()/create_window(); window is separable).
# --------------------------------------------------------------------------
def _gaussian_weights(window_size: int, sigma: float = 1.5):
    g = [math.exp(-((i - window_size // 2) ** 2) / (2.0 * sigma * sigma))
         for i in range(window_size)]
    s = sum(g)
    return [v / s for v in g]


def _banded_conv_matrix(g, in_size: int, out_size: int) -> jnp.ndarray:
    """M[w, o] = g[w - o] for 0 <= w - o < K, so (p @ M)[., o] = sum_j g[j] p[., o+j]."""
    k = len(g)
    m = np.zeros((in_size, out_size), dtype=np.float32)
    for o in range(out_size):
        for j in range(k):
            m[o + j, o] = g[j]
    return jnp.asarray(m)


def _choose_planes_per_block(planes: int, H: int, W: int, budget_bytes: int) -> int:
    """Largest divisor of `planes` whose per-step working set fits the budget."""
    best = 1
    for p in range(1, planes + 1):
        if planes % p:
            continue
        # rough per-step VMEM: x,y double-buffered + stacked quantities +
        # column-pass result + a handful of (p*H, Wo) temporaries.
        approx = 4 * H * W * p * (2 * 2 + 5 + 5 + 8)
        if approx <= budget_bytes:
            best = p
    return best


# --------------------------------------------------------------------------
# Pallas kernel: one block of `P` image planes (flattened N*C) per grid step.
# --------------------------------------------------------------------------
def _ssim_kernel(consts_ref, bw_ref, x_ref, y_ref, out_ref, *, g, H, Ho, K, P):
    C1 = consts_ref[0]
    C2 = consts_ref[1]

    X = x_ref[0]                       # (P*H, W) f32 — P planes stacked on sublanes
    Y = y_ref[0]
    Bw = bw_ref[...]                   # (W, Wo) banded Gaussian column matrix

    PH = P * H

    # ---- Column (W) pass: ONE fused MXU matmul over all 5 quantities ----
    # Stack [x, y, x^2, y^2, x*y] along sublanes, plus K-1 zero rows so the
    # row-pass taps below never read out of bounds.
    zpad = jnp.zeros((K - 1, X.shape[1]), jnp.float32)
    Q = jnp.concatenate([X, Y, X * X, Y * Y, X * Y, zpad], axis=0)   # (5*PH+K-1, W)
    Rc = jnp.dot(Q, Bw, preferred_element_type=jnp.float32)          # (5*PH+K-1, Wo)

    # ---- Row (H) pass: K-tap shifted accumulate (VPU; transpose-free) ----
    Rr = g[0] * Rc[0:5 * PH, :]
    for j in range(1, K):
        Rr = Rr + g[j] * Rc[j:j + 5 * PH, :]                          # (5*PH, Wo)

    mu1 = Rr[0 * PH:1 * PH]
    mu2 = Rr[1 * PH:2 * PH]
    s11 = Rr[2 * PH:3 * PH]
    s22 = Rr[3 * PH:4 * PH]
    s12 = Rr[4 * PH:5 * PH]

    # Rows with (r mod H) >= Ho straddle a plane boundary (or the zero pad)
    # and are garbage; mask them out of the reduction.
    row = jax.lax.broadcasted_iota(jnp.int32, mu1.shape, 0)
    valid = (row % H) < Ho

    mu1_sq = mu1 * mu1
    mu2_sq = mu2 * mu2
    mu1_mu2 = mu1 * mu2
    sigma1_sq = s11 - mu1_sq
    sigma2_sq = s22 - mu2_sq
    sigma12 = s12 - mu1_mu2

    v1 = 2.0 * sigma12 + C2
    v2 = sigma1_sq + sigma2_sq + C2
    num = (2.0 * mu1_mu2 + C1) * v1
    den = (mu1_sq + mu2_sq + C1) * v2
    den = jnp.where(valid, den, 1.0)          # keep garbage rows finite
    ssim_map = num / den                      # exact f32 divide (correctness feedback)

    partial = jnp.sum(jnp.where(valid, ssim_map, 0.0))
    out_ref[...] = jnp.broadcast_to(partial, out_ref.shape).astype(out_ref.dtype)


# --------------------------------------------------------------------------
# Wrapper (SSIM.forward with size_average=True, val_range=None by default).
# --------------------------------------------------------------------------
@functools.partial(jax.jit, static_argnames=("window_size",))
def ssim_pallas(img1: jnp.ndarray, img2: jnp.ndarray,
                window_size: int = 11, val_range=None) -> jnp.ndarray:
    assert img1.shape == img2.shape and img1.ndim == 4
    N, C, H, W = img1.shape
    img1 = img1.astype(jnp.float32)
    img2 = img2.astype(jnp.float32)

    K = min(window_size, H, W)                 # guard; == window_size for H,W >= 11
    Ho, Wo = H - K + 1, W - K + 1              # padding=0 ("valid") output size

    g = _gaussian_weights(K)
    Bw = _banded_conv_matrix(g, W, Wo)         # (W, Wo)

    # Dynamic range L (val_range=None branch of the reference).
    if val_range is None:
        max_val = jnp.where(jnp.max(img1) > 128.0, 255.0, 1.0)
        min_val = jnp.where(jnp.min(img1) < -0.5, -1.0, 0.0)
        L = max_val - min_val
    else:
        L = val_range
    consts = jnp.stack([(0.01 * L) ** 2, (0.03 * L) ** 2]).astype(jnp.float32)

    # Generation-aware VMEM budget (~100 MiB on 128 MiB chips, ~51 MiB on v7x).
    try:
        vmem_cap = int(pltpu.get_tpu_info().vmem_capacity_bytes)
    except Exception:
        vmem_cap = 64 * 1024 * 1024
    vmem_limit = min(int(vmem_cap * 0.8), 100 * 1024 * 1024)

    planes = N * C
    P = _choose_planes_per_block(planes, H, W,
                                 min(vmem_limit // 3, 16 * 1024 * 1024))
    num_blocks = planes // P
    PH = P * H

    # Free contiguous reshapes (no transpose, no extra HBM traffic).
    x = img1.reshape(num_blocks, PH, W)
    y = img2.reshape(num_blocks, PH, W)

    kernel = functools.partial(_ssim_kernel, g=tuple(g), H=H, Ho=Ho, K=K, P=P)

    out = pl.pallas_call(
        kernel,
        out_shape=jax.ShapeDtypeStruct((num_blocks, 8, 128), jnp.float32),
        grid_spec=pltpu.PrefetchScalarGridSpec(
            num_scalar_prefetch=0,
            grid=(num_blocks,),
            in_specs=[
                # C1/C2 scalars in SMEM.
                pl.BlockSpec(memory_space=pltpu.MemorySpace.SMEM),
                # Small banded column matrix, resident for every grid step.
                pl.BlockSpec((W, Wo), lambda n: (0, 0)),
                # One block of P stacked image planes per grid step.
                pl.BlockSpec((1, PH, W), lambda n: (n, 0, 0)),
                pl.BlockSpec((1, PH, W), lambda n: (n, 0, 0)),
            ],
            # Per-block partial sums; independent blocks -> "parallel" axis.
            out_specs=pl.BlockSpec((1, 8, 128), lambda n: (n, 0, 0)),
        ),
        compiler_params=pltpu.CompilerParams(
            dimension_semantics=("parallel",),
            vmem_limit_bytes=vmem_limit,
        ),
    )(consts, Bw, x, y)

    total = N * C * Ho * Wo
    return jnp.sum(out[:, 0, 0]) / float(total)   # size_average=True mean


if __name__ == "__main__":
    key = jax.random.PRNGKey(0)
    k1, k2 = jax.random.split(key)
    # Small shapes consistent with the module: NCHW, H=W=16 > window_size=11.
    img1 = jax.random.normal(k1, (2, 4, 16, 16), dtype=jnp.float32)
    img2 = img1 + 0.1 * jax.random.normal(k2, (2, 4, 16, 16), dtype=jnp.float32)

    result = ssim_pallas(img1, img2, window_size=11)
    jax.block_until_ready(result)
    print("KERNEL_OK")
</pallas_src>

<mosaic_0001>
module attributes {stable_mosaic.version = 11 : i64} {
  func.func @_ssim_kernel(%arg0: i32, %arg1: memref<2xf32, #tpu.memory_space<smem>>, %arg2: memref<16x6xf32, #tpu.memory_space<vmem>>, %arg3: memref<1x128x16xf32, #tpu.memory_space<vmem>>, %arg4: memref<1x128x16xf32, #tpu.memory_space<vmem>>, %arg5: memref<1x8x128xf32, #tpu.memory_space<vmem>>) attributes {dimension_semantics = [#tpu.dimension_semantics<parallel>], iteration_bounds = array<i64: 1>, scalar_prefetch = 0 : i64, scratch_operands = 0 : i64, tpu.core_type = #tpu.core_type<tc>, window_params = [{transform_indices = @transform_0, window_bounds = array<i64: 2>}, {pipeline_mode = #tpu.pipeline_mode<synchronous>, transform_indices = @transform_1, window_bounds = array<i64: 16, 6>}, {transform_indices = @transform_2, window_bounds = array<i64: 1, 128, 16>}, {transform_indices = @transform_3, window_bounds = array<i64: 1, 128, 16>}, {transform_indices = @transform_4, window_bounds = array<i64: 1, 8, 128>}]} {
    %c0 = arith.constant 0 : index
    %0 = memref.load %arg1[%c0] : memref<2xf32, #tpu.memory_space<smem>>
    %c1 = arith.constant 1 : index
    %1 = memref.load %arg1[%c1] : memref<2xf32, #tpu.memory_space<smem>>
    %c0_0 = arith.constant 0 : index
    %c0_1 = arith.constant 0 : index
    %c0_2 = arith.constant 0 : index
    %2 = vector.load %arg3[%c0_0, %c0_1, %c0_2] : memref<1x128x16xf32, #tpu.memory_space<vmem>>, vector<1x128x16xf32>
    %3 = vector.shape_cast %2 : vector<1x128x16xf32> to vector<128x16xf32>
    %c0_3 = arith.constant 0 : index
    %c0_4 = arith.constant 0 : index
    %c0_5 = arith.constant 0 : index
    %4 = vector.load %arg4[%c0_3, %c0_4, %c0_5] : memref<1x128x16xf32, #tpu.memory_space<vmem>>, vector<1x128x16xf32>
    %5 = vector.shape_cast %4 : vector<1x128x16xf32> to vector<128x16xf32>
    %c0_6 = arith.constant 0 : index
    %c0_7 = arith.constant 0 : index
    %6 = vector.load %arg2[%c0_6, %c0_7] : memref<16x6xf32, #tpu.memory_space<vmem>>, vector<16x6xf32>
    %cst = arith.constant 0.000000e+00 : f32
    %7 = vector.broadcast %cst : f32 to vector<10x16xf32>
    %8 = arith.mulf %3, %3 : vector<128x16xf32>
    %9 = arith.mulf %5, %5 : vector<128x16xf32>
    %10 = arith.mulf %3, %5 : vector<128x16xf32>
    %11 = tpu.concatenate %3, %5, %8, %9, %10, %7 in 0 : vector<128x16xf32>, vector<128x16xf32>, vector<128x16xf32>, vector<128x16xf32>, vector<128x16xf32>, vector<10x16xf32> -> vector<650x16xf32>
    %cst_8 = arith.constant dense<0.000000e+00> : vector<650x6xf32>
    %12 = tpu.matmul %11, %6, %cst_8 {dimension_numbers = #tpu.dot_dimension_numbers<[1], [0], [0], [1], [0, 0, 1, 1], [], []>} : vector<650x16xf32>, vector<16x6xf32>, vector<650x6xf32> -> vector<650x6xf32>
    %13 = vector.extract_strided_slice %12 {offsets = [0, 0], sizes = [640, 6], strides = [1, 1]} : vector<650x6xf32> to vector<640x6xf32>
    %cst_9 = arith.constant 0.00102838012 : f32
    %14 = vector.broadcast %cst_9 : f32 to vector<640x6xf32>
    %15 = arith.mulf %14, %13 : vector<640x6xf32>
    %16 = vector.extract_strided_slice %12 {offsets = [1, 0], sizes = [640, 6], strides = [1, 1]} : vector<650x6xf32> to vector<640x6xf32>
    %cst_10 = arith.constant 0.00759875821 : f32
    %17 = vector.broadcast %cst_10 : f32 to vector<640x6xf32>
    %18 = arith.mulf %17, %16 : vector<640x6xf32>
    %19 = arith.addf %15, %18 : vector<640x6xf32>
    %20 = vector.extract_strided_slice %12 {offsets = [2, 0], sizes = [640, 6], strides = [1, 1]} : vector<650x6xf32> to vector<640x6xf32>
    %cst_11 = arith.constant 0.0360007733 : f32
    %21 = vector.broadcast %cst_11 : f32 to vector<640x6xf32>
    %22 = arith.mulf %21, %20 : vector<640x6xf32>
    %23 = arith.addf %19, %22 : vector<640x6xf32>
    %24 = vector.extract_strided_slice %12 {offsets = [3, 0], sizes = [640, 6], strides = [1, 1]} : vector<650x6xf32> to vector<640x6xf32>
    %cst_12 = arith.constant 0.109360687 : f32
    %25 = vector.broadcast %cst_12 : f32 to vector<640x6xf32>
    %26 = arith.mulf %25, %24 : vector<640x6xf32>
    %27 = arith.addf %23, %26 : vector<640x6xf32>
    %28 = vector.extract_strided_slice %12 {offsets = [4, 0], sizes = [640, 6], strides = [1, 1]} : vector<650x6xf32> to vector<640x6xf32>
    %cst_13 = arith.constant 0.213005543 : f32
    %29 = vector.broadcast %cst_13 : f32 to vector<640x6xf32>
    %30 = arith.mulf %29, %28 : vector<640x6xf32>
    %31 = arith.addf %27, %30 : vector<640x6xf32>
    %32 = vector.extract_strided_slice %12 {offsets = [5, 0], sizes = [640, 6], strides = [1, 1]} : vector<650x6xf32> to vector<640x6xf32>
    %cst_14 = arith.constant 0.266011715 : f32
    %33 = vector.broadcast %cst_14 : f32 to vector<640x6xf32>
    %34 = arith.mulf %33, %32 : vector<640x6xf32>
    %35 = arith.addf %31, %34 : vector<640x6xf32>
    %36 = vector.extract_strided_slice %12 {offsets = [6, 0], sizes = [640, 6], strides = [1, 1]} : vector<650x6xf32> to vector<640x6xf32>
    %cst_15 = arith.constant 0.213005543 : f32
    %37 = vector.broadcast %cst_15 : f32 to vector<640x6xf32>
    %38 = arith.mulf %37, %36 : vector<640x6xf32>
    %39 = arith.addf %35, %38 : vector<640x6xf32>
    %40 = vector.extract_strided_slice %12 {offsets = [7, 0], sizes = [640, 6], strides = [1, 1]} : vector<650x6xf32> to vector<640x6xf32>
    %cst_16 = arith.constant 0.109360687 : f32
    %41 = vector.broadcast %cst_16 : f32 to vector<640x6xf32>
    %42 = arith.mulf %41, %40 : vector<640x6xf32>
    %43 = arith.addf %39, %42 : vector<640x6xf32>
    %44 = vector.extract_strided_slice %12 {offsets = [8, 0], sizes = [640, 6], strides = [1, 1]} : vector<650x6xf32> to vector<640x6xf32>
    %cst_17 = arith.constant 0.0360007733 : f32
    %45 = vector.broadcast %cst_17 : f32 to vector<640x6xf32>
    %46 = arith.mulf %45, %44 : vector<640x6xf32>
    %47 = arith.addf %43, %46 : vector<640x6xf32>
    %48 = vector.extract_strided_slice %12 {offsets = [9, 0], sizes = [640, 6], strides = [1, 1]} : vector<650x6xf32> to vector<640x6xf32>
    %cst_18 = arith.constant 0.00759875821 : f32
    %49 = vector.broadcast %cst_18 : f32 to vector<640x6xf32>
    %50 = arith.mulf %49, %48 : vector<640x6xf32>
    %51 = arith.addf %47, %50 : vector<640x6xf32>
    %52 = vector.extract_strided_slice %12 {offsets = [10, 0], sizes = [640, 6], strides = [1, 1]} : vector<650x6xf32> to vector<640x6xf32>
    %cst_19 = arith.constant 0.00102838012 : f32
    %53 = vector.broadcast %cst_19 : f32 to vector<640x6xf32>
    %54 = arith.mulf %53, %52 : vector<640x6xf32>
    %55 = arith.addf %51, %54 : vector<640x6xf32>
    %56 = vector.extract_strided_slice %55 {offsets = [0, 0], sizes = [128, 6], strides = [1, 1]} : vector<640x6xf32> to vector<128x6xf32>
    %57 = vector.extract_strided_slice %55 {offsets = [128, 0], sizes = [128, 6], strides = [1, 1]} : vector<640x6xf32> to vector<128x6xf32>
    %58 = vector.extract_strided_slice %55 {offsets = [256, 0], sizes = [128, 6], strides = [1, 1]} : vector<640x6xf32> to vector<128x6xf32>
    %59 = vector.extract_strided_slice %55 {offsets = [384, 0], sizes = [128, 6], strides = [1, 1]} : vector<640x6xf32> to vector<128x6xf32>
    %60 = vector.extract_strided_slice %55 {offsets = [512, 0], sizes = [128, 6], strides = [1, 1]} : vector<640x6xf32> to vector<128x6xf32>
    %61 = tpu.iota {dimensions = array<i32: 0>} : vector<128x6xi32>
    %c16_i32 = arith.constant 16 : i32
    %c0_i32 = arith.constant 0 : i32
    %62 = arith.cmpi eq, %c16_i32, %c0_i32 : i32
    %c1_i32 = arith.constant 1 : i32
    %63 = arith.select %62, %c1_i32, %c16_i32 : i32
    %64 = vector.broadcast %63 : i32 to vector<128x6xi32>
    %65 = arith.remsi %61, %64 : vector<128x6xi32>
    %c0_i32_20 = arith.constant 0 : i32
    %66 = vector.broadcast %c0_i32_20 : i32 to vector<128x6xi32>
    %67 = arith.cmpi ne, %65, %66 : vector<128x6xi32>
    %c0_i32_21 = arith.constant 0 : i32
    %68 = vector.broadcast %c0_i32_21 : i32 to vector<128x6xi32>
    %69 = arith.cmpi slt, %65, %68 : vector<128x6xi32>
    %c0_i32_22 = arith.constant 0 : i32
    %70 = arith.cmpi slt, %63, %c0_i32_22 : i32
    %71 = vector.broadcast %70 : i1 to vector<128x6xi1>
    %72 = vector.broadcast %71 : vector<128x6xi1> to vector<128x6xi1>
    %73 = arith.xori %69, %72 : vector<128x6xi1>
    %74 = arith.andi %73, %67 : vector<128x6xi1>
    %75 = vector.broadcast %63 : i32 to vector<128x6xi32>
    %76 = arith.addi %65, %75 : vector<128x6xi32>
    %77 = arith.select %74, %76, %65 : vector<128x6xi1>, vector<128x6xi32>
    %c6_i32 = arith.constant 6 : i32
    %78 = vector.broadcast %c6_i32 : i32 to vector<128x6xi32>
    %79 = arith.cmpi slt, %77, %78 : vector<128x6xi32>
    %80 = arith.mulf %56, %56 : vector<128x6xf32>
    %81 = arith.mulf %57, %57 : vector<128x6xf32>
    %82 = arith.mulf %56, %57 : vector<128x6xf32>
    %83 = arith.subf %58, %80 : vector<128x6xf32>
    %84 = arith.subf %59, %81 : vector<128x6xf32>
    %85 = arith.subf %60, %82 : vector<128x6xf32>
    %cst_23 = arith.constant 2.000000e+00 : f32
    %86 = vector.broadcast %cst_23 : f32 to vector<128x6xf32>
    %87 = arith.mulf %86, %85 : vector<128x6xf32>
    %88 = vector.broadcast %1 : f32 to vector<128x6xf32>
    %89 = arith.addf %87, %88 : vector<128x6xf32>
    %90 = arith.addf %83, %84 : vector<128x6xf32>
    %91 = vector.broadcast %1 : f32 to vector<128x6xf32>
    %92 = arith.addf %90, %91 : vector<128x6xf32>
    %cst_24 = arith.constant 2.000000e+00 : f32
    %93 = vector.broadcast %cst_24 : f32 to vector<128x6xf32>
    %94 = arith.mulf %93, %82 : vector<128x6xf32>
    %95 = vector.broadcast %0 : f32 to vector<128x6xf32>
    %96 = arith.addf %94, %95 : vector<128x6xf32>
    %97 = arith.mulf %96, %89 : vector<128x6xf32>
    %98 = arith.addf %80, %81 : vector<128x6xf32>
    %99 = vector.broadcast %0 : f32 to vector<128x6xf32>
    %100 = arith.addf %98, %99 : vector<128x6xf32>
    %101 = arith.mulf %100, %92 : vector<128x6xf32>
    %cst_25 = arith.constant 1.000000e+00 : f32
    %102 = vector.broadcast %cst_25 : f32 to vector<128x6xf32>
    %103 = arith.select %79, %101, %102 : vector<128x6xi1>, vector<128x6xf32>
    %104 = arith.divf %97, %103 : vector<128x6xf32>
    %cst_26 = arith.constant 0.000000e+00 : f32
    %105 = vector.broadcast %cst_26 : f32 to vector<128x6xf32>
    %106 = arith.select %79, %104, %105 : vector<128x6xi1>, vector<128x6xf32>
    %107 = vector.shape_cast %106 : vector<128x6xf32> to vector<1x128x6xf32>
    %cst_27 = arith.constant dense<0.000000e+00> : vector<1xf32>
    %108 = vector.multi_reduction <add>, %107, %cst_27 [1, 2] : vector<1x128x6xf32> to vector<1xf32>
    %109 = vector.shape_cast %108 : vector<1xf32> to vector<1x1x1xf32>
    %110 = vector.extract %109[0, 0, 0] : f32 from vector<1x1x1xf32>
    %111 = vector.broadcast %110 : f32 to vector<1x8x128xf32>
    %c0_28 = arith.constant 0 : index
    %c0_29 = arith.constant 0 : index
    %c0_30 = arith.constant 0 : index
    %112 = vector.load %arg5[%c0_28, %c0_29, %c0_30] : memref<1x8x128xf32, #tpu.memory_space<vmem>>, vector<1x8x128xf32>
    tpu.vector_store %arg5[%c0_28, %c0_29, %c0_30], %111 {strides = array<i32>} : memref<1x8x128xf32, #tpu.memory_space<vmem>>, vector<1x8x128xf32>,
    return
  }
  func.func @transform_0(%arg0: i32) -> i32 {
    %c0_i32 = arith.constant 0 : i32
    %c0_i32_0 = arith.constant 0 : i32
    return %c0_i32 : i32
  }
  func.func @transform_1(%arg0: i32) -> (i32, i32) {
    %c0_i32 = arith.constant 0 : i32
    %c0_i32_0 = arith.constant 0 : i32
    %c0_i32_1 = arith.constant 0 : i32
    return %c0_i32, %c0_i32_0 : i32, i32
  }
  func.func @transform_2(%arg0: i32) -> (i32, i32, i32) {
    %c0_i32 = arith.constant 0 : i32
    %c0_i32_0 = arith.constant 0 : i32
    %c0_i32_1 = arith.constant 0 : i32
    return %arg0, %c0_i32, %c0_i32_0 : i32, i32, i32
  }
  func.func @transform_3(%arg0: i32) -> (i32, i32, i32) {
    %c0_i32 = arith.constant 0 : i32
    %c0_i32_0 = arith.constant 0 : i32
    %c0_i32_1 = arith.constant 0 : i32
    return %arg0, %c0_i32, %c0_i32_0 : i32, i32, i32
  }
  func.func @transform_4(%arg0: i32) -> (i32, i32, i32) {
    %c0_i32 = arith.constant 0 : i32
    %c0_i32_0 = arith.constant 0 : i32
    %c0_i32_1 = arith.constant 0 : i32
    return %arg0, %c0_i32, %c0_i32_0 : i32, i32, i32
  }
}

</mosaic_0001>

<bundles_post_ra>
// kernel: ssim_pallas.1
= control target key start
LH: loop header
LB: loop body
LE: loop exit
PB: predicated region body
PF: predicated region fallthrough
CT: control target
= control target key end

     0   :  { %9 = vsyncpa [#allocation4], 0  ;;  %s8191_s0 = inlined_call_operand.vmem [shape: f32[2], index: 0, kind: input, shape index: {}]   ;;  %s8192_s1 = inlined_call_operand.vmem [shape: f32[16,6], index: 1, kind: input, shape index: {}]   ;;  %s8193_s2 = inlined_call_operand.vmem [shape: f32[1,128,16], index: 2, kind: input, shape index: {}]   ;;  %s8194_s3 = inlined_call_operand.hbm [shape: f32[1,128,16], index: 3, kind: input, shape index: {}]   ;;  %s8195_s4 = inlined_call_operand.vmem [shape: f32[1,8,128], index: 4, kind: output, shape index: {}]  }
   0x1   :  { %s17_s17 = sshll.u32 %s8191_s0, 4  ;;  %s18_s17 = int_to_ptr.vmem [resolvable:$true] %s17_s17 }
   0x2   :  { %10 = vsyncpa [#allocation3], 0  ;;  %s5477_s18 = scalar_lea.vmem %s18_s17, 16  ;;  %p5482_p1 = scmp.lt.s32.totalorder %s18_s17, %s18_s17 }
   0x3   :  { %p5478_p0 = scmp.ne.s32.totalorder %s18_s17, %s5477_s18  ;;  %p5483_p2 = scmp.lt.s32.totalorder %s5477_s18, %s5477_s18 }
   0x5   :  { %p5484_p3 = por %p5483_p2, %p5482_p1 }
   0x7   :  { %p5485_p4 = pnand %p5484_p3, %p5478_p0 }
   0x9   :  { %5488 = shalt.err (!%p5485_p4)
}
   0xa   :  { %s5515_s19 = smov [#allocation2]   ;;  %s5516_s20 = smov [#allocation5]  }
   0xb   :  { %20 = dma.vmem_to_smem %s18_s17, 16, %s5515_s19, [#allocation4]  }
   0xc   :  { %s30_s21 = sshll.u32 %s5516_s20, 4  ;;  %s5489_s24 = scalar_lea.hbm %s8194_s3, 2048  ;;  %s31_s21 = int_to_ptr.vmem [resolvable:$true] %s30_s21 }
   0xd   :  { %p5490_p5 = scmp.ne.s32.totalorder %s8194_s3, %s5489_s24  ;;  %p5493_p6 = scmp.lt.u32.totalorder %s5489_s24, %s8194_s3 }
   0xf   :  { %p5495_p7 = pnand %p5493_p6, %p5490_p5 }
  0x11   :  { %5498 = shalt.err (!%p5495_p7)
}
  0x12   :  { %s5499_s28 = scalar_lea.vmem %s31_s21, 2048  ;;  %p5504_p9 = scmp.lt.s32.totalorder %s31_s21, %s31_s21 }
  0x13   :  { %p5500_p8 = scmp.ne.s32.totalorder %s31_s21, %s5499_s28  ;;  %p5505_p10 = scmp.lt.s32.totalorder %s5499_s28, %s5499_s28 }
  0x15   :  { %p5506_p11 = por %p5505_p10, %p5504_p9 }
  0x17   :  { %p5507_p12 = pnand %p5506_p11, %p5500_p8 }
  0x19   :  { %5510 = shalt.err (!%p5507_p12)
}
  0x1a   :  { %s5517_s29 = smov 128   ;;  %s5518_s30 = smov 8  }
  0x1b   :  { %36 = dma.hbm_to_vmem [thread:$0]  %s8194_s3, 2048, %s31_s21, [#allocation3], %s5517_s29, %s5517_s29, %s5518_s30  }
  0x1c   :  { %5511 = dma.done.wait [#allocation4], 16  }
  0x1d   :  { %5512 = vsyncadd [#allocation4], 4294967280 }
  0x1e   :  { %5513 = dma.done.wait [#allocation3], 2048  }
  0x1f   :  { %5514 = vsyncadd [#allocation3], 4294965248 }
  0x20   :  { %43 = sfence }
  0x21   :  { %v78_v0 = vld [vmem:[%s8192_s1] sm:$0xff]  ;;  %v79_v1 = vld [vmem:[%s8192_s1 + $0x8] sm:$0xff]  ;;  %vm128_vm0 = vcmask 130048   ;;  %v5576_v4 = vld [vmem:[%s8193_s2 + $0x50] sm:$0xff]  ;;  %vm1089_vm1 = vcmask 1046528   ;;  %vm1573_vm2 = vcmask 1045504  }
  0x22   :  { %v5569_v2 = vld [vmem:[%s8193_s2] sm:$0xff]  ;;  %v5448_v3 = vpack.c.bf16 %v79_v1, %v78_v0  ;;  %v90_v5 = vmul.f32 %v5576_v4, %v5576_v4  ;;  %v5583_v6 = vld [vmem:[%s8193_s2 + $0x58] sm:$0xff]  ;;  %v5595_v9 = vld [vmem:[%s8193_s2 + $0x8] sm:$0xff]  ;;  %vm2057_vm3 = vcmask 1044480   ;;  %vm2541_vm4 = vcmask 1043456   ;;  %s8060_s13 = sld [smem:[#allocation2]] }
  0x23   :  { %5325 = vmatprep.mubr.msk.f32.mxu0 %vm128_vm0, %v5569_v2  ;;  %v91_v7 = vmul.f32 %v5583_v6, %v5583_v6  ;;  %v5590_v8 = vld [vmem:[%s8193_s2 + $0x60] sm:$0xff]  ;;  %v5602_v11 = vld [vmem:[%s8193_s2 + $0x68] sm:$0xff]  ;;  %v5608_v12 = vld [vmem:[%s8193_s2 + $0x10] sm:$0xff]  ;;  %vm3025_vm5 = vcmask 1042432   ;;  %vm3347_vm6 = vcmask 1041408   ;;  %vm3669_vm7 = vcmask 1040384  }
  0x24   :  { %5449 = vmatprep.subr.bf16.mxu0 %v5448_v3  ;;  %5452 = vmatprep.subr.bf16.mxu1 %v5448_v3  ;;  %v92_v10 = vmul.f32 %v5590_v8, %v5590_v8  ;;  %v5613_v13 = vld [vmem:[%s8193_s2 + $0x70] sm:$0xff]  ;;  %v93_v14 = vmul.f32 %v5602_v11, %v5602_v11  ;;  %v5626_v15 = vld [vmem:[%s8193_s2 + $0x18] sm:$0xff]  ;;  %v5635_v18 = vld [vmem:[#allocation5] sm:$0xff] }
  0x25   :  { %5451 = vmatpush3.bf16.msra.mxu0 %v5448_v3  ;;  %5453 = vmatpush3.bf16.msra.mxu1 %v5448_v3  ;;  %v94_v16 = vmul.f32 %v5613_v13, %v5613_v13  ;;  %v5633_v17 = vld [vmem:[%s8193_s2 + $0x78] sm:$0xff]  ;;  %v5640_v19 = vld [vmem:[%s8193_s2 + $0x20] sm:$0xff]  ;;  %v5647_v21 = vld [vmem:[#allocation5 + $0x8] sm:$0xff]  ;;  %v96_v23 = vmul.f32 %v5635_v18, %v5635_v18  ;;  %v112_v57 = vmul.f32 %v5635_v18, %v5569_v2 }
  0x26   :  { %5388 = vmatprep.mubr.msk.f32.mxu1 %vm128_vm0, %v90_v5  ;;  %v95_v20 = vmul.f32 %v5633_v17, %v5633_v17  ;;  %v5655_v22 = vld [vmem:[%s8193_s2 + $0x28] sm:$0xff]  ;;  %v5659_v24 = vld [vmem:[#allocation5 + $0x10] sm:$0xff]  ;;  %v97_v26 = vmul.f32 %v5647_v21, %v5647_v21  ;;  %v5671_v27 = vld [vmem:[#allocation5 + $0x18] sm:$0xff]  ;;  %v113_v58 = vmul.f32 %v5647_v21, %v5595_v9  ;;  %v80_v5 = vmul.f32 %v5569_v2, %v5569_v2 }
  0x27   :  { %v5664_v25 = vld [vmem:[%s8193_s2 + $0x30] sm:$0xff]  ;;  %v5679_v28 = vld [vmem:[%s8193_s2 + $0x38] sm:$0xff]  ;;  %v98_v29 = vmul.f32 %v5659_v24, %v5659_v24  ;;  %v5683_v30 = vld [vmem:[#allocation5 + $0x20] sm:$0xff]  ;;  %v99_v32 = vmul.f32 %v5671_v27, %v5671_v27  ;;  %v114_v59 = vmul.f32 %v5659_v24, %v5608_v12  ;;  %v115_v60 = vmul.f32 %v5671_v27, %v5626_v15 }
  0x28   :  { %5326 = vmatmul.mubr.msk.f32.vlgmr.msra.gmra.mrb[0].mxu0 %vm128_vm0, %v5595_v9  ;;  %5389 = vmatmul.mubr.msk.f32.vlgmr.msra.gmra.mrb[0].mxu1 %vm128_vm0, %v91_v7  ;;  %v5688_v31 = vld [vmem:[%s8193_s2 + $0x40] sm:$0xff]  ;;  %v5695_v33 = vld [vmem:[#allocation5 + $0x28] sm:$0xff]  ;;  %v100_v35 = vmul.f32 %v5683_v30, %v5683_v30  ;;  %v68_v36 = vld [vmem:[#allocation5 + $0x30] sm:$0xff]  ;;  %v116_v61 = vmul.f32 %v5683_v30, %v5640_v19 }
  0x29   :  { %5328 = vmatprep.mubr.msk.f32.mxu0 %vm128_vm0, %v5608_v12  ;;  %5391 = vmatprep.mubr.msk.f32.mxu1 %vm128_vm0, %v92_v10  ;;  %v5703_v34 = vld [vmem:[%s8193_s2 + $0x48] sm:$0xff]  ;;  %v101_v37 = vmul.f32 %v5695_v33, %v5695_v33  ;;  %v69_v38 = vld [vmem:[#allocation5 + $0x38] sm:$0xff]  ;;  %v102_v39 = vmul.f32 %v68_v36, %v68_v36  ;;  %v70_v40 = vld [vmem:[#allocation5 + $0x40] sm:$0xff]  ;;  %v117_v62 = vmul.f32 %v5695_v33, %v5655_v22  ;;  %s7989_s2 = sld [smem:[#allocation2 + $0x1]] }
  0x2a   :  { %v103_v41 = vmul.f32 %v69_v38, %v69_v38  ;;  %v71_v42 = vld [vmem:[#allocation5 + $0x48] sm:$0xff]  ;;  %v104_v43 = vmul.f32 %v70_v40, %v70_v40  ;;  %v72_v44 = vld [vmem:[#allocation5 + $0x50] sm:$0xff]  ;;  %v73_v47 = vld [vmem:[#allocation5 + $0x58] sm:$0xff]  ;;  %v118_v63 = vmul.f32 %v68_v36, %v5664_v25  ;;  %v119_v0 = vmul.f32 %v69_v38, %v5679_v28 }
  0x2b   :  { %v105_v45 = vmul.f32 %v71_v42, %v71_v42  ;;  %v106_v46 = vmul.f32 %v72_v44, %v72_v44  ;;  %v74_v48 = vld [vmem:[#allocation5 + $0x60] sm:$0xff]  ;;  %v107_v49 = vmul.f32 %v73_v47, %v73_v47  ;;  %v75_v51 = vld [vmem:[#allocation5 + $0x68] sm:$0xff]  ;;  %v76_v52 = vld [vmem:[#allocation5 + $0x70] sm:$0xff]  ;;  %v120_v1 = vmul.f32 %v70_v40, %v5688_v31 }
  0x2c   :  { %5329 = vmatmul.mubr.msk.f32.gmra.mrb[2].mxu0 %vm128_vm0, %v5626_v15  ;;  %5392 = vmatmul.mubr.msk.f32.gmra.mrb[2].mxu1 %vm128_vm0, %v93_v14  ;;  %v108_v50 = vmul.f32 %v74_v48, %v74_v48  ;;  %v109_v53 = vmul.f32 %v75_v51, %v75_v51  ;;  %v110_v54 = vmul.f32 %v76_v52, %v76_v52  ;;  %v77_v55 = vld [vmem:[#allocation5 + $0x78] sm:$0xff] }
  0x2d   :  { %5331 = vmatprep.mubr.msk.f32.mxu0 %vm128_vm0, %v5640_v19  ;;  %5394 = vmatprep.mubr.msk.f32.mxu1 %vm128_vm0, %v94_v16  ;;  %v111_v56 = vmul.f32 %v77_v55, %v77_v55  ;;  %v121_v3 = vmul.f32 %v71_v42, %v5703_v34  ;;  %v122_v7 = vmul.f32 %v72_v44, %v5576_v4 }
  0x2e   :  { %v81_v10 = vmul.f32 %v5595_v9, %v5595_v9  ;;  %v123_v14 = vmul.f32 %v73_v47, %v5583_v6  ;;  %v82_v16 = vmul.f32 %v5608_v12, %v5608_v12  ;;  %v124_v2 = vmul.f32 %v74_v48, %v5590_v8 }
  0x2f   :  { %v125_v9 = vmul.f32 %v75_v51, %v5602_v11  ;;  %v126_v12 = vmul.f32 %v76_v52, %v5613_v13 }
  0x30   :  { %5332 = vmatmul.mubr.msk.f32.gmra.mrb[4].mxu0 %vm128_vm0, %v5655_v22  ;;  %5395 = vmatmul.mubr.msk.f32.gmra.mrb[4].mxu1 %vm128_vm0, %v95_v20 }
  0x31   :  { %5334 = vmatprep.mubr.msk.f32.mxu0 %vm128_vm0, %v5664_v25  ;;  %5397 = vmatprep.mubr.msk.f32.mxu1 %vm128_vm0, %v96_v23 }
  0x34   :  { %5335 = vmatmul.mubr.msk.f32.gmra.mrb[6].mxu0 %vm128_vm0, %v5679_v28  ;;  %5398 = vmatmul.mubr.msk.f32.gmra.mrb[6].mxu1 %vm128_vm0, %v97_v26 }
  0x35   :  { %5337 = vmatprep.mubr.msk.f32.mxu0 %vm128_vm0, %v5688_v31  ;;  %5400 = vmatprep.mubr.msk.f32.mxu1 %vm128_vm0, %v98_v29 }
  0x38   :  { %5338 = vmatmul.mubr.msk.f32.gmra.mrb[8].mxu0 %vm128_vm0, %v5703_v34  ;;  %5401 = vmatmul.mubr.msk.f32.gmra.mrb[8].mxu1 %vm128_vm0, %v99_v32 }
  0x39   :  { %5340 = vmatprep.mubr.msk.f32.mxu0 %vm128_vm0, %v5576_v4  ;;  %5403 = vmatprep.mubr.msk.f32.mxu1 %vm128_vm0, %v100_v35  ;;  %v83_v4 = vmul.f32 %v5626_v15, %v5626_v15  ;;  %v127_v15 = vmul.f32 %v77_v55, %v5633_v17 }
  0x3c   :  { %5341 = vmatmul.mubr.msk.f32.gmra.mrb[10].mxu0 %vm128_vm0, %v5583_v6  ;;  %5404 = vmatmul.mubr.msk.f32.gmra.mrb[10].mxu1 %vm128_vm0, %v101_v37  ;;  %v84_v6 = vmul.f32 %v5640_v19, %v5640_v19  ;;  %v89_v19 = vmul.f32 %v5703_v34, %v5703_v34 }
  0x3d   :  { %5343 = vmatprep.mubr.msk.f32.mxu0 %vm128_vm0, %v5590_v8  ;;  %5406 = vmatprep.mubr.msk.f32.mxu1 %vm128_vm0, %v102_v39  ;;  %v85_v8 = vmul.f32 %v5655_v22, %v5655_v22 }
  0x40   :  { %5344 = vmatmul.mubr.msk.f32.gmra.mrb[12].mxu0 %vm128_vm0, %v5602_v11  ;;  %5407 = vmatmul.mubr.msk.f32.gmra.mrb[12].mxu1 %vm128_vm0, %v103_v41  ;;  %v86_v11 = vmul.f32 %v5664_v25, %v5664_v25 }
  0x41   :  { %5346 = vmatprep.mubr.msk.f32.mxu0 %vm128_vm0, %v5613_v13  ;;  %5409 = vmatprep.mubr.msk.f32.mxu1 %vm128_vm0, %v104_v43  ;;  %v88_v13 = vmul.f32 %v5688_v31, %v5688_v31 }
  0x44   :  { %5347 = vmatmul.mubr.msk.f32.gmra.mrb[14].mxu0 %vm128_vm0, %v5633_v17  ;;  %5410 = vmatmul.mubr.msk.f32.gmra.mrb[14].mxu1 %vm128_vm0, %v105_v45  ;;  %v5519_v17 = vmov 0.0  }
  0x45   :  { %5349 = vmatprep.mubr.msk.f32.mxu0 %vm128_vm0, %v5635_v18  ;;  %5412 = vmatprep.mubr.msk.f32.mxu1 %vm128_vm0, %v106_v46  ;;  %v87_v18 = vmul.f32 %v5679_v28, %v5679_v28 }
  0x48   :  { %5350 = vmatmul.mubr.msk.f32.gmra.mrb[16].mxu0 %vm128_vm0, %v5647_v21  ;;  %5413 = vmatmul.mubr.msk.f32.gmra.mrb[16].mxu1 %vm128_vm0, %v107_v49 }
  0x49   :  { %5352 = vmatprep.mubr.msk.f32.mxu0 %vm128_vm0, %v5659_v24  ;;  %5415 = vmatprep.mubr.msk.f32.mxu1 %vm128_vm0, %v108_v50 }
  0x4c   :  { %5353 = vmatmul.mubr.msk.f32.gmra.mrb[18].mxu0 %vm128_vm0, %v5671_v27  ;;  %5416 = vmatmul.mubr.msk.f32.gmra.mrb[18].mxu1 %vm128_vm0, %v109_v53 }
  0x4d   :  { %5355 = vmatprep.mubr.msk.f32.mxu0 %vm128_vm0, %v5683_v30  ;;  %5418 = vmatprep.mubr.msk.f32.mxu1 %vm128_vm0, %v110_v54 }
  0x50   :  { %5356 = vmatmul.mubr.msk.f32.gmra.mrb[20].mxu0 %vm128_vm0, %v5695_v33  ;;  %5419 = vmatmul.mubr.msk.f32.gmra.mrb[20].mxu1 %vm128_vm0, %v111_v56 }
  0x51   :  { %5358 = vmatprep.mubr.msk.f32.mxu0 %vm128_vm0, %v68_v36  ;;  %5421 = vmatprep.mubr.msk.f32.mxu1 %vm128_vm0, %v112_v57 }
  0x54   :  { %5359 = vmatmul.mubr.msk.f32.gmra.mrb[22].mxu0 %vm128_vm0, %v69_v38  ;;  %5422 = vmatmul.mubr.msk.f32.gmra.mrb[22].mxu1 %vm128_vm0, %v113_v58 }
  0x55   :  { %5361 = vmatprep.mubr.msk.f32.mxu0 %vm128_vm0, %v70_v40  ;;  %5424 = vmatprep.mubr.msk.f32.mxu1 %vm128_vm0, %v114_v59 }
  0x58   :  { %5362 = vmatmul.mubr.msk.f32.gmra.mrb[24].mxu0 %vm128_vm0, %v71_v42  ;;  %5425 = vmatmul.mubr.msk.f32.gmra.mrb[24].mxu1 %vm128_vm0, %v115_v60 }
  0x59   :  { %5364 = vmatprep.mubr.msk.f32.mxu0 %vm128_vm0, %v72_v44  ;;  %5427 = vmatprep.mubr.msk.f32.mxu1 %vm128_vm0, %v116_v61 }
  0x5c   :  { %5365 = vmatmul.mubr.msk.f32.gmra.mrb[26].mxu0 %vm128_vm0, %v73_v47  ;;  %5428 = vmatmul.mubr.msk.f32.gmra.mrb[26].mxu1 %vm128_vm0, %v117_v62 }
  0x5d   :  { %5367 = vmatprep.mubr.msk.f32.mxu0 %vm128_vm0, %v74_v48  ;;  %5430 = vmatprep.mubr.msk.f32.mxu1 %vm128_vm0, %v118_v63 }
  0x60   :  { %5368 = vmatmul.mubr.msk.f32.gmra.mrb[28].mxu0 %vm128_vm0, %v75_v51  ;;  %5431 = vmatmul.mubr.msk.f32.gmra.mrb[28].mxu1 %vm128_vm0, %v119_v0 }
  0x61   :  { %5370 = vmatprep.mubr.msk.f32.mxu0 %vm128_vm0, %v76_v52  ;;  %5433 = vmatprep.mubr.msk.f32.mxu1 %vm128_vm0, %v120_v1 }
  0x64   :  { %5371 = vmatmul.mubr.msk.f32.gmra.mrb[30].mxu0 %vm128_vm0, %v77_v55  ;;  %5434 = vmatmul.mubr.msk.f32.gmra.mrb[30].mxu1 %vm128_vm0, %v121_v3 }
  0x65   :  { %5373 = vmatprep.mubr.msk.f32.mxu0 %vm128_vm0, %v80_v5  ;;  %5436 = vmatprep.mubr.msk.f32.mxu1 %vm128_vm0, %v122_v7 }
  0x68   :  { %5374 = vmatmul.mubr.msk.f32.gmra.mrb[32].mxu0 %vm128_vm0, %v81_v10  ;;  %5437 = vmatmul.mubr.msk.f32.gmra.mrb[32].mxu1 %vm128_vm0, %v123_v14 }
  0x69   :  { %5376 = vmatprep.mubr.msk.f32.mxu0 %vm128_vm0, %v82_v16  ;;  %5439 = vmatprep.mubr.msk.f32.mxu1 %vm128_vm0, %v124_v2 }
  0x6c   :  { %5377 = vmatmul.mubr.msk.f32.gmra.mrb[34].mxu0 %vm128_vm0, %v83_v4  ;;  %5440 = vmatmul.mubr.msk.f32.gmra.mrb[34].mxu1 %vm128_vm0, %v125_v9 }
  0x6d   :  { %5379 = vmatprep.mubr.msk.f32.mxu0 %vm128_vm0, %v84_v6  ;;  %5442 = vmatprep.mubr.msk.f32.mxu1 %vm128_vm0, %v126_v12 }
  0x70   :  { %5380 = vmatmul.mubr.msk.f32.gmra.mrb[36].mxu0 %vm128_vm0, %v85_v8  ;;  %5443 = vmatmul.mubr.msk.f32.gmra.mrb[36].mxu1 %vm128_vm0, %v127_v15 }
  0x71   :  { %5382 = vmatprep.mubr.msk.f32.mxu0 %vm128_vm0, %v86_v11  ;;  %5445 = vmatprep.mubr.f32.mxu1 %v5519_v17 }
  0x74   :  { %5383 = vmatmul.mubr.msk.f32.gmra.mrb[38].mxu0 %vm128_vm0, %v87_v18  ;;  %5446 = vmatmul.mubr.f32.gmra.mrb[38].mxu1 %v5519_v17 }
  0x75   :  { %5385 = vmatprep.mubr.msk.f32.mxu0 %vm128_vm0, %v88_v13 }
  0x78   :  { %5386 = vmatmul.mubr.msk.f32.gmra.mrb[40].mxu0 %vm128_vm0, %v89_v19  ;;  %vm5107_vm0 = vcmask 48128  }
  0xfb   :  { %v5327_v20 = vpop.f32.mrb[0].mxu0  ;;  %v5826_v21 = vpop.f32.mrb[0].mxu1 }
  0xfc   :  { %v5828_v22 = vmul.f32 0.0010283801, %v5327_v20  ;;  %v5830_v23 = vmul.f32 0.007598758, %v5327_v20  ;;  %v5832_v24 = vmul.f32 0.036000773, %v5327_v20 }
  0xfd   :  { %v1896_v25 = vmul.f32 0.10936069, %v5327_v20  ;;  %v2380_v26 = vmul.f32 0.21300554, %v5327_v20  ;;  %v2864_v27 = vmul.f32 0.26601171, %v5327_v20 }
  0xfe   :  { %v438_v28 = vpop.f32.mrb[1].mxu0  ;;  %v1091_v29 = vrot.slane %v5830_v23, 1  ;;  %v1575_v30 = vrot.slane %v5832_v24, 2  ;;  %v4239_v32 = vrot.slane %v5828_v22, 2  ;;  %v5839_v34 = vpop.f32.mrb[1].mxu1 }
  0xff   :  { %v2059_v31 = vrot.slane %v1896_v25, 3  ;;  %v5837_v33 = vpop.f32.mrb[2].mxu0  ;;  %v2543_v35 = vrot.slane %v2380_v26, 4  ;;  %v3027_v36 = vrot.slane %v2864_v27, 5  ;;  %v3349_v37 = vrot.slane %v2380_v26, 6  ;;  %v5843_v52 = vpop.f32.mrb[2].mxu1 }
 0x100   :  { %v927_v38 = vmul.f32 0.007598758, %v438_v28  ;;  %v448_v39 = vpop.f32.mrb[3].mxu0  ;;  %v1411_v40 = vmul.f32 0.036000773, %v438_v28  ;;  %v3671_v43 = vrot.slane %v1896_v25, 7 }
 0x101   :  { %v1895_v41 = vmul.f32 0.10936069, %v438_v28  ;;  %v2379_v42 = vmul.f32 0.21300554, %v438_v28  ;;  %v847_v44 = vmul.f32 0.0010283801, %v438_v28 }
 0x102   :  { %v1090_v45 = vrot.slane %v927_v38, 1  ;;  %v2863_v46 = vmul.f32 0.26601171, %v438_v28  ;;  %v1574_v47 = vrot.slane %v1411_v40, 2  ;;  %v5849_v56 = vmul.f32 0.007598758, %v5837_v33 }
 0x103   :  { %v2058_v48 = vrot.slane %v1895_v41, 3  ;;  %v2542_v49 = vrot.slane %v2379_v42, 4  ;;  %v3348_v50 = vrot.slane %v2379_v42, 6  ;;  %v5841_v51 = vpop.f32.mrb[4].mxu0  ;;  %v3670_v55 = vrot.slane %v1895_v41, 7  ;;  %v5853_v58 = vpop.f32.mrb[3].mxu1 }
 0x104   :  { %v1092_v53 = vsel %vm1089_vm1, %v1090_v45, %v1091_v29  ;;  %v3026_v54 = vrot.slane %v2863_v46, 5  ;;  %v5851_v57 = vpop.f32.mrb[5].mxu0  ;;  %v1576_v60 = vsel %vm1573_vm2, %v1574_v47, %v1575_v30  ;;  %v5858_v63 = vpop.f32.mrb[4].mxu1  ;;  %v5864_v5 = vmul.f32 0.0010283801, %v5826_v21 }
 0x105   :  { %v1331_v59 = vadd.f32 %v1092_v53, %v847_v44  ;;  %v2060_v61 = vsel %vm2057_vm3, %v2058_v48, %v2059_v31  ;;  %v2544_v62 = vsel %vm2541_vm4, %v2542_v49, %v2543_v35  ;;  %v3350_v1 = vsel %vm3347_vm6, %v3348_v50, %v3349_v37  ;;  %v5866_v7 = vpop.f32.mrb[5].mxu1 }
 0x106   :  { %v3028_v0 = vsel %vm3025_vm5, %v3026_v54, %v3027_v36  ;;  %v3672_v3 = vsel %vm3669_vm7, %v3670_v55, %v3671_v43  ;;  %v5869_v14 = vmul.f32 0.036000773, %v5837_v33  ;;  %v1898_v16 = vmul.f32 0.10936069, %v5837_v33 }
 0x107   :  { %v1815_v10 = vadd.f32 %v1576_v60, %v1331_v59  ;;  %v2382_v2 = vmul.f32 0.21300554, %v5837_v33  ;;  %v8196_v4 = vrot.slane %v5849_v56, 1  ;;  %v2866_v9 = vmul.f32 0.26601171, %v5837_v33  ;;  %v5875_v12 = vpop.f32.mrb[6].mxu0 }
 0x108   :  { %v849_v6 = vmul.f32 0.0010283801, %v448_v39  ;;  %v1579_v15 = vrot.slane %v5869_v14, 2  ;;  %v2063_v11 = vrot.slane %v1898_v16, 3  ;;  %v5878_v13 = vpop.f32.mrb[7].mxu0  ;;  %v5880_v17 = vpop.f32.mrb[6].mxu1 }
 0x109   :  { %v2299_v8 = vadd.f32 %v2060_v61, %v1815_v10  ;;  %v2547_v18 = vrot.slane %v2382_v2, 4  ;;  %v3031_v19 = vrot.slane %v2866_v9, 5  ;;  %v3353_v20 = vrot.slane %v2382_v2, 6  ;;  %v5882_v27 = vpop.f32.mrb[7].mxu1 }
 0x10a   :  { %v3675_v25 = vrot.slane %v1898_v16, 7  ;;  %v929_v26 = vmul.f32 0.007598758, %v448_v39  ;;  %v1413_v30 = vmul.f32 0.036000773, %v448_v39  ;;  %v4240_v38 = vrot.slane %v849_v6, 2 }
 0x10b   :  { %v2783_v28 = vadd.f32 %v2544_v62, %v2299_v8  ;;  %v1897_v31 = vmul.f32 0.10936069, %v448_v39  ;;  %v2381_v35 = vmul.f32 0.21300554, %v448_v39  ;;  %v2865_v37 = vmul.f32 0.26601171, %v448_v39 }
 0x10c   :  { %v1093_v36 = vrot.slane %v929_v26, 1  ;;  %v5885_v40 = vmul.f32 0.007598758, %v5826_v21  ;;  %v1577_v42 = vrot.slane %v1413_v30, 2  ;;  %v5887_v45 = vpop.f32.mrb[8].mxu0  ;;  %v5889_v46 = vpop.f32.mrb[8].mxu1  ;;  %v4241_v8 = vsel %vm1573_vm2, %v4239_v32, %v4240_v38 }
 0x10d   :  { %v3267_v41 = vadd.f32 %v3028_v0, %v2783_v28  ;;  %v2061_v43 = vrot.slane %v1897_v31, 3  ;;  %v2545_v44 = vrot.slane %v2381_v35, 4  ;;  %v3029_v48 = vrot.slane %v2865_v37, 5  ;;  %v5897_v50 = vpop.f32.mrb[9].mxu0  ;;  %v5899_v53 = vpop.f32.mrb[9].mxu1 }
 0x10e   :  { %v1094_v47 = vsel %vm1089_vm1, %v1091_v29, %v1093_v36  ;;  %v1096_v39 = vsel %vm1089_vm1, %v1093_v36, %v8196_v4  ;;  %v3351_v49 = vrot.slane %v2381_v35, 6  ;;  %v1580_v59 = vsel %vm1573_vm2, %v1577_v42, %v1579_v15 }
 0x10f   :  { %v3589_v54 = vadd.f32 %v3350_v1, %v3267_v41  ;;  %v1333_v55 = vadd.f32 %v1096_v39, %v849_v6  ;;  %v2064_v60 = vsel %vm2057_vm3, %v2061_v43, %v2063_v11  ;;  %v5903_v61 = vpop.f32.mrb[10].mxu0  ;;  %v5905_v23 = vpop.f32.mrb[10].mxu1  ;;  %v2548_v29 = vsel %vm2541_vm4, %v2545_v44, %v2547_v18 }
 0x110   :  { %v3032_v62 = vsel %vm3025_vm5, %v3029_v48, %v3031_v19  ;;  %v3354_v0 = vsel %vm3347_vm6, %v3351_v49, %v3353_v20  ;;  %v3673_v10 = vrot.slane %v1897_v31, 7  ;;  %v5910_v16 = vpop.f32.mrb[11].mxu0  ;;  %v5912_v2 = vpop.f32.mrb[11].mxu1  ;;  %v5915_v9 = vmul.f32 0.0010283801, %v5837_v33 }
 0x111   :  { %v3911_v1 = vadd.f32 %v3672_v3, %v3589_v54  ;;  %v1817_v6 = vadd.f32 %v1580_v59, %v1333_v55  ;;  %v5922_v11 = vmul.f32 0.036000773, %v5826_v21  ;;  %v1938_v18 = vmul.f32 0.10936069, %v5826_v21 }
 0x112   :  { %v3676_v15 = vsel %vm3669_vm7, %v3673_v10, %v3675_v25  ;;  %v2422_v19 = vmul.f32 0.21300554, %v5826_v21  ;;  %v8203_v33 = vrot.slane %v5885_v40, 1  ;;  %v2906_v32 = vmul.f32 0.26601171, %v5826_v21 }
 0x113   :  { %v2301_v20 = vadd.f32 %v2064_v60, %v1817_v6  ;;  %v3991_v3 = vadd.f32 %v3911_v1, %v5832_v24  ;;  %v5929_v28 = vpop.f32.mrb[12].mxu0  ;;  %v1659_v22 = vrot.slane %v5922_v11, 2  ;;  %v5934_v25 = vmul.f32 0.0010283801, %v5841_v51  ;;  %v5978_v26 = vpop.f32.mrb[12].mxu1 }
 0x114   :  { %v5936_v30 = vpop.f32.mrb[13].mxu0  ;;  %v2143_v36 = vrot.slane %v1938_v18, 3  ;;  %v2627_v37 = vrot.slane %v2422_v19, 4  ;;  %v5939_v24 = vmul.f32 0.007598758, %v5841_v51  ;;  %v3111_v39 = vrot.slane %v2906_v32, 5 }
 0x115   :  { %v2785_v31 = vadd.f32 %v2548_v29, %v2301_v20  ;;  %v4076_v35 = vadd.f32 %v3991_v3, %v1094_v47  ;;  %v5942_v38 = vmul.f32 0.036000773, %v5841_v51  ;;  %v5945_v41 = vmul.f32 0.10936069, %v5841_v51  ;;  %8288 = vst [vmem:[#allocation12_spill] sm:$0xff] %v5978_v26 }
 0x116   :  { %v5950_v43 = vmul.f32 0.21300554, %v5841_v51  ;;  %v5953_v44 = vmul.f32 0.26601171, %v5841_v51  ;;  %v3433_v48 = vrot.slane %v2422_v19, 6  ;;  %v3755_v49 = vrot.slane %v1938_v18, 7 }
 0x117   :  { %v3269_v42 = vadd.f32 %v3032_v62, %v2785_v31  ;;  %v5947_v21 = vadd.f32 %v4241_v8, %v4076_v35  ;;  %v5955_v47 = vpop.f32.mrb[14].mxu0  ;;  %v1583_v60 = vrot.slane %v5942_v38, 2  ;;  %v2067_v29 = vrot.slane %v5945_v41, 3 }
 0x118   :  { %v5958_v55 = vpop.f32.mrb[15].mxu0  ;;  %v3679_v62 = vrot.slane %v5945_v41, 7  ;;  %v2551_v10 = vrot.slane %v5950_v43, 4  ;;  %v3035_v51 = vrot.slane %v5953_v44, 5  ;;  %v5966_v1 = vmul.f32 0.0010283801, %v5839_v34 }
 0x119   :  { %8284 = vst [vmem:[#allocation8_spill] sm:$0xff] %v5947_v21  ;;  %8285 = vst [vmem:[#allocation9_spill] sm:$0xff] %v5958_v55  ;;  %v3591_v59 = vadd.f32 %v3354_v0, %v3269_v42  ;;  %v5969_v6 = vmul.f32 0.007598758, %v5839_v34  ;;  %v1453_v18 = vmul.f32 0.036000773, %v5839_v34 }
 0x11a   :  { %8286 = vst [vmem:[#allocation10_spill] sm:$0xff] %v5966_v1  ;;  %v1937_v0 = vmul.f32 0.10936069, %v5839_v34  ;;  %v2421_v19 = vmul.f32 0.21300554, %v5839_v34  ;;  %v3357_v20 = vrot.slane %v5950_v43, 6 }
 0x11b   :  { %8287 = vst [vmem:[#allocation11_spill] sm:$0xff] %v5969_v6  ;;  %v3913_v8 = vadd.f32 %v3676_v15, %v3591_v59  ;;  %v8202_v3 = vrot.slane %v5969_v6, 1  ;;  %v2905_v32 = vmul.f32 0.26601171, %v5839_v34  ;;  %v851_v31 = vmul.f32 0.0010283801, %v5851_v57 }
 0x11c   :  { %v1657_v35 = vrot.slane %v1453_v18, 2  ;;  %v2141_v41 = vrot.slane %v1937_v0, 3  ;;  %v2625_v42 = vrot.slane %v2421_v19, 4  ;;  %v3431_v44 = vrot.slane %v2421_v19, 6  ;;  %v5980_v15 = vpop.f32.mrb[16].mxu0 }
 0x11d   :  { %8289 = vst [vmem:[#allocation13_spill] sm:$0xff] %v5980_v15  ;;  %v1176_v43 = vsel %vm1089_vm1, %v8202_v3, %v8203_v33  ;;  %v3109_v59 = vrot.slane %v2905_v32, 5  ;;  %v3753_v54 = vrot.slane %v1937_v0, 7  ;;  %v931_v34 = vmul.f32 0.007598758, %v5851_v57 }
 0x11e   :  { %v1373_v4 = vadd.f32 %v1176_v43, %v5966_v1  ;;  %v1660_v18 = vsel %vm1573_vm2, %v1657_v35, %v1659_v22  ;;  %v2144_v19 = vsel %vm2057_vm3, %v2141_v41, %v2143_v36  ;;  %v2628_v21 = vsel %vm2541_vm4, %v2625_v42, %v2627_v37 }
 0x11f   :  { %v3112_v15 = vsel %vm3025_vm5, %v3109_v59, %v3111_v39  ;;  %v3434_v26 = vsel %vm3347_vm6, %v3431_v44, %v3433_v48  ;;  %v3756_v6 = vsel %vm3669_vm7, %v3753_v54, %v3755_v49  ;;  %v1097_v55 = vrot.slane %v931_v34, 1  ;;  %v6006_v54 = vpop.f32.mrb[13].mxu1 }
 0x120   :  { %v1857_v3 = vadd.f32 %v1660_v18, %v1373_v4  ;;  %v1415_v0 = vmul.f32 0.036000773, %v5851_v57  ;;  %v1899_v32 = vmul.f32 0.10936069, %v5851_v57  ;;  %v2383_v43 = vmul.f32 0.21300554, %v5851_v57 }
 0x121   :  { %v8290_v22 = vrot.slane %v5849_v56, 1  ;;  %v8291_v37 = vrot.slane %v5939_v24, 1  ;;  %v2867_v48 = vmul.f32 0.26601171, %v5851_v57  ;;  %v3993_v49 = vadd.f32 %v3913_v8, %v5869_v14 }
 0x122   :  { %v2341_v4 = vadd.f32 %v2144_v19, %v1857_v3  ;;  %v1581_v41 = vrot.slane %v1415_v0, 2  ;;  %v2065_v42 = vrot.slane %v1899_v32, 3  ;;  %v2549_v44 = vrot.slane %v2383_v43, 4 }
 0x123   :  { %v1098_v36 = vsel %vm1089_vm1, %v8290_v22, %v1097_v55  ;;  %v1100_v39 = vsel %vm1089_vm1, %v1097_v55, %v8291_v37  ;;  %v3033_v59 = vrot.slane %v2867_v48, 5  ;;  %v3355_v34 = vrot.slane %v2383_v43, 6  ;;  %v6010_v37 = vpop.f32.mrb[17].mxu0 }
 0x124   :  { %v1335_v35 = vadd.f32 %v1100_v39, %v851_v31  ;;  %v3677_v56 = vrot.slane %v1899_v32, 7  ;;  %v2825_v18 = vadd.f32 %v2628_v21, %v2341_v4  ;;  %v1584_v22 = vsel %vm1573_vm2, %v1581_v41, %v1583_v60  ;;  %8292 = vst [vmem:[#allocation14_spill] sm:$0xff] %v6010_v37 }
 0x125   :  { %v2068_v33 = vsel %vm2057_vm3, %v2065_v42, %v2067_v29  ;;  %v4078_v55 = vadd.f32 %v3993_v49, %v1098_v36  ;;  %v2552_v14 = vsel %vm2541_vm4, %v2549_v44, %v2551_v10  ;;  %v3036_v8 = vsel %vm3025_vm5, %v3033_v59, %v3035_v51 }
 0x126   :  { %v1819_v57 = vadd.f32 %v1584_v22, %v1335_v35  ;;  %v3358_v3 = vsel %vm3347_vm6, %v3355_v34, %v3357_v20  ;;  %v4242_v19 = vrot.slane %v5915_v9, 2  ;;  %v3309_v0 = vadd.f32 %v3112_v15, %v2825_v18 }
 0x127   :  { %v3680_v32 = vsel %vm3669_vm7, %v3677_v56, %v3679_v62  ;;  %v4244_v21 = vrot.slane %v851_v31, 2  ;;  %v6018_v60 = vmul.f32 0.007598758, %v5843_v52  ;;  %v6021_v29 = vmul.f32 0.036000773, %v5843_v52  ;;  %v6073_v62 = vpop.f32.mrb[18].mxu0 }
 0x128   :  { %v2303_v43 = vadd.f32 %v2068_v33, %v1819_v57  ;;  %v6024_v36 = vmul.f32 0.10936069, %v5843_v52  ;;  %v3631_v10 = vadd.f32 %v3434_v26, %v3309_v0  ;;  %v2424_v20 = vmul.f32 0.21300554, %v5843_v52  ;;  %8296 = vst [vmem:[#allocation18_spill] sm:$0xff] %v6073_v62 }
 0x129   :  { %v4245_v51 = vsel %vm1573_vm2, %v4242_v19, %v4244_v21  ;;  %v2908_v9 = vmul.f32 0.26601171, %v5843_v52  ;;  %v6034_v48 = vmul.f32 0.0010283801, %v5843_v52  ;;  %v1663_v26 = vrot.slane %v6021_v29, 2  ;;  %v6062_v21 = vpop.f32.mrb[14].mxu1 }
 0x12a   :  { %v2787_v31 = vadd.f32 %v2552_v14, %v2303_v43  ;;  %v6031_v15 = vadd.f32 %v4245_v51, %v4078_v55  ;;  %v3953_v39 = vadd.f32 %v3756_v6, %v3631_v10  ;;  %v2147_v35 = vrot.slane %v6024_v36, 3  ;;  %8295 = vst [vmem:[#allocation17_spill] sm:$0xff] %v6062_v21 }
 0x12b   :  { %8294 = vst [vmem:[#allocation16_spill] sm:$0xff] %v6034_v48  ;;  %v2631_v41 = vrot.slane %v2424_v20, 4  ;;  %v3115_v42 = vrot.slane %v2908_v9, 5  ;;  %v3437_v44 = vrot.slane %v2424_v20, 6  ;;  %v6040_v59 = vmul.f32 0.0010283801, %v5875_v12 }
 0x12c   :  { %8293 = vst [vmem:[#allocation15_spill] sm:$0xff] %v6031_v15  ;;  %v3271_v4 = vadd.f32 %v3036_v8, %v2787_v31  ;;  %v6043_v34 = vmul.f32 0.007598758, %v5875_v12  ;;  %v4033_v6 = vadd.f32 %v3953_v39, %v5922_v11  ;;  %v6047_v56 = vmul.f32 0.036000773, %v5875_v12 }
 0x12d   :  { %v6050_v18 = vmul.f32 0.10936069, %v5875_v12  ;;  %v6053_v22 = vmul.f32 0.21300554, %v5875_v12  ;;  %v3759_v55 = vrot.slane %v6024_v36, 7  ;;  %v8297_v57 = vrot.slane %v5885_v40, 1 }
 0x12e   :  { %v3593_v52 = vadd.f32 %v3358_v3, %v3271_v4  ;;  %v2870_v14 = vmul.f32 0.26601171, %v5875_v12  ;;  %v891_v8 = vmul.f32 0.0010283801, %v5853_v58  ;;  %v1587_v11 = vrot.slane %v6047_v56, 2 }
 0x12f   :  { %v2071_v3 = vrot.slane %v6050_v18, 3  ;;  %v2555_v0 = vrot.slane %v6053_v22, 4  ;;  %v3361_v10 = vrot.slane %v6053_v22, 6  ;;  %v3683_v36 = vrot.slane %v6050_v18, 7 }
 0x130   :  { %v3915_v19 = vadd.f32 %v3680_v32, %v3593_v52  ;;  %v3039_v43 = vrot.slane %v2870_v14, 5  ;;  %v971_v51 = vmul.f32 0.007598758, %v5853_v58  ;;  %v1455_v12 = vmul.f32 0.036000773, %v5853_v58 }
 0x131   :  { %v1939_v20 = vmul.f32 0.10936069, %v5853_v58  ;;  %v2423_v32 = vmul.f32 0.21300554, %v5853_v58  ;;  %v2907_v39 = vmul.f32 0.26601171, %v5853_v58 }
 0x132   :  { %v3995_v9 = vadd.f32 %v3915_v19, %v5942_v38  ;;  %v1177_v31 = vrot.slane %v971_v51, 1  ;;  %v4324_v4 = vrot.slane %v891_v8, 2  ;;  %v853_v52 = vmul.f32 0.0010283801, %v5878_v13 }
 0x133   :  { %v1661_v14 = vrot.slane %v1455_v12, 2  ;;  %v2145_v22 = vrot.slane %v1939_v20, 3  ;;  %v2629_v33 = vrot.slane %v2423_v32, 4  ;;  %v3435_v18 = vrot.slane %v2423_v32, 6 }
 0x134   :  { %v1178_v49 = vsel %vm1089_vm1, %v8297_v57, %v1177_v31  ;;  %v8298_v1 = vrot.slane %v6018_v60, 1  ;;  %v3113_v19 = vrot.slane %v2907_v39, 5  ;;  %v3757_v51 = vrot.slane %v1939_v20, 7 }
 0x135   :  { %v1664_v15 = vsel %vm1573_vm2, %v1661_v14, %v1663_v26  ;;  %v2148_v12 = vsel %vm2057_vm3, %v2145_v22, %v2147_v35  ;;  %v2632_v21 = vsel %vm2541_vm4, %v2629_v33, %v2631_v41  ;;  %v3438_v62 = vsel %vm3347_vm6, %v3435_v18, %v3437_v44 }
 0x136   :  { %v1180_v38 = vsel %vm1089_vm1, %v1177_v31, %v8298_v1  ;;  %v3116_v32 = vsel %vm3025_vm5, %v3113_v19, %v3115_v42  ;;  %v3760_v40 = vsel %vm3669_vm7, %v3757_v51, %v3759_v55  ;;  %v6087_v57 = vadd.f32 %v4033_v6, %v1178_v49 }
 0x137   :  { %v1375_v58 = vadd.f32 %v1180_v38, %v891_v8  ;;  %v8300_v1 = vrot.slane %v5864_v5, 2  ;;  %v933_v26 = vmul.f32 0.007598758, %v5878_v13  ;;  %v1417_v35 = vmul.f32 0.036000773, %v5878_v13  ;;  %v6096_v8 = vpop.f32.mrb[15].mxu1 }
 0x138   :  { %8299 = vst [vmem:[#allocation19_spill] sm:$0xff] %v6087_v57  ;;  %v1901_v33 = vmul.f32 0.10936069, %v5878_v13  ;;  %v2385_v41 = vmul.f32 0.21300554, %v5878_v13  ;;  %v4248_v6 = vrot.slane %v853_v52, 2 }
 0x139   :  { %v1859_v37 = vadd.f32 %v1664_v15, %v1375_v58  ;;  %v6092_v20 = vsel %vm1573_vm2, %v8300_v1, %v4324_v4  ;;  %v2869_v42 = vmul.f32 0.26601171, %v5878_v13  ;;  %v1101_v44 = vrot.slane %v933_v26, 1  ;;  %v6108_v13 = vpop.f32.mrb[19].mxu0 }
 0x13a   :  { %8301 = vst [vmem:[#allocation20_spill] sm:$0xff] %v6092_v20  ;;  %v1585_v15 = vrot.slane %v1417_v35, 2  ;;  %v2069_v5 = vrot.slane %v1901_v33, 3  ;;  %v2553_v55 = vrot.slane %v2385_v41, 4  ;;  %v3359_v39 = vrot.slane %v2385_v41, 6 }
 0x13b   :  { %v2343_v49 = vadd.f32 %v2148_v12, %v1859_v37  ;;  %v3037_v31 = vrot.slane %v2869_v42, 5  ;;  %v8302_v14 = vrot.slane %v5939_v24, 1  ;;  %v8303_v18 = vrot.slane %v6043_v34, 1 }
 0x13c   :  { %v1588_v19 = vsel %vm1573_vm2, %v1585_v15, %v1587_v11  ;;  %v2072_v51 = vsel %vm2057_vm3, %v2069_v5, %v2071_v3  ;;  %v2556_v58 = vsel %vm2541_vm4, %v2553_v55, %v2555_v0  ;;  %v3362_v24 = vsel %vm3347_vm6, %v3359_v39, %v3361_v10 }
 0x13d   :  { %v2827_v4 = vadd.f32 %v2632_v21, %v2343_v49  ;;  %v1102_v22 = vsel %vm1089_vm1, %v8302_v14, %v1101_v44  ;;  %v1104_v38 = vsel %vm1089_vm1, %v1101_v44, %v8303_v18  ;;  %v3040_v12 = vsel %vm3025_vm5, %v3037_v31, %v3039_v43 }
 0x13e   :  { %v1337_v37 = vadd.f32 %v1104_v38, %v853_v52  ;;  %v3681_v1 = vrot.slane %v1901_v33, 7  ;;  %v4080_v26 = vadd.f32 %v3995_v9, %v1102_v22  ;;  %v8304_v42 = vrot.slane %v5934_v25, 2 }
 0x13f   :  { %v3311_v21 = vadd.f32 %v3116_v32, %v2827_v4  ;;  %v6119_v52 = vmul.f32 0.007598758, %v5858_v63  ;;  %v6125_v43 = vmul.f32 0.036000773, %v5858_v63  ;;  %v1942_v32 = vmul.f32 0.10936069, %v5858_v63 }
 0x140   :  { %v1821_v41 = vadd.f32 %v1588_v19, %v1337_v37  ;;  %v4249_v11 = vsel %vm1573_vm2, %v8304_v42, %v4248_v6  ;;  %v3684_v0 = vsel %vm3669_vm7, %v3681_v1, %v3683_v36  ;;  %v2426_v25 = vmul.f32 0.21300554, %v5858_v63 }
 0x141   :  { %v3633_v3 = vadd.f32 %v3438_v62, %v3311_v21  ;;  %v6122_v49 = vadd.f32 %v4249_v11, %v4080_v26  ;;  %8306 = vst [vmem:[#allocation22_spill] sm:$0xff] %v6125_v43  ;;  %v6131_v44 = vmul.f32 0.0010283801, %v5858_v63  ;;  %v8209_v62 = vrot.slane %v6119_v52, 1  ;;  %v6159_v26 = vpop.f32.mrb[16].mxu1 }
 0x142   :  { %v2305_v9 = vadd.f32 %v2072_v51, %v1821_v41  ;;  %v2910_v36 = vmul.f32 0.26601171, %v5858_v63  ;;  %v1667_v6 = vrot.slane %v6125_v43, 2  ;;  %v2151_v5 = vrot.slane %v1942_v32, 3 }
 0x143   :  { %8305 = vst [vmem:[#allocation21_spill] sm:$0xff] %v6122_v49  ;;  %v3955_v33 = vadd.f32 %v3760_v40, %v3633_v3  ;;  %8307 = vst [vmem:[#allocation23_spill] sm:$0xff] %v6131_v44  ;;  %v2635_v55 = vrot.slane %v2426_v25, 4  ;;  %v3441_v39 = vrot.slane %v2426_v25, 6  ;;  %v3763_v4 = vrot.slane %v1942_v32, 7  ;;  %v6165_v3 = vpop.f32.mrb[17].mxu1 }
 0x144   :  { %v2789_v15 = vadd.f32 %v2556_v58, %v2305_v9  ;;  %v3119_v31 = vrot.slane %v2910_v36, 5  ;;  %v6137_v14 = vmul.f32 0.0010283801, %v5887_v45  ;;  %v6140_v40 = vmul.f32 0.007598758, %v5887_v45 }
 0x145   :  { %v6143_v18 = vmul.f32 0.036000773, %v5887_v45  ;;  %v6146_v63 = vmul.f32 0.10936069, %v5887_v45  ;;  %v6150_v19 = vmul.f32 0.21300554, %v5887_v45  ;;  %v4035_v51 = vadd.f32 %v3955_v33, %v6021_v29 }
 0x146   :  { %v3273_v22 = vadd.f32 %v3040_v12, %v2789_v15  ;;  %v6153_v37 = vmul.f32 0.26601171, %v5887_v45  ;;  %v973_v9 = vmul.f32 0.007598758, %v5866_v7  ;;  %v1457_v32 = vmul.f32 0.036000773, %v5866_v7 }
 0x147   :  { %v1591_v21 = vrot.slane %v6143_v18, 2  ;;  %v2075_v41 = vrot.slane %v6146_v63, 3  ;;  %v2559_v42 = vrot.slane %v6150_v19, 4  ;;  %v3365_v45 = vrot.slane %v6150_v19, 6 }
 0x148   :  { %v3595_v58 = vadd.f32 %v3362_v24, %v3273_v22  ;;  %v3043_v11 = vrot.slane %v6153_v37, 5  ;;  %v6168_v24 = vmul.f32 0.0010283801, %v5866_v7  ;;  %v1941_v25 = vmul.f32 0.10936069, %v5866_v7 }
 0x149   :  { %v2425_v33 = vmul.f32 0.21300554, %v5866_v7  ;;  %v2909_v36 = vmul.f32 0.26601171, %v5866_v7  ;;  %v3687_v15 = vrot.slane %v6146_v63, 7  ;;  %v1181_v22 = vrot.slane %v973_v9, 1 }
 0x14a   :  { %v3917_v29 = vadd.f32 %v3684_v0, %v3595_v58  ;;  %8308 = vst [vmem:[#allocation24_spill] sm:$0xff] %v6168_v24  ;;  %v1665_v19 = vrot.slane %v1457_v32, 2  ;;  %v855_v37 = vmul.f32 0.0010283801, %v5897_v50  ;;  %v2149_v0 = vrot.slane %v1941_v25, 3 }
 0x14b   :  { %v2633_v58 = vrot.slane %v2425_v33, 4  ;;  %v3117_v38 = vrot.slane %v2909_v36, 5  ;;  %v3439_v35 = vrot.slane %v2425_v33, 6  ;;  %v8309_v1 = vrot.slane %v6018_v60, 1 }
 0x14c   :  { %v1184_v12 = vsel %vm1089_vm1, %v1181_v22, %v8209_v62  ;;  %v1668_v7 = vsel %vm1573_vm2, %v1665_v19, %v1667_v6  ;;  %v3761_v20 = vrot.slane %v1941_v25, 7  ;;  %v2152_v9 = vsel %vm2057_vm3, %v2149_v0, %v2151_v5 }
 0x14d   :  { %v1182_v10 = vsel %vm1089_vm1, %v8309_v1, %v1181_v22  ;;  %v1377_v63 = vadd.f32 %v1184_v12, %v6168_v24  ;;  %v2636_v32 = vsel %vm2541_vm4, %v2633_v58, %v2635_v55  ;;  %v3120_v36 = vsel %vm3025_vm5, %v3117_v38, %v3119_v31  ;;  %v6193_v22 = vpop.f32.mrb[20].mxu0 }
 0x14e   :  { %v3442_v33 = vsel %vm3347_vm6, %v3439_v35, %v3441_v39  ;;  %v3764_v60 = vsel %vm3669_vm7, %v3761_v20, %v3763_v4  ;;  %v6190_v1 = vadd.f32 %v4035_v51, %v1182_v10  ;;  %v935_v57 = vmul.f32 0.007598758, %v5897_v50 }
 0x14f   :  { %v1861_v6 = vadd.f32 %v1668_v7, %v1377_v63  ;;  %v1419_v25 = vmul.f32 0.036000773, %v5897_v50  ;;  %v1903_v12 = vmul.f32 0.10936069, %v5897_v50  ;;  %v2387_v5 = vmul.f32 0.21300554, %v5897_v50 }
 0x150   :  { %8310 = vst [vmem:[#allocation25_spill] sm:$0xff] %v6190_v1  ;;  %v1105_v55 = vrot.slane %v935_v57, 1  ;;  %v2871_v31 = vmul.f32 0.26601171, %v5897_v50  ;;  %v3997_v35 = vadd.f32 %v3917_v29, %v6047_v56  ;;  %v4252_v39 = vrot.slane %v855_v37, 2 }
 0x151   :  { %v2345_v20 = vadd.f32 %v2152_v9, %v1861_v6  ;;  %v1589_v10 = vrot.slane %v1419_v25, 2  ;;  %v2073_v4 = vrot.slane %v1903_v12, 3  ;;  %v2557_v38 = vrot.slane %v2387_v5, 4 }
 0x152   :  { %v8311_v51 = vrot.slane %v6043_v34, 1  ;;  %v8312_v0 = vrot.slane %v6140_v40, 1  ;;  %v3041_v7 = vrot.slane %v2871_v31, 5  ;;  %v3363_v63 = vrot.slane %v2387_v5, 6 }
 0x153   :  { %v2829_v57 = vadd.f32 %v2636_v32, %v2345_v20  ;;  %v1592_v50 = vsel %vm1573_vm2, %v1589_v10, %v1591_v21  ;;  %v2076_v56 = vsel %vm2057_vm3, %v2073_v4, %v2075_v41  ;;  %v2560_v29 = vsel %vm2541_vm4, %v2557_v38, %v2559_v42 }
 0x154   :  { %v1106_v19 = vsel %vm1089_vm1, %v8311_v51, %v1105_v55  ;;  %v1108_v58 = vsel %vm1089_vm1, %v1105_v55, %v8312_v0  ;;  %v3044_v9 = vsel %vm3025_vm5, %v3041_v7, %v3043_v11  ;;  %v3366_v34 = vsel %vm3347_vm6, %v3363_v63, %v3365_v45 }
 0x155   :  { %v1339_v62 = vadd.f32 %v1108_v58, %v855_v37  ;;  %v3685_v6 = vrot.slane %v1903_v12, 7  ;;  %v3313_v25 = vadd.f32 %v3120_v36, %v2829_v57  ;;  %v4082_v1 = vadd.f32 %v3997_v35, %v1106_v19 }
 0x156   :  { %v8313_v55 = vrot.slane %v6040_v59, 2  ;;  %v6216_v21 = vmul.f32 0.0010283801, %v5880_v17  ;;  %v6219_v41 = vmul.f32 0.007598758, %v5880_v17  ;;  %v6227_v59 = vpop.f32.mrb[18].mxu1 }
 0x157   :  { %v1823_v51 = vadd.f32 %v1592_v50, %v1339_v62  ;;  %v3688_v37 = vsel %vm3669_vm7, %v3685_v6, %v3687_v15  ;;  %v6222_v42 = vmul.f32 0.036000773, %v5880_v17  ;;  %v3635_v11 = vadd.f32 %v3442_v33, %v3313_v25 }
 0x158   :  { %v4253_v5 = vsel %vm1573_vm2, %v8313_v55, %v4252_v39  ;;  %v1944_v62 = vmul.f32 0.10936069, %v5880_v17  ;;  %v8213_v15 = vrot.slane %v6219_v41, 1  ;;  %v2428_v12 = vmul.f32 0.21300554, %v5880_v17  ;;  %v6271_v55 = vpop.f32.mrb[19].mxu1 }
 0x159   :  { %v2307_v45 = vadd.f32 %v2076_v56, %v1823_v51  ;;  %v6224_v32 = vadd.f32 %v4253_v5, %v4082_v1  ;;  %v2912_v31 = vmul.f32 0.26601171, %v5880_v17  ;;  %v6233_v35 = vadd.f32 %v3764_v60, %v3635_v11  ;;  %v6236_v1 = vpop.f32.mrb[21].mxu0 }
 0x15a   :  { %v1671_v33 = vrot.slane %v6222_v42, 2  ;;  %v2155_v20 = vrot.slane %v1944_v62, 3  ;;  %v2639_v10 = vrot.slane %v2428_v12, 4  ;;  %v3445_v38 = vrot.slane %v2428_v12, 6 }
 0x15b   :  { %8314 = vst [vmem:[#allocation26_spill] sm:$0xff] %v6224_v32  ;;  %8315 = vst [vmem:[#allocation27_spill] sm:$0xff] %v6233_v35  ;;  %v2791_v39 = vadd.f32 %v2560_v29, %v2307_v45  ;;  %v3123_v4 = vrot.slane %v2912_v31, 5  ;;  %v3767_v19 = vrot.slane %v1944_v62, 7  ;;  %v6239_v58 = vmul.f32 0.0010283801, %v5903_v61 }
 0x15c   :  { %v6242_v7 = vmul.f32 0.007598758, %v5903_v61  ;;  %v6245_v17 = vmul.f32 0.036000773, %v5903_v61  ;;  %v6248_v60 = vmul.f32 0.10936069, %v5903_v61 }
 0x15d   :  { %v3275_v0 = vadd.f32 %v3044_v9, %v2791_v39  ;;  %v6251_v63 = vmul.f32 0.21300554, %v5903_v61  ;;  %v2874_v57 = vmul.f32 0.26601171, %v5903_v61  ;;  %v6262_v45 = vmul.f32 0.0010283801, %v5882_v27 }
 0x15e   :  { %v1595_v9 = vrot.slane %v6245_v17, 2  ;;  %v2079_v6 = vrot.slane %v6248_v60, 3  ;;  %v975_v61 = vmul.f32 0.007598758, %v5882_v27  ;;  %v1943_v62 = vmul.f32 0.10936069, %v5882_v27 }
 0x15f   :  { %v3597_v50 = vadd.f32 %v3366_v34, %v3275_v0  ;;  %v2563_v25 = vrot.slane %v6251_v63, 4  ;;  %v3047_v51 = vrot.slane %v2874_v57, 5  ;;  %v3369_v11 = vrot.slane %v6251_v63, 6  ;;  %8316 = vst [vmem:[#allocation28_spill] sm:$0xff] %v6262_v45 }
 0x160   :  { %v1459_v34 = vmul.f32 0.036000773, %v5882_v27  ;;  %v2427_v12 = vmul.f32 0.21300554, %v5882_v27  ;;  %v3691_v31 = vrot.slane %v6248_v60, 7  ;;  %v1185_v39 = vrot.slane %v975_v61, 1 }
 0x161   :  { %v3919_v5 = vadd.f32 %v3688_v37, %v3597_v50  ;;  %v2911_v0 = vmul.f32 0.26601171, %v5882_v27  ;;  %v857_v37 = vmul.f32 0.0010283801, %v5910_v16  ;;  %v2153_v63 = vrot.slane %v1943_v62, 3  ;;  %v6281_v27 = vpop.f32.mrb[20].mxu1 }
 0x162   :  { %v1669_v57 = vrot.slane %v1459_v34, 2  ;;  %v2637_v50 = vrot.slane %v2427_v12, 4  ;;  %v3443_v36 = vrot.slane %v2427_v12, 6  ;;  %v8317_v56 = vrot.slane %v6119_v52, 1 }
 0x163   :  { %v1188_v60 = vsel %vm1089_vm1, %v1185_v39, %v8213_v15  ;;  %v3121_v61 = vrot.slane %v2911_v0, 5  ;;  %v3765_v44 = vrot.slane %v1943_v62, 7  ;;  %v2156_v12 = vsel %vm2057_vm3, %v2153_v63, %v2155_v20 }
 0x164   :  { %v6276_v29 = vsel %vm1089_vm1, %v8317_v56, %v1185_v39  ;;  %v1379_v34 = vadd.f32 %v1188_v60, %v6262_v45  ;;  %v1672_v48 = vsel %vm1573_vm2, %v1669_v57, %v1671_v33  ;;  %v2640_v24 = vsel %vm2541_vm4, %v2637_v50, %v2639_v10 }
 0x165   :  { %8318 = vst [vmem:[#allocation29_spill] sm:$0xff] %v6276_v29  ;;  %v3124_v52 = vsel %vm3025_vm5, %v3121_v61, %v3123_v4  ;;  %v3446_v56 = vsel %vm3347_vm6, %v3443_v36, %v3445_v38  ;;  %v3768_v29 = vsel %vm3669_vm7, %v3765_v44, %v3767_v19  ;;  %v937_v39 = vmul.f32 0.007598758, %v5910_v16  ;;  %v6296_v44 = vpop.f32.mrb[21].mxu1 }
 0x166   :  { %v1863_v0 = vadd.f32 %v1672_v48, %v1379_v34  ;;  %v1421_v62 = vmul.f32 0.036000773, %v5910_v16  ;;  %v1905_v15 = vmul.f32 0.10936069, %v5910_v16  ;;  %v2389_v60 = vmul.f32 0.21300554, %v5910_v16 }
 0x167   :  { %v1109_v33 = vrot.slane %v937_v39, 1  ;;  %v2873_v20 = vmul.f32 0.26601171, %v5910_v16  ;;  %v3999_v10 = vadd.f32 %v3919_v5, %v6143_v18  ;;  %v4256_v57 = vrot.slane %v857_v37, 2  ;;  %v6374_v45 = vpop.f32.mrb[22].mxu1 }
 0x168   :  { %v2347_v4 = vadd.f32 %v2156_v12, %v1863_v0  ;;  %v1593_v63 = vrot.slane %v1421_v62, 2  ;;  %v2077_v36 = vrot.slane %v1905_v15, 3  ;;  %v2561_v38 = vrot.slane %v2389_v60, 4 }
 0x169   :  { %v8319_v48 = vrot.slane %v6140_v40, 1  ;;  %v8320_v50 = vrot.slane %v6242_v7, 1  ;;  %v3045_v34 = vrot.slane %v2873_v20, 5  ;;  %v3367_v39 = vrot.slane %v2389_v60, 6 }
 0x16a   :  { %v2831_v16 = vadd.f32 %v2640_v24, %v2347_v4  ;;  %v1596_v18 = vsel %vm1573_vm2, %v1593_v63, %v1595_v9  ;;  %v2080_v5 = vsel %vm2057_vm3, %v2077_v36, %v2079_v6  ;;  %v2564_v12 = vsel %vm2541_vm4, %v2561_v38, %v2563_v25 }
 0x16b   :  { %v1110_v19 = vsel %vm1089_vm1, %v8319_v48, %v1109_v33  ;;  %v1112_v61 = vsel %vm1089_vm1, %v1109_v33, %v8320_v50  ;;  %v3048_v0 = vsel %vm3025_vm5, %v3045_v34, %v3047_v51  ;;  %v3370_v40 = vsel %vm3347_vm6, %v3367_v39, %v3369_v11 }
 0x16c   :  { %v1341_v35 = vadd.f32 %v1112_v61, %v857_v37  ;;  %v3689_v62 = vrot.slane %v1905_v15, 7  ;;  %v3315_v48 = vadd.f32 %v3124_v52, %v2831_v16  ;;  %v4084_v32 = vadd.f32 %v3999_v10, %v1110_v19  ;;  %v6323_v37 = vpop.f32.mrb[22].mxu0 }
 0x16d   :  { %v8321_v33 = vrot.slane %v6137_v14, 2  ;;  %v6315_v6 = vmul.f32 0.007598758, %v5889_v46  ;;  %v6318_v25 = vmul.f32 0.036000773, %v5889_v46  ;;  %8323 = vst [vmem:[#allocation31_spill] sm:$0xff] %v6323_v37 }
 0x16e   :  { %v1825_v43 = vadd.f32 %v1596_v18, %v1341_v35  ;;  %v3692_v9 = vsel %vm3669_vm7, %v3689_v62, %v3691_v31  ;;  %v3637_v51 = vadd.f32 %v3446_v56, %v3315_v48  ;;  %v1946_v35 = vmul.f32 0.10936069, %v5889_v46 }
 0x16f   :  { %v4257_v60 = vsel %vm1573_vm2, %v8321_v33, %v4256_v57  ;;  %v6326_v14 = vmul.f32 0.0010283801, %v5889_v46  ;;  %v2430_v52 = vmul.f32 0.21300554, %v5889_v46  ;;  %v2914_v31 = vmul.f32 0.26601171, %v5889_v46 }
 0x170   :  { %v2309_v11 = vadd.f32 %v2080_v5, %v1825_v43  ;;  %v6320_v15 = vadd.f32 %v4257_v60, %v4084_v32  ;;  %v3959_v20 = vadd.f32 %v3768_v29, %v3637_v51  ;;  %v1191_v57 = vrot.slane %v6315_v6, 1 }
 0x171   :  { %v1675_v56 = vrot.slane %v6318_v25, 2  ;;  %v2159_v43 = vrot.slane %v1946_v35, 3  ;;  %v2643_v32 = vrot.slane %v2430_v52, 4  ;;  %v3127_v4 = vrot.slane %v2914_v31, 5 }
 0x172   :  { %8322 = vst [vmem:[#allocation30_spill] sm:$0xff] %v6320_v15  ;;  %v2793_v10 = vadd.f32 %v2564_v12, %v2309_v11  ;;  %v3771_v63 = vrot.slane %v1946_v35, 7  ;;  %v3449_v38 = vrot.slane %v2430_v52, 6  ;;  %v6333_v19 = vmul.f32 0.007598758, %v5929_v28 }
 0x173   :  { %v6336_v50 = vmul.f32 0.036000773, %v5929_v28  ;;  %v6339_v46 = vmul.f32 0.10936069, %v5929_v28  ;;  %v6342_v29 = vmul.f32 0.21300554, %v5929_v28  ;;  %v4039_v34 = vadd.f32 %v3959_v20, %v6222_v42 }
 0x174   :  { %v3277_v36 = vadd.f32 %v3048_v0, %v2793_v10  ;;  %v6345_v61 = vmul.f32 0.26601171, %v5929_v28  ;;  %v6349_v16 = vmul.f32 0.0010283801, %v5929_v28  ;;  %v897_v42 = vmul.f32 0.0010283801, %v5899_v53 }
 0x175   :  { %v1599_v5 = vrot.slane %v6336_v50, 2  ;;  %v2083_v12 = vrot.slane %v6339_v46, 3  ;;  %v2567_v0 = vrot.slane %v6342_v29, 4  ;;  %v3373_v48 = vrot.slane %v6342_v29, 6 }
 0x176   :  { %v3599_v39 = vadd.f32 %v3370_v40, %v3277_v36  ;;  %8324 = vst [vmem:[#allocation32_spill] sm:$0xff] %v6349_v16  ;;  %v3051_v62 = vrot.slane %v6345_v61, 5  ;;  %v977_v28 = vmul.f32 0.007598758, %v5899_v53  ;;  %v1461_v40 = vmul.f32 0.036000773, %v5899_v53 }
 0x177   :  { %v1945_v51 = vmul.f32 0.10936069, %v5899_v53  ;;  %v2429_v11 = vmul.f32 0.21300554, %v5899_v53  ;;  %v2913_v52 = vmul.f32 0.26601171, %v5899_v53 }
 0x178   :  { %v3921_v33 = vadd.f32 %v3692_v9, %v3599_v39  ;;  %v1189_v35 = vrot.slane %v977_v28, 1  ;;  %v4336_v31 = vrot.slane %v897_v42, 2  ;;  %v859_v20 = vmul.f32 0.0010283801, %v5936_v30 }
 0x179   :  { %v1673_v10 = vrot.slane %v1461_v40, 2  ;;  %v2157_v9 = vrot.slane %v1945_v51, 3  ;;  %v2641_v36 = vrot.slane %v2429_v11, 4  ;;  %v3447_v29 = vrot.slane %v2429_v11, 6 }
 0x17a   :  { %v8325_v61 = vrot.slane %v6219_v41, 1  ;;  %v1192_v24 = vsel %vm1089_vm1, %v1189_v35, %v1191_v57  ;;  %v3125_v60 = vrot.slane %v2913_v52, 5  ;;  %v3769_v18 = vrot.slane %v1945_v51, 7 }
 0x17b   :  { %v1381_v28 = vadd.f32 %v1192_v24, %v897_v42  ;;  %v1676_v53 = vsel %vm1573_vm2, %v1673_v10, %v1675_v56  ;;  %v2160_v15 = vsel %vm2057_vm3, %v2157_v9, %v2159_v43  ;;  %v2644_v40 = vsel %vm2541_vm4, %v2641_v36, %v2643_v32  ;;  %v6384_v42 = vpop.f32.mrb[23].mxu0 }
 0x17c   :  { %v1190_v39 = vsel %vm1089_vm1, %v8325_v61, %v1189_v35  ;;  %v3128_v11 = vsel %vm3025_vm5, %v3125_v60, %v3127_v4  ;;  %v3450_v41 = vsel %vm3347_vm6, %v3447_v29, %v3449_v38  ;;  %v3772_v61 = vsel %vm3669_vm7, %v3769_v18, %v3771_v63 }
 0x17d   :  { %v4124_v49 = vadd.f32 %v4039_v34, %v1190_v39  ;;  %v1865_v37 = vadd.f32 %v1676_v53, %v1381_v28  ;;  %v8326_v35 = vrot.slane %v6216_v21, 2  ;;  %v939_v56 = vmul.f32 0.007598758, %v5936_v30 }
 0x17e   :  { %v1423_v43 = vmul.f32 0.036000773, %v5936_v30  ;;  %v1907_v4 = vmul.f32 0.10936069, %v5936_v30  ;;  %v2391_v38 = vmul.f32 0.21300554, %v5936_v30  ;;  %v4001_v21 = vadd.f32 %v3921_v33, %v6245_v17 }
 0x17f   :  { %v4337_v24 = vsel %vm1573_vm2, %v8326_v35, %v4336_v31  ;;  %v2875_v63 = vmul.f32 0.26601171, %v5936_v30  ;;  %v2349_v34 = vadd.f32 %v2160_v15, %v1865_v37  ;;  %v1113_v18 = vrot.slane %v939_v56, 1 }
 0x180   :  { %v6386_v32 = vadd.f32 %v4337_v24, %v4124_v49  ;;  %v1597_v60 = vrot.slane %v1423_v43, 2  ;;  %v2081_v51 = vrot.slane %v1907_v4, 3  ;;  %v2565_v52 = vrot.slane %v2391_v38, 4 }
 0x181   :  { %v3049_v31 = vrot.slane %v2875_v63, 5  ;;  %v3371_v10 = vrot.slane %v2391_v38, 6  ;;  %v2833_v9 = vadd.f32 %v2644_v40, %v2349_v34  ;;  %v8328_v36 = vrot.slane %v6242_v7, 1 }
 0x182   :  { %8327 = vst [vmem:[#allocation33_spill] sm:$0xff] %v6386_v32  ;;  %v8329_v29 = vrot.slane %v6333_v19, 1  ;;  %v1600_v30 = vsel %vm1573_vm2, %v1597_v60, %v1599_v5  ;;  %v2084_v37 = vsel %vm2057_vm3, %v2081_v51, %v2083_v12  ;;  %v2568_v17 = vsel %vm2541_vm4, %v2565_v52, %v2567_v0  ;;  %v6409_v5 = vpop.f32.mrb[23].mxu1 }
 0x183   :  { %v1114_v49 = vsel %vm1089_vm1, %v8328_v36, %v1113_v18  ;;  %v3052_v33 = vsel %vm3025_vm5, %v3049_v31, %v3051_v62  ;;  %v3317_v28 = vadd.f32 %v3128_v11, %v2833_v9  ;;  %v3374_v53 = vsel %vm3347_vm6, %v3371_v10, %v3373_v48 }
 0x184   :  { %v1116_v39 = vsel %vm1089_vm1, %v1113_v18, %v8329_v29  ;;  %v3693_v40 = vrot.slane %v1907_v4, 7  ;;  %v6403_v7 = vadd.f32 %v4001_v21, %v1114_v49  ;;  %v4260_v56 = vrot.slane %v859_v20, 2 }
 0x185   :  { %v1343_v15 = vadd.f32 %v1116_v39, %v859_v20  ;;  %v6407_v43 = vmul.f32 0.007598758, %v5905_v23  ;;  %v3639_v12 = vadd.f32 %v3450_v41, %v3317_v28  ;;  %v8331_v0 = vrot.slane %v6339_v46, 7 }
 0x186   :  { %8330 = vst [vmem:[#allocation34_spill] sm:$0xff] %v6403_v7  ;;  %v6415_v11 = vmul.f32 0.036000773, %v5905_v23  ;;  %v1948_v48 = vmul.f32 0.10936069, %v5905_v23  ;;  %v8332_v20 = vrot.slane %v6239_v58, 2 }
 0x187   :  { %v1827_v24 = vadd.f32 %v1600_v30, %v1343_v15  ;;  %v3696_v62 = vsel %vm3669_vm7, %v3693_v40, %v8331_v0  ;;  %v2432_v34 = vmul.f32 0.21300554, %v5905_v23  ;;  %v3961_v41 = vadd.f32 %v3772_v61, %v3639_v12 }
 0x188   :  { %v6422_v63 = vsel %vm1573_vm2, %v8332_v20, %v4260_v56  ;;  %v6426_v46 = vmul.f32 0.0010283801, %v5905_v23  ;;  %v8220_v18 = vrot.slane %v6407_v43, 1  ;;  %v2916_v60 = vmul.f32 0.26601171, %v5905_v23 }
 0x189   :  { %v2311_v38 = vadd.f32 %v2084_v37, %v1827_v24  ;;  %8333 = vst [vmem:[#allocation35_spill] sm:$0xff] %v6422_v63  ;;  %v1679_v51 = vrot.slane %v6415_v11, 2  ;;  %v2163_v52 = vrot.slane %v1948_v48, 3  ;;  %v2647_v31 = vrot.slane %v2432_v34, 4  ;;  %v6454_v24 = vpop.f32.mrb[24].mxu0 }
 0x18a   :  { %v3453_v10 = vrot.slane %v2432_v34, 6  ;;  %v3775_v58 = vrot.slane %v1948_v48, 7  ;;  %v6432_v9 = vmul.f32 0.0010283801, %v5955_v47  ;;  %v6435_v36 = vmul.f32 0.007598758, %v5955_v47 }
 0x18b   :  { %v2795_v21 = vadd.f32 %v2568_v17, %v2311_v38  ;;  %v6438_v49 = vmul.f32 0.036000773, %v5955_v47  ;;  %v6441_v29 = vmul.f32 0.10936069, %v5955_v47  ;;  %v6444_v23 = vmul.f32 0.21300554, %v5955_v47 }
 0x18c   :  { %8334 = vst [vmem:[#allocation36_spill] sm:$0xff] %v6432_v9  ;;  %8335 = vst [vmem:[#allocation37_spill] sm:$0xff] %v6435_v36  ;;  %v3131_v39 = vrot.slane %v2916_v60, 5  ;;  %v6448_v15 = vmul.f32 0.26601171, %v5955_v47  ;;  %v8350_v16 = vrot.slane %v6407_v43, 1 }
 0x18d   :  { %v3279_v61 = vadd.f32 %v3052_v33, %v2795_v21  ;;  %8336 = vst [vmem:[#allocation38_spill] sm:$0xff] %v6438_v49  ;;  %v899_v37 = vmul.f32 0.0010283801, %v5912_v2  ;;  %v1603_v33 = vrot.slane %v6438_v49, 2  ;;  %v2087_v28 = vrot.slane %v6441_v29, 3 }
 0x18e   :  { %v2571_v40 = vrot.slane %v6444_v23, 4  ;;  %v3055_v56 = vrot.slane %v6448_v15, 5  ;;  %v3377_v12 = vrot.slane %v6444_v23, 6  ;;  %v979_v47 = vmul.f32 0.007598758, %v5912_v2 }
 0x18f   :  { %v3601_v17 = vadd.f32 %v3374_v53, %v3279_v61  ;;  %v1463_v38 = vmul.f32 0.036000773, %v5912_v2  ;;  %v1947_v53 = vmul.f32 0.10936069, %v5912_v2  ;;  %v2431_v20 = vmul.f32 0.21300554, %v5912_v2 }
 0x190   :  { %v1193_v34 = vrot.slane %v979_v47, 1  ;;  %v2915_v60 = vmul.f32 0.26601171, %v5912_v2  ;;  %v4041_v21 = vadd.f32 %v3961_v41, %v6318_v25  ;;  %v4340_v61 = vrot.slane %v899_v37, 2 }
 0x191   :  { %v3923_v48 = vadd.f32 %v3696_v62, %v3601_v17  ;;  %v1677_v15 = vrot.slane %v1463_v38, 2  ;;  %v2161_v4 = vrot.slane %v1947_v53, 3  ;;  %v2645_v23 = vrot.slane %v2431_v20, 4  ;;  %v6474_v38 = vpop.f32.mrb[24].mxu1 }
 0x192   :  { %v3451_v30 = vrot.slane %v2431_v20, 6  ;;  %v1194_v62 = vsel %vm1089_vm1, %v1191_v57, %v1193_v34  ;;  %v1196_v17 = vsel %vm1089_vm1, %v1193_v34, %v8220_v18  ;;  %v3129_v0 = vrot.slane %v2915_v60, 5 }
 0x193   :  { %v3773_v35 = vrot.slane %v1947_v53, 7  ;;  %v1383_v47 = vadd.f32 %v1196_v17, %v899_v37  ;;  %v1680_v2 = vsel %vm1573_vm2, %v1677_v15, %v1679_v51  ;;  %v2164_v25 = vsel %vm2057_vm3, %v2161_v4, %v2163_v52  ;;  %v8338_v53 = vld [vmem:[#allocation9_spill] sm:$0xff] }
 0x194   :  { %v2648_v41 = vsel %vm2541_vm4, %v2645_v23, %v2647_v31  ;;  %v3132_v20 = vsel %vm3025_vm5, %v3129_v0, %v3131_v39  ;;  %v3454_v6 = vsel %vm3347_vm6, %v3451_v30, %v3453_v10  ;;  %v4126_v63 = vadd.f32 %v4041_v21, %v1194_v62  ;;  %v6493_v0 = vpop.f32.mrb[25].mxu0 }
 0x195   :  { %v3776_v57 = vsel %vm3669_vm7, %v3773_v35, %v3775_v58  ;;  %v1867_v7 = vadd.f32 %v1680_v2, %v1383_v47  ;;  %v8337_v34 = vrot.slane %v6326_v14, 2  ;;  %v6483_v51 = vmul.f32 0.0010283801, %v8338_v53 }
 0x196   :  { %v941_v4 = vmul.f32 0.007598758, %v8338_v53  ;;  %v1425_v31 = vmul.f32 0.036000773, %v8338_v53  ;;  %v1909_v39 = vmul.f32 0.10936069, %v8338_v53  ;;  %v4003_v14 = vadd.f32 %v3923_v48, %v6336_v50 }
 0x197   :  { %v4341_v37 = vsel %vm1573_vm2, %v8337_v34, %v4340_v61  ;;  %8339 = vst [vmem:[#allocation9_spill] sm:$0xff] %v6483_v51  ;;  %v2393_v10 = vmul.f32 0.21300554, %v8338_v53  ;;  %v2351_v35 = vadd.f32 %v2164_v25, %v1867_v7  ;;  %v2877_v30 = vmul.f32 0.26601171, %v8338_v53 }
 0x198   :  { %v6486_v52 = vadd.f32 %v4341_v37, %v4126_v63  ;;  %v1117_v58 = vrot.slane %v941_v4, 1  ;;  %v1601_v60 = vrot.slane %v1425_v31, 2  ;;  %v2085_v21 = vrot.slane %v1909_v39, 3 }
 0x199   :  { %v2569_v61 = vrot.slane %v2393_v10, 4  ;;  %v3375_v15 = vrot.slane %v2393_v10, 6  ;;  %v2835_v63 = vadd.f32 %v2648_v41, %v2351_v35  ;;  %v8341_v23 = vrot.slane %v6333_v19, 1  ;;  %v8344_v10 = vld [vmem:[#allocation12_spill] sm:$0xff] }
 0x19a   :  { %8340 = vst [vmem:[#allocation39_spill] sm:$0xff] %v6486_v52  ;;  %v8342_v17 = vrot.slane %v6435_v36, 1  ;;  %v3053_v47 = vrot.slane %v2877_v30, 5  ;;  %v1604_v50 = vsel %vm1573_vm2, %v1601_v60, %v1603_v33  ;;  %v2088_v48 = vsel %vm2057_vm3, %v2085_v21, %v2087_v28 }
 0x19b   :  { %v1118_v62 = vsel %vm1089_vm1, %v8341_v23, %v1117_v58  ;;  %v2572_v25 = vsel %vm2541_vm4, %v2569_v61, %v2571_v40  ;;  %v3319_v34 = vadd.f32 %v3132_v20, %v2835_v63  ;;  %v3378_v19 = vsel %vm3347_vm6, %v3375_v15, %v3377_v12 }
 0x19c   :  { %v1120_v7 = vsel %vm1089_vm1, %v1117_v58, %v8342_v17  ;;  %v3056_v41 = vsel %vm3025_vm5, %v3053_v47, %v3055_v56  ;;  %v3697_v37 = vrot.slane %v1909_v39, 7  ;;  %v6508_v31 = vadd.f32 %v4003_v14, %v1118_v62  ;;  %v6513_v58 = vpop.f32.mrb[25].mxu1  ;;  %v8347_v47 = vld [vmem:[#allocation13_spill] sm:$0xff] }
 0x19d   :  { %v1345_v2 = vadd.f32 %v1120_v7, %v6483_v51  ;;  %v6511_v35 = vmul.f32 0.0010283801, %v8344_v10  ;;  %v3641_v33 = vadd.f32 %v3454_v6, %v3319_v34  ;;  %v8345_v28 = vrot.slane %v6441_v29, 7 }
 0x19e   :  { %8343 = vst [vmem:[#allocation40_spill] sm:$0xff] %v6508_v31  ;;  %v6521_v56 = vmul.f32 0.007598758, %v8344_v10  ;;  %v6524_v12 = vmul.f32 0.036000773, %v8344_v10 }
 0x19f   :  { %v1829_v4 = vadd.f32 %v1604_v50, %v1345_v2  ;;  %v6518_v40 = vsel %vm3669_vm7, %v3697_v37, %v8345_v28  ;;  %v1950_v39 = vmul.f32 0.10936069, %v8344_v10  ;;  %v2434_v30 = vmul.f32 0.21300554, %v8344_v10 }
 0x1a0   :  { %8346 = vst [vmem:[#allocation12_spill] sm:$0xff] %v6518_v40  ;;  %v2918_v14 = vmul.f32 0.26601171, %v8344_v10  ;;  %v3963_v60 = vadd.f32 %v3776_v57, %v3641_v33  ;;  %v1683_v15 = vrot.slane %v6524_v12, 2  ;;  %v6535_v2 = vmul.f32 0.007598758, %v8347_v47 }
 0x1a1   :  { %v2313_v20 = vadd.f32 %v2088_v48, %v1829_v4  ;;  %v2167_v63 = vrot.slane %v1950_v39, 3  ;;  %v2651_v62 = vrot.slane %v2434_v30, 4  ;;  %v3457_v7 = vrot.slane %v2434_v30, 6  ;;  %v6556_v30 = vpop.f32.mrb[26].mxu0 }
 0x1a2   :  { %v3135_v17 = vrot.slane %v2918_v14, 5  ;;  %v6538_v48 = vmul.f32 0.036000773, %v8347_v47  ;;  %v6541_v57 = vmul.f32 0.10936069, %v8347_v47  ;;  %v3779_v34 = vrot.slane %v1950_v39, 7 }
 0x1a3   :  { %v2797_v61 = vadd.f32 %v2572_v25, %v2313_v20  ;;  %v6544_v25 = vmul.f32 0.21300554, %v8347_v47  ;;  %v6547_v37 = vmul.f32 0.0010283801, %v8347_v47  ;;  %v2880_v10 = vmul.f32 0.26601171, %v8347_v47 }
 0x1a4   :  { %v2091_v28 = vrot.slane %v6541_v57, 3  ;;  %v901_v20 = vmul.f32 0.0010283801, %v6006_v54  ;;  %8349 = vst [vmem:[#allocation41_spill] sm:$0xff] %v6556_v30  ;;  %v981_v29 = vmul.f32 0.007598758, %v6006_v54 }
 0x1a5   :  { %v3281_v50 = vadd.f32 %v3056_v41, %v2797_v61  ;;  %v1607_v41 = vrot.slane %v6538_v48, 2  ;;  %v2575_v14 = vrot.slane %v6544_v25, 4  ;;  %v3059_v39 = vrot.slane %v2880_v10, 5 }
 0x1a6   :  { %v3381_v61 = vrot.slane %v6544_v25, 6  ;;  %v1465_v6 = vmul.f32 0.036000773, %v6006_v54  ;;  %v2433_v47 = vmul.f32 0.21300554, %v6006_v54  ;;  %v3703_v23 = vrot.slane %v6541_v57, 7 }
 0x1a7   :  { %v6551_v33 = vadd.f32 %v3378_v19, %v3281_v50  ;;  %v1949_v19 = vmul.f32 0.10936069, %v6006_v54  ;;  %v4043_v50 = vadd.f32 %v3963_v60, %v6415_v11  ;;  %v1197_v4 = vrot.slane %v981_v29, 1 }
 0x1a8   :  { %v2917_v53 = vmul.f32 0.26601171, %v6006_v54  ;;  %v4344_v21 = vrot.slane %v901_v20, 2  ;;  %v1681_v18 = vrot.slane %v1465_v6, 2  ;;  %v2649_v31 = vrot.slane %v2433_v47, 4 }
 0x1a9   :  { %8348 = vst [vmem:[#allocation13_spill] sm:$0xff] %v6551_v33  ;;  %v2165_v10 = vrot.slane %v1949_v19, 3  ;;  %v3455_v25 = vrot.slane %v2433_v47, 6  ;;  %v1198_v51 = vsel %vm1089_vm1, %v8350_v16, %v1197_v4  ;;  %v8351_v9 = vrot.slane %v6521_v56, 1  ;;  %v6579_v33 = vpop.f32.mrb[26].mxu1 }
 0x1aa   :  { %v3133_v40 = vrot.slane %v2917_v53, 5  ;;  %v3777_v11 = vrot.slane %v1949_v19, 7  ;;  %v1684_v29 = vsel %vm1573_vm2, %v1681_v18, %v1683_v15  ;;  %v2652_v6 = vsel %vm2541_vm4, %v2649_v31, %v2651_v62  ;;  %8352 = vst [vmem:[#allocation42_spill] sm:$0xff] %v6579_v33  ;;  %v8354_v53 = vld [vmem:[#allocation14_spill] sm:$0xff] }
 0x1ab   :  { %v1200_v49 = vsel %vm1089_vm1, %v1197_v4, %v8351_v9  ;;  %v2168_v54 = vsel %vm2057_vm3, %v2165_v10, %v2167_v63  ;;  %v3458_v47 = vsel %vm3347_vm6, %v3455_v25, %v3457_v7  ;;  %v4128_v16 = vadd.f32 %v4043_v50, %v1198_v51  ;;  %v6597_v7 = vpop.f32.mrb[27].mxu0 }
 0x1ac   :  { %v1385_v60 = vadd.f32 %v1200_v49, %v901_v20  ;;  %v3136_v57 = vsel %vm3025_vm5, %v3133_v40, %v3135_v17  ;;  %v3780_v43 = vsel %vm3669_vm7, %v3777_v11, %v3779_v34  ;;  %v8353_v9 = vrot.slane %v6426_v46, 2  ;;  %8358 = vst [vmem:[#allocation45_spill] sm:$0xff] %v6597_v7 }
 0x1ad   :  { %v6585_v18 = vmul.f32 0.007598758, %v8354_v53  ;;  %v1427_v15 = vmul.f32 0.036000773, %v8354_v53  ;;  %v1911_v40 = vmul.f32 0.10936069, %v8354_v53 }
 0x1ae   :  { %v1869_v36 = vadd.f32 %v1684_v29, %v1385_v60  ;;  %v4345_v49 = vsel %vm1573_vm2, %v8353_v9, %v4344_v21  ;;  %v2395_v63 = vmul.f32 0.21300554, %v8354_v53  ;;  %v2879_v51 = vmul.f32 0.26601171, %v8354_v53 }
 0x1af   :  { %8355 = vst [vmem:[#allocation14_spill] sm:$0xff] %v6585_v18  ;;  %v6588_v31 = vadd.f32 %v4345_v49, %v4128_v16  ;;  %v6594_v17 = vmul.f32 0.0010283801, %v8354_v53  ;;  %v8226_v46 = vrot.slane %v6585_v18, 1  ;;  %v1605_v21 = vrot.slane %v1427_v15, 2  ;;  %v8360_v53 = vld [vmem:[#allocation17_spill] sm:$0xff] }
 0x1b0   :  { %v2353_v62 = vadd.f32 %v2168_v54, %v1869_v36  ;;  %v2089_v34 = vrot.slane %v1911_v40, 3  ;;  %v2573_v4 = vrot.slane %v2395_v63, 4  ;;  %v3057_v20 = vrot.slane %v2879_v51, 5 }
 0x1b1   :  { %8356 = vst [vmem:[#allocation43_spill] sm:$0xff] %v6588_v31  ;;  %8357 = vst [vmem:[#allocation44_spill] sm:$0xff] %v6594_v17  ;;  %v3379_v19 = vrot.slane %v2395_v63, 6  ;;  %v8359_v10 = vrot.slane %v6535_v2, 1  ;;  %v1608_v36 = vsel %vm1573_vm2, %v1605_v21, %v1607_v41  ;;  %v3701_v11 = vrot.slane %v1911_v40, 7 }
 0x1b2   :  { %v2837_v50 = vadd.f32 %v2652_v6, %v2353_v62  ;;  %v2092_v29 = vsel %vm2057_vm3, %v2089_v34, %v2091_v28  ;;  %v2576_v54 = vsel %vm2541_vm4, %v2573_v4, %v2575_v14  ;;  %v3060_v16 = vsel %vm3025_vm5, %v3057_v20, %v3059_v39 }
 0x1b3   :  { %v1124_v25 = vsel %vm1089_vm1, %v8226_v46, %v8359_v10  ;;  %v3382_v6 = vsel %vm3347_vm6, %v3379_v19, %v3381_v61  ;;  %v3704_v49 = vsel %vm3669_vm7, %v3701_v11, %v3703_v23  ;;  %v6612_v15 = vmul.f32 0.0010283801, %v8360_v53  ;;  %v6624_v23 = vpop.f32.mrb[27].mxu1 }
 0x1b4   :  { %v1347_v60 = vadd.f32 %v1124_v25, %v6594_v17  ;;  %v3321_v9 = vadd.f32 %v3136_v57, %v2837_v50  ;;  %v6615_v41 = vmul.f32 0.007598758, %v8360_v53  ;;  %v6618_v40 = vmul.f32 0.036000773, %v8360_v53  ;;  %8361 = vst [vmem:[#allocation17_spill] sm:$0xff] %v6624_v23  ;;  %v6656_v17 = vpop.f32.mrb[28].mxu0 }
 0x1b5   :  { %v1952_v28 = vmul.f32 0.10936069, %v8360_v53  ;;  %v2436_v57 = vmul.f32 0.21300554, %v8360_v53  ;;  %v2920_v61 = vmul.f32 0.26601171, %v8360_v53 }
 0x1b6   :  { %v1831_v63 = vadd.f32 %v1608_v36, %v1347_v60  ;;  %v3643_v39 = vadd.f32 %v3458_v47, %v3321_v9  ;;  %v1687_v20 = vrot.slane %v6618_v40, 2  ;;  %v8362_v36 = vld [vmem:[#allocation18_spill] sm:$0xff]  ;;  %v2919_v21 = vmul.f32 0.26601171, %v6096_v8 }
 0x1b7   :  { %v2171_v19 = vrot.slane %v1952_v28, 3  ;;  %v2655_v50 = vrot.slane %v2436_v57, 4  ;;  %v3139_v47 = vrot.slane %v2920_v61, 5  ;;  %v3461_v25 = vrot.slane %v2436_v57, 6  ;;  %8363 = vst [vmem:[#allocation18_spill] sm:$0xff] %v6656_v17 }
 0x1b8   :  { %v2315_v51 = vadd.f32 %v2092_v29, %v1831_v63  ;;  %v3965_v4 = vadd.f32 %v3780_v43, %v3643_v39  ;;  %v6631_v11 = vmul.f32 0.007598758, %v8362_v36  ;;  %v6634_v60 = vmul.f32 0.036000773, %v8362_v36 }
 0x1b9   :  { %v6637_v29 = vmul.f32 0.10936069, %v8362_v36  ;;  %v6640_v9 = vmul.f32 0.21300554, %v8362_v36  ;;  %v3783_v63 = vrot.slane %v1952_v28, 7  ;;  %v3137_v18 = vrot.slane %v2919_v21, 5 }
 0x1ba   :  { %v2799_v10 = vadd.f32 %v2576_v54, %v2315_v51  ;;  %v4045_v43 = vadd.f32 %v3965_v4, %v6524_v12  ;;  %v2882_v39 = vmul.f32 0.26601171, %v8362_v36  ;;  %v1611_v57 = vrot.slane %v6634_v60, 2 }
 0x1bb   :  { %v2095_v61 = vrot.slane %v6637_v29, 3  ;;  %v2579_v51 = vrot.slane %v6640_v9, 4  ;;  %v3385_v62 = vrot.slane %v6640_v9, 6  ;;  %v3707_v14 = vrot.slane %v6637_v29, 7 }
 0x1bc   :  { %v3283_v53 = vadd.f32 %v3060_v16, %v2799_v10  ;;  %v3063_v34 = vrot.slane %v2882_v39, 5  ;;  %v903_v12 = vmul.f32 0.0010283801, %v6096_v8  ;;  %v983_v16 = vmul.f32 0.007598758, %v6096_v8 }
 0x1bd   :  { %v1467_v28 = vmul.f32 0.036000773, %v6096_v8  ;;  %v1951_v4 = vmul.f32 0.10936069, %v6096_v8  ;;  %v2435_v54 = vmul.f32 0.21300554, %v6096_v8 }
 0x1be   :  { %v3605_v46 = vadd.f32 %v3382_v6, %v3283_v53  ;;  %v4348_v31 = vrot.slane %v903_v12, 2  ;;  %v1201_v6 = vrot.slane %v983_v16, 1  ;;  %v8364_v7 = vrot.slane %v6511_v35, 2 }
 0x1bf   :  { %v1685_v9 = vrot.slane %v1467_v28, 2  ;;  %v2169_v53 = vrot.slane %v1951_v4, 3  ;;  %v3781_v29 = vrot.slane %v1951_v4, 7  ;;  %v2653_v39 = vrot.slane %v2435_v54, 4 }
 0x1c0   :  { %v3927_v10 = vadd.f32 %v3704_v49, %v3605_v46  ;;  %v3459_v23 = vrot.slane %v2435_v54, 6  ;;  %v4349_v33 = vsel %vm1573_vm2, %v8364_v7, %v4348_v31  ;;  %v8365_v46 = vrot.slane %v6521_v56, 1 }
 0x1c1   :  { %v8366_v8 = vrot.slane %v6615_v41, 1  ;;  %v1688_v16 = vsel %vm1573_vm2, %v1685_v9, %v1687_v20  ;;  %v2172_v28 = vsel %vm2057_vm3, %v2169_v53, %v2171_v19  ;;  %v2656_v21 = vsel %vm2541_vm4, %v2653_v39, %v2655_v50 }
 0x1c2   :  { %v1202_v49 = vsel %vm1089_vm1, %v8365_v46, %v1201_v6  ;;  %v3140_v54 = vsel %vm3025_vm5, %v3137_v18, %v3139_v47  ;;  %v3462_v35 = vsel %vm3347_vm6, %v3459_v23, %v3461_v25  ;;  %v3784_v31 = vsel %vm3669_vm7, %v3781_v29, %v3783_v63  ;;  %v6682_v47 = vpop.f32.mrb[28].mxu1 }
 0x1c3   :  { %v1204_v30 = vsel %vm1089_vm1, %v1201_v6, %v8366_v8  ;;  %v4130_v56 = vadd.f32 %v4045_v43, %v1202_v49  ;;  %v865_v7 = vmul.f32 0.0010283801, %v6108_v13  ;;  %v945_v46 = vmul.f32 0.007598758, %v6108_v13  ;;  %v6690_v8 = vpop.f32.mrb[29].mxu0 }
 0x1c4   :  { %v1387_v4 = vadd.f32 %v1204_v30, %v903_v12  ;;  %v1429_v6 = vmul.f32 0.036000773, %v6108_v13  ;;  %v1913_v20 = vmul.f32 0.10936069, %v6108_v13  ;;  %v2397_v30 = vmul.f32 0.21300554, %v6108_v13 }
 0x1c5   :  { %v6678_v19 = vadd.f32 %v4349_v33, %v4130_v56  ;;  %v1125_v50 = vrot.slane %v945_v46, 1  ;;  %v2881_v18 = vmul.f32 0.26601171, %v6108_v13  ;;  %v4007_v23 = vadd.f32 %v3927_v10, %v6538_v48 }
 0x1c6   :  { %v1871_v17 = vadd.f32 %v1688_v16, %v1387_v4  ;;  %v1609_v43 = vrot.slane %v1429_v6, 2  ;;  %v2093_v63 = vrot.slane %v1913_v20, 3  ;;  %v2577_v12 = vrot.slane %v2397_v30, 4 }
 0x1c7   :  { %8367 = vst [vmem:[#allocation46_spill] sm:$0xff] %v6678_v19  ;;  %v8368_v9 = vrot.slane %v6535_v2, 1  ;;  %v8369_v29 = vrot.slane %v6631_v11, 1  ;;  %v3061_v39 = vrot.slane %v2881_v18, 5  ;;  %v3383_v49 = vrot.slane %v2397_v30, 6 }
 0x1c8   :  { %v2355_v25 = vadd.f32 %v2172_v28, %v1871_v17  ;;  %v1612_v10 = vsel %vm1573_vm2, %v1609_v43, %v1611_v57  ;;  %v2096_v17 = vsel %vm2057_vm3, %v2093_v63, %v2095_v61  ;;  %v2580_v16 = vsel %vm2541_vm4, %v2577_v12, %v2579_v51  ;;  %v8372_v12 = vld [vmem:[#allocation8_spill] sm:$0xff] }
 0x1c9   :  { %v1126_v53 = vsel %vm1089_vm1, %v8368_v9, %v1125_v50  ;;  %v1128_v33 = vsel %vm1089_vm1, %v1125_v50, %v8369_v29  ;;  %v3064_v2 = vsel %vm3025_vm5, %v3061_v39, %v3063_v34  ;;  %v3386_v28 = vsel %vm3347_vm6, %v3383_v49, %v3385_v62 }
 0x1ca   :  { %v2839_v13 = vadd.f32 %v2656_v21, %v2355_v25  ;;  %v1349_v48 = vadd.f32 %v1128_v33, %v865_v7  ;;  %v3705_v4 = vrot.slane %v1913_v20, 7  ;;  %v4092_v6 = vadd.f32 %v4007_v23, %v1126_v53  ;;  %v6716_v23 = vpop.f32.mrb[29].mxu1 }
 0x1cb   :  { %v4272_v50 = vrot.slane %v865_v7, 2  ;;  %v6698_v30 = vmul.f32 0.0010283801, %v8362_v36  ;;  %v6702_v57 = vmul.f32 0.007598758, %v6159_v26  ;;  %v8370_v62 = vrot.slane %v6547_v37, 2 }
 0x1cc   :  { %v3323_v56 = vadd.f32 %v3140_v54, %v2839_v13  ;;  %v1833_v46 = vadd.f32 %v1612_v10, %v1349_v48  ;;  %v3708_v21 = vsel %vm3669_vm7, %v3705_v4, %v3707_v14  ;;  %v6705_v61 = vmul.f32 0.036000773, %v6159_v26 }
 0x1cd   :  { %v4273_v54 = vsel %vm1573_vm2, %v8370_v62, %v4272_v50  ;;  %v1954_v20 = vmul.f32 0.10936069, %v6159_v26  ;;  %v6712_v36 = vmul.f32 0.0010283801, %v6159_v26  ;;  %v8234_v14 = vrot.slane %v6702_v57, 1 }
 0x1ce   :  { %v3645_v51 = vadd.f32 %v3462_v35, %v3323_v56  ;;  %v2317_v34 = vadd.f32 %v2096_v17, %v1833_v46  ;;  %v4496_v7 = vadd.f32 %v4273_v54, %v4092_v6  ;;  %v2438_v18 = vmul.f32 0.21300554, %v6159_v26 }
 0x1cf   :  { %v1691_v35 = vrot.slane %v6705_v61, 2  ;;  %v2922_v37 = vmul.f32 0.26601171, %v6159_v26  ;;  %v2175_v53 = vrot.slane %v1954_v20, 3  ;;  %v3787_v13 = vrot.slane %v1954_v20, 7 }
 0x1d0   :  { %v3967_v25 = vadd.f32 %v3784_v31, %v3645_v51  ;;  %v2801_v43 = vadd.f32 %v2580_v16, %v2317_v34  ;;  %v6720_v63 = vmul.f32 %v4496_v7, %v4496_v7  ;;  %v6723_v9 = vmul.f32 %v4496_v7, %v8372_v12 }
 0x1d1   :  { %v2659_v29 = vrot.slane %v2438_v18, 4  ;;  %v3143_v39 = vrot.slane %v2922_v37, 5  ;;  %v3465_v49 = vrot.slane %v2438_v18, 6  ;;  %v905_v31 = vmul.f32 0.0010283801, %v6165_v3 }
 0x1d2   :  { %8371 = vst [vmem:[#allocation47_spill] sm:$0xff] %v6720_v63  ;;  %8373 = vst [vmem:[#allocation8_spill] sm:$0xff] %v6723_v9  ;;  %v3285_v33 = vadd.f32 %v3064_v2, %v2801_v43  ;;  %v985_v10 = vmul.f32 0.007598758, %v6165_v3  ;;  %v1469_v26 = vmul.f32 0.036000773, %v6165_v3  ;;  %v4047_v6 = vadd.f32 %v3967_v25, %v6618_v40 }
 0x1d3   :  { %v1953_v16 = vmul.f32 0.10936069, %v6165_v3  ;;  %v2437_v4 = vmul.f32 0.21300554, %v6165_v3  ;;  %v2921_v56 = vmul.f32 0.26601171, %v6165_v3 }
 0x1d4   :  { %v3607_v17 = vadd.f32 %v3386_v28, %v3285_v33  ;;  %v1205_v2 = vrot.slane %v985_v10, 1  ;;  %v1689_v46 = vrot.slane %v1469_v26, 2  ;;  %v4352_v50 = vrot.slane %v905_v31, 2  ;;  %v6741_v43 = vpop.f32.mrb[30].mxu0 }
 0x1d5   :  { %v2173_v34 = vrot.slane %v1953_v16, 3  ;;  %v2657_v62 = vrot.slane %v2437_v4, 4  ;;  %v3141_v54 = vrot.slane %v2921_v56, 5  ;;  %v8374_v20 = vrot.slane %v6615_v41, 1  ;;  %8375 = vst [vmem:[#allocation48_spill] sm:$0xff] %v6741_v43 }
 0x1d6   :  { %v3929_v51 = vadd.f32 %v3708_v21, %v3607_v17  ;;  %v1208_v28 = vsel %vm1089_vm1, %v1205_v2, %v8234_v14  ;;  %v1692_v18 = vsel %vm1573_vm2, %v1689_v46, %v1691_v35  ;;  %v3463_v3 = vrot.slane %v2437_v4, 6 }
 0x1d7   :  { %v1206_v7 = vsel %vm1089_vm1, %v8374_v20, %v1205_v2  ;;  %v1389_v37 = vadd.f32 %v1208_v28, %v905_v31  ;;  %v2176_v40 = vsel %vm2057_vm3, %v2173_v34, %v2175_v53  ;;  %v2660_v21 = vsel %vm2541_vm4, %v2657_v62, %v2659_v29  ;;  %v6772_v28 = vpop.f32.mrb[30].mxu1 }
 0x1d8   :  { %v3144_v25 = vsel %vm3025_vm5, %v3141_v54, %v3143_v39  ;;  %v3466_v41 = vsel %vm3347_vm6, %v3463_v3, %v3465_v49  ;;  %v3785_v33 = vrot.slane %v1953_v16, 7  ;;  %v4132_v10 = vadd.f32 %v4047_v6, %v1206_v7  ;;  %8379 = vst [vmem:[#allocation51_spill] sm:$0xff] %v6772_v28  ;;  %v6806_v32 = vpop.f32.mrb[31].mxu1 }
 0x1d9   :  { %v8376_v26 = vrot.slane %v6612_v15, 2  ;;  %v1873_v4 = vadd.f32 %v1692_v18, %v1389_v37  ;;  %v6752_v56 = vmul.f32 0.007598758, %v6193_v22  ;;  %v6755_v53 = vmul.f32 0.036000773, %v6193_v22  ;;  %8381 = vst [vmem:[#allocation53_spill] sm:$0xff] %v6806_v32 }
 0x1da   :  { %v3788_v29 = vsel %vm3669_vm7, %v3785_v33, %v3787_v13  ;;  %v1916_v49 = vmul.f32 0.10936069, %v6193_v22  ;;  %v2400_v31 = vmul.f32 0.21300554, %v6193_v22  ;;  %v6764_v2 = vmul.f32 0.0010283801, %v6193_v22 }
 0x1db   :  { %v4353_v17 = vsel %vm1573_vm2, %v8376_v26, %v4352_v50  ;;  %v2357_v16 = vadd.f32 %v2176_v40, %v1873_v4  ;;  %v2884_v46 = vmul.f32 0.26601171, %v6193_v22  ;;  %v1615_v50 = vrot.slane %v6755_v53, 2  ;;  %v6790_v26 = vpop.f32.mrb[31].mxu0 }
 0x1dc   :  { %v6758_v39 = vadd.f32 %v4353_v17, %v4132_v10  ;;  %v2099_v34 = vrot.slane %v1916_v49, 3  ;;  %v2583_v13 = vrot.slane %v2400_v31, 4  ;;  %v3389_v54 = vrot.slane %v2400_v31, 6  ;;  %8380 = vst [vmem:[#allocation52_spill] sm:$0xff] %v6790_v26 }
 0x1dd   :  { %v2841_v62 = vadd.f32 %v2660_v21, %v2357_v16  ;;  %v3711_v20 = vrot.slane %v1916_v49, 7  ;;  %v6770_v7 = vmul.f32 0.0010283801, %v6227_v59  ;;  %v6775_v18 = vmul.f32 0.007598758, %v6227_v59 }
 0x1de   :  { %8377 = vst [vmem:[#allocation49_spill] sm:$0xff] %v6758_v39  ;;  %v6778_v3 = vmul.f32 0.036000773, %v6227_v59  ;;  %v6781_v22 = vmul.f32 0.10936069, %v6227_v59  ;;  %v4009_v37 = vadd.f32 %v3929_v51, %v6634_v60  ;;  %v3067_v21 = vrot.slane %v2884_v46, 5 }
 0x1df   :  { %8378 = vst [vmem:[#allocation50_spill] sm:$0xff] %v6770_v7  ;;  %v3325_v40 = vadd.f32 %v3144_v25, %v2841_v62  ;;  %v6785_v33 = vmul.f32 0.21300554, %v6227_v59  ;;  %v6788_v10 = vmul.f32 0.26601171, %v6227_v59  ;;  %v8382_v39 = vrot.slane %v6631_v11, 1 }
 0x1e0   :  { %v1695_v4 = vrot.slane %v6778_v3, 2  ;;  %v2179_v49 = vrot.slane %v6781_v22, 3  ;;  %v867_v59 = vmul.f32 0.0010283801, %v6236_v1  ;;  %v947_v46 = vmul.f32 0.007598758, %v6236_v1 }
 0x1e1   :  { %v3647_v16 = vadd.f32 %v3466_v41, %v3325_v40  ;;  %v2663_v60 = vrot.slane %v6785_v33, 4  ;;  %v3147_v51 = vrot.slane %v6788_v10, 5  ;;  %v1431_v62 = vmul.f32 0.036000773, %v6236_v1 }
 0x1e2   :  { %v1915_v15 = vmul.f32 0.10936069, %v6236_v1  ;;  %v2399_v17 = vmul.f32 0.21300554, %v6236_v1  ;;  %v2883_v31 = vmul.f32 0.26601171, %v6236_v1 }
 0x1e3   :  { %v3969_v48 = vadd.f32 %v3788_v29, %v3647_v16  ;;  %v1129_v41 = vrot.slane %v947_v46, 1  ;;  %v1613_v40 = vrot.slane %v1431_v62, 2  ;;  %v4276_v14 = vrot.slane %v867_v59, 2 }
 0x1e4   :  { %v907_v10 = vmul.f32 0.0010283801, %v6271_v55  ;;  %v2097_v35 = vrot.slane %v1915_v15, 3  ;;  %v2581_v25 = vrot.slane %v2399_v17, 4  ;;  %v3065_v6 = vrot.slane %v2883_v31, 5 }
 0x1e5   :  { %v3387_v63 = vrot.slane %v2399_v17, 6  ;;  %v1130_v29 = vsel %vm1089_vm1, %v8382_v39, %v1129_v41  ;;  %v8383_v16 = vrot.slane %v6752_v56, 1  ;;  %v1616_v1 = vsel %vm1573_vm2, %v1613_v40, %v1615_v50 }
 0x1e6   :  { %v3709_v46 = vrot.slane %v1915_v15, 7  ;;  %v2100_v26 = vsel %vm2057_vm3, %v2097_v35, %v2099_v34  ;;  %v2584_v28 = vsel %vm2541_vm4, %v2581_v25, %v2583_v13  ;;  %v3068_v17 = vsel %vm3025_vm5, %v3065_v6, %v3067_v21 }
 0x1e7   :  { %v1132_v19 = vsel %vm1089_vm1, %v1129_v41, %v8383_v16  ;;  %v3390_v31 = vsel %vm3347_vm6, %v3387_v63, %v3389_v54  ;;  %v4094_v32 = vadd.f32 %v4009_v37, %v1130_v29  ;;  %v8384_v39 = vrot.slane %v6698_v30, 2 }
 0x1e8   :  { %v1351_v62 = vadd.f32 %v1132_v19, %v867_v59  ;;  %v3712_v11 = vsel %vm3669_vm7, %v3709_v46, %v3711_v20  ;;  %v987_v50 = vmul.f32 0.007598758, %v6271_v55  ;;  %v1471_v19 = vmul.f32 0.036000773, %v6271_v55 }
 0x1e9   :  { %v4277_v43 = vsel %vm1573_vm2, %v8384_v39, %v4276_v14  ;;  %v1955_v35 = vmul.f32 0.10936069, %v6271_v55  ;;  %v2439_v34 = vmul.f32 0.21300554, %v6271_v55  ;;  %v2923_v6 = vmul.f32 0.26601171, %v6271_v55 }
 0x1ea   :  { %v1835_v41 = vadd.f32 %v1616_v1, %v1351_v62  ;;  %v4498_v15 = vadd.f32 %v4277_v43, %v4094_v32  ;;  %v4049_v63 = vadd.f32 %v3969_v48, %v6705_v61  ;;  %v1209_v54 = vrot.slane %v987_v50, 1  ;;  %v8386_v14 = vld [vmem:[#allocation15_spill] sm:$0xff] }
 0x1eb   :  { %v1693_v20 = vrot.slane %v1471_v19, 2  ;;  %v2177_v30 = vrot.slane %v1955_v35, 3  ;;  %v2661_v25 = vrot.slane %v2439_v34, 4  ;;  %v3145_v59 = vrot.slane %v2923_v6, 5 }
 0x1ec   :  { %v2319_v13 = vadd.f32 %v2100_v26, %v1835_v41  ;;  %v6829_v37 = vmul.f32 %v4498_v15, %v4498_v15  ;;  %v6832_v21 = vmul.f32 %v4498_v15, %v8386_v14  ;;  %v8388_v32 = vrot.slane %v6702_v57, 1  ;;  %v6841_v26 = vpop.f32.mrb[32].mxu0 }
 0x1ed   :  { %v8389_v55 = vrot.slane %v6775_v18, 1  ;;  %v1696_v48 = vsel %vm1573_vm2, %v1693_v20, %v1695_v4  ;;  %v2180_v1 = vsel %vm2057_vm3, %v2177_v30, %v2179_v49  ;;  %v3148_v57 = vsel %vm3025_vm5, %v3145_v59, %v3147_v51  ;;  %v6872_v20 = vpop.f32.mrb[32].mxu1 }
 0x1ee   :  { %8385 = vst [vmem:[#allocation54_spill] sm:$0xff] %v6829_v37  ;;  %8387 = vst [vmem:[#allocation15_spill] sm:$0xff] %v6832_v21  ;;  %v2803_v40 = vadd.f32 %v2584_v28, %v2319_v13  ;;  %v1210_v43 = vsel %vm1089_vm1, %v8388_v32, %v1209_v54  ;;  %v2664_v28 = vsel %vm2541_vm4, %v2661_v25, %v2663_v60  ;;  %v3467_v62 = vrot.slane %v2439_v34, 6 }
 0x1ef   :  { %v1212_v61 = vsel %vm1089_vm1, %v1209_v54, %v8389_v55  ;;  %v3789_v39 = vrot.slane %v1955_v35, 7  ;;  %v6849_v19 = vadd.f32 %v4049_v63, %v1210_v43  ;;  %v4356_v4 = vrot.slane %v907_v10, 2 }
 0x1f0   :  { %v1391_v16 = vadd.f32 %v1212_v61, %v907_v10  ;;  %v3287_v46 = vadd.f32 %v3068_v17, %v2803_v40  ;;  %v8391_v6 = vrot.slane %v6785_v33, 6  ;;  %v8392_v49 = vrot.slane %v6781_v22, 7 }
 0x1f1   :  { %8390 = vst [vmem:[#allocation55_spill] sm:$0xff] %v6849_v19  ;;  %v6858_v17 = vmul.f32 0.007598758, %v6281_v27  ;;  %v8393_v35 = vrot.slane %v6712_v36, 2  ;;  %v6866_v10 = vmul.f32 0.036000773, %v6281_v27 }
 0x1f2   :  { %v1875_v50 = vadd.f32 %v1696_v48, %v1391_v16  ;;  %v3609_v15 = vadd.f32 %v3390_v31, %v3287_v46  ;;  %v3470_v13 = vsel %vm3347_vm6, %v3467_v62, %v8391_v6  ;;  %v3792_v60 = vsel %vm3669_vm7, %v3789_v39, %v8392_v49 }
 0x1f3   :  { %v6863_v34 = vsel %vm1573_vm2, %v8393_v35, %v4356_v4  ;;  %8395 = vst [vmem:[#allocation57_spill] sm:$0xff] %v6866_v10  ;;  %v1958_v33 = vmul.f32 0.10936069, %v6281_v27  ;;  %v2442_v22 = vmul.f32 0.21300554, %v6281_v27  ;;  %v8242_v25 = vrot.slane %v6858_v17, 1 }
 0x1f4   :  { %v2359_v51 = vadd.f32 %v2180_v1, %v1875_v50  ;;  %8394 = vst [vmem:[#allocation56_spill] sm:$0xff] %v6863_v34  ;;  %v3931_v63 = vadd.f32 %v3712_v11, %v3609_v15  ;;  %v2926_v54 = vmul.f32 0.26601171, %v6281_v27  ;;  %v6875_v36 = vmul.f32 0.0010283801, %v6281_v27  ;;  %v6890_v4 = vpop.f32.mrb[33].mxu0 }
 0x1f5   :  { %v1699_v59 = vrot.slane %v6866_v10, 2  ;;  %v2183_v40 = vrot.slane %v1958_v33, 3  ;;  %v2667_v32 = vrot.slane %v2442_v22, 4  ;;  %v3795_v55 = vrot.slane %v1958_v33, 7 }
 0x1f6   :  { %v2843_v30 = vadd.f32 %v2664_v28, %v2359_v51  ;;  %8396 = vst [vmem:[#allocation58_spill] sm:$0xff] %v6875_v36  ;;  %v3151_v43 = vrot.slane %v2926_v54, 5  ;;  %v6880_v11 = vmul.f32 0.0010283801, %v6296_v44  ;;  %v989_v48 = vmul.f32 0.007598758, %v6296_v44 }
 0x1f7   :  { %v1473_v16 = vmul.f32 0.036000773, %v6296_v44  ;;  %v1957_v1 = vmul.f32 0.10936069, %v6296_v44  ;;  %v2441_v27 = vmul.f32 0.21300554, %v6296_v44  ;;  %v6888_v46 = vadd.f32 %v3931_v63, %v6755_v53 }
 0x1f8   :  { %v3327_v61 = vadd.f32 %v3148_v57, %v2843_v30  ;;  %8397 = vst [vmem:[#allocation59_spill] sm:$0xff] %v6880_v11  ;;  %v2925_v28 = vmul.f32 0.26601171, %v6296_v44  ;;  %v3473_v39 = vrot.slane %v2442_v22, 6  ;;  %v1213_v50 = vrot.slane %v989_v48, 1 }
 0x1f9   :  { %v1697_v57 = vrot.slane %v1473_v16, 2  ;;  %v2181_v15 = vrot.slane %v1957_v1, 3  ;;  %v2665_v6 = vrot.slane %v2441_v27, 4  ;;  %v3471_v51 = vrot.slane %v2441_v27, 6  ;;  %v6906_v16 = vpop.f32.mrb[33].mxu1 }
 0x1fa   :  { %v3649_v62 = vadd.f32 %v3470_v13, %v3327_v61  ;;  %v3149_v49 = vrot.slane %v2925_v28, 5  ;;  %v8398_v33 = vrot.slane %v6775_v18, 1  ;;  %v1216_v44 = vsel %vm1089_vm1, %v1213_v50, %v8242_v25  ;;  %v8399_v28 = vld [vmem:[#allocation31_spill] sm:$0xff] }
 0x1fb   :  { %v1700_v53 = vsel %vm1573_vm2, %v1697_v57, %v1699_v59  ;;  %v1393_v13 = vadd.f32 %v1216_v44, %v6880_v11  ;;  %v2184_v63 = vsel %vm2057_vm3, %v2181_v15, %v2183_v40  ;;  %v2668_v22 = vsel %vm2541_vm4, %v2665_v6, %v2667_v32 }
 0x1fc   :  { %v3971_v35 = vadd.f32 %v3792_v60, %v3649_v62  ;;  %v1214_v54 = vsel %vm1089_vm1, %v8398_v33, %v1213_v50  ;;  %v3152_v30 = vsel %vm3025_vm5, %v3149_v49, %v3151_v43  ;;  %v3474_v18 = vsel %vm3347_vm6, %v3471_v51, %v3473_v39 }
 0x1fd   :  { %v3793_v61 = vrot.slane %v1957_v1, 7  ;;  %v1877_v27 = vadd.f32 %v1700_v53, %v1393_v13  ;;  %v6909_v59 = vmul.f32 0.007598758, %v8399_v28  ;;  %v6912_v62 = vmul.f32 0.036000773, %v8399_v28  ;;  %v6932_v53 = vpop.f32.mrb[34].mxu0 }
 0x1fe   :  { %v4051_v48 = vadd.f32 %v3971_v35, %v6778_v3  ;;  %v1918_v40 = vmul.f32 0.10936069, %v8399_v28  ;;  %v2402_v39 = vmul.f32 0.21300554, %v8399_v28  ;;  %v2886_v1 = vmul.f32 0.26601171, %v8399_v28 }
 0x1ff   :  { %v3796_v32 = vsel %vm3669_vm7, %v3793_v61, %v3795_v55  ;;  %v2361_v3 = vadd.f32 %v2184_v63, %v1877_v27  ;;  %v6922_v57 = vmul.f32 0.0010283801, %v8399_v28  ;;  %v1619_v6 = vrot.slane %v6912_v62, 2 }
 0x200   :  { %v6916_v43 = vadd.f32 %v4051_v48, %v1214_v54  ;;  %v2103_v49 = vrot.slane %v1918_v40, 3  ;;  %v2587_v51 = vrot.slane %v2402_v39, 4  ;;  %v3071_v35 = vrot.slane %v2886_v1, 5 }
 0x201   :  { %v2845_v55 = vadd.f32 %v2668_v22, %v2361_v3  ;;  %v3393_v33 = vrot.slane %v2402_v39, 6  ;;  %v6927_v54 = vmul.f32 0.0010283801, %v6374_v45  ;;  %v6930_v44 = vmul.f32 0.007598758, %v6374_v45 }
 0x202   :  { %8400 = vst [vmem:[#allocation31_spill] sm:$0xff] %v6916_v43  ;;  %v6936_v13 = vmul.f32 %v8372_v12, %v8372_v12  ;;  %v6939_v63 = vmul.f32 0.036000773, %v6374_v45  ;;  %v6942_v61 = vmul.f32 0.10936069, %v6374_v45  ;;  %v3715_v27 = vrot.slane %v1918_v40, 7 }
 0x203   :  { %v6945_v22 = vmul.f32 0.21300554, %v6374_v45  ;;  %v3329_v48 = vadd.f32 %v3152_v30, %v2845_v55  ;;  %v6952_v3 = vmul.f32 0.26601171, %v6374_v45  ;;  %v869_v30 = vmul.f32 0.0010283801, %v6384_v42 }
 0x204   :  { %8401 = vst [vmem:[#allocation60_spill] sm:$0xff] %v6936_v13  ;;  %v1703_v1 = vrot.slane %v6939_v63, 2  ;;  %v2187_v12 = vrot.slane %v6942_v61, 3  ;;  %v6960_v40 = vmul.f32 %v8386_v14, %v8386_v14  ;;  %v949_v55 = vmul.f32 0.007598758, %v6384_v42 }
 0x205   :  { %v3651_v60 = vadd.f32 %v3474_v18, %v3329_v48  ;;  %v2671_v31 = vrot.slane %v6945_v22, 4  ;;  %v1433_v28 = vmul.f32 0.036000773, %v6384_v42  ;;  %v1917_v45 = vmul.f32 0.10936069, %v6384_v42 }
 0x206   :  { %8402 = vst [vmem:[#allocation61_spill] sm:$0xff] %v6960_v40  ;;  %v2401_v18 = vmul.f32 0.21300554, %v6384_v42  ;;  %v2885_v48 = vmul.f32 0.26601171, %v6384_v42  ;;  %v4280_v29 = vrot.slane %v869_v30, 2 }
 0x207   :  { %v6965_v39 = vadd.f32 %v3796_v32, %v3651_v60  ;;  %v1133_v50 = vrot.slane %v949_v55, 1  ;;  %v1617_v25 = vrot.slane %v1433_v28, 2  ;;  %v2101_v15 = vrot.slane %v1917_v45, 3 }
 0x208   :  { %v3713_v41 = vrot.slane %v1917_v45, 7  ;;  %v2585_v37 = vrot.slane %v2401_v18, 4  ;;  %v3069_v14 = vrot.slane %v2885_v48, 5  ;;  %v3391_v52 = vrot.slane %v2401_v18, 6  ;;  %v6980_v45 = vpop.f32.mrb[34].mxu1 }
 0x209   :  { %8403 = vst [vmem:[#allocation62_spill] sm:$0xff] %v6965_v39  ;;  %v8404_v43 = vrot.slane %v6764_v2, 2  ;;  %v8405_v19 = vrot.slane %v6752_v56, 1  ;;  %v8406_v32 = vrot.slane %v6909_v59, 1  ;;  %v1620_v55 = vsel %vm1573_vm2, %v1617_v25, %v1619_v6 }
 0x20a   :  { %v2104_v28 = vsel %vm2057_vm3, %v2101_v15, %v2103_v49  ;;  %v2588_v18 = vsel %vm2541_vm4, %v2585_v37, %v2587_v51  ;;  %v3072_v2 = vsel %vm3025_vm5, %v3069_v14, %v3071_v35  ;;  %v3716_v56 = vsel %vm3669_vm7, %v3713_v41, %v3715_v27 }
 0x20b   :  { %v4281_v34 = vsel %vm1573_vm2, %v8404_v43, %v4280_v29  ;;  %v1134_v60 = vsel %vm1089_vm1, %v8405_v19, %v1133_v50  ;;  %v1136_v42 = vsel %vm1089_vm1, %v1133_v50, %v8406_v32  ;;  %v3394_v29 = vsel %vm3347_vm6, %v3391_v52, %v3393_v33 }
 0x20c   :  { %v1353_v48 = vadd.f32 %v1136_v42, %v869_v30  ;;  %v4096_v19 = vadd.f32 %v6888_v46, %v1134_v60  ;;  %v6988_v43 = vmul.f32 0.0010283801, %v6409_v5  ;;  %v991_v25 = vmul.f32 0.007598758, %v6409_v5  ;;  %v6998_v46 = vpop.f32.mrb[35].mxu0  ;;  %v8409_v60 = vld [vmem:[#allocation21_spill] sm:$0xff] }
 0x20d   :  { %v1475_v15 = vmul.f32 0.036000773, %v6409_v5  ;;  %v1959_v6 = vmul.f32 0.10936069, %v6409_v5  ;;  %v2443_v37 = vmul.f32 0.21300554, %v6409_v5 }
 0x20e   :  { %8407 = vst [vmem:[#allocation63_spill] sm:$0xff] %v6988_v43  ;;  %v1837_v50 = vadd.f32 %v1620_v55, %v1353_v48  ;;  %v3155_v49 = vrot.slane %v6952_v3, 5  ;;  %v6995_v51 = vadd.f32 %v4281_v34, %v4096_v19  ;;  %v1217_v52 = vrot.slane %v991_v25, 1 }
 0x20f   :  { %v2927_v41 = vmul.f32 0.26601171, %v6409_v5  ;;  %v1701_v33 = vrot.slane %v1475_v15, 2  ;;  %v2185_v27 = vrot.slane %v1959_v6, 3  ;;  %v2669_v30 = vrot.slane %v2443_v37, 4 }
 0x210   :  { %8408 = vst [vmem:[#allocation64_spill] sm:$0xff] %v6995_v51  ;;  %v2321_v35 = vadd.f32 %v2104_v28, %v1837_v50  ;;  %v3799_v14 = vrot.slane %v6942_v61, 7  ;;  %v7003_v32 = vmul.f32 %v6995_v51, %v8409_v60  ;;  %v8411_v42 = vrot.slane %v6858_v17, 1 }
 0x211   :  { %v8413_v3 = vrot.slane %v6930_v44, 1  ;;  %v1704_v48 = vsel %vm1573_vm2, %v1701_v33, %v1703_v1  ;;  %v2188_v61 = vsel %vm2057_vm3, %v2185_v27, %v2187_v12  ;;  %v2672_v19 = vsel %vm2541_vm4, %v2669_v30, %v2671_v31 }
 0x212   :  { %8410 = vst [vmem:[#allocation21_spill] sm:$0xff] %v7003_v32  ;;  %v7008_v34 = vsel %vm1089_vm1, %v8411_v42, %v1217_v52  ;;  %v2805_v55 = vadd.f32 %v2588_v18, %v2321_v35  ;;  %v3153_v25 = vrot.slane %v2927_v41, 5  ;;  %v3475_v50 = vrot.slane %v2443_v37, 6  ;;  %v7023_v18 = vpop.f32.mrb[35].mxu1 }
 0x213   :  { %8412 = vst [vmem:[#allocation65_spill] sm:$0xff] %v7008_v34  ;;  %v1220_v5 = vsel %vm1089_vm1, %v1217_v52, %v8413_v3  ;;  %v3797_v15 = vrot.slane %v1959_v6, 7  ;;  %v7018_v42 = vmul.f32 0.0010283801, %v6454_v24  ;;  %v7021_v51 = vmul.f32 0.007598758, %v6454_v24 }
 0x214   :  { %v1395_v28 = vadd.f32 %v1220_v5, %v6988_v43  ;;  %v3289_v17 = vadd.f32 %v3072_v2, %v2805_v55  ;;  %v3156_v52 = vsel %vm3025_vm5, %v3153_v25, %v3155_v49  ;;  %v8414_v1 = vrot.slane %v6945_v22, 6 }
 0x215   :  { %v3800_v31 = vsel %vm3669_vm7, %v3797_v15, %v3799_v14  ;;  %v7031_v6 = vmul.f32 0.036000773, %v6454_v24  ;;  %v1920_v35 = vmul.f32 0.10936069, %v6454_v24  ;;  %v2404_v49 = vmul.f32 0.21300554, %v6454_v24 }
 0x216   :  { %v1879_v32 = vadd.f32 %v1704_v48, %v1395_v28  ;;  %v3478_v12 = vsel %vm3347_vm6, %v3475_v50, %v8414_v1  ;;  %v3611_v2 = vadd.f32 %v3394_v29, %v3289_v17  ;;  %v2888_v22 = vmul.f32 0.26601171, %v6454_v24 }
 0x217   :  { %v1623_v27 = vrot.slane %v7031_v6, 2  ;;  %v2107_v14 = vrot.slane %v1920_v35, 3  ;;  %v2591_v55 = vrot.slane %v2404_v49, 4  ;;  %v3719_v28 = vrot.slane %v1920_v35, 7 }
 0x218   :  { %v2363_v37 = vadd.f32 %v2188_v61, %v1879_v32  ;;  %v3933_v30 = vadd.f32 %v3716_v56, %v3611_v2  ;;  %v3075_v29 = vrot.slane %v2888_v22, 5  ;;  %v3397_v32 = vrot.slane %v2404_v49, 6 }
 0x219   :  { %v7041_v61 = vmul.f32 0.007598758, %v6474_v38  ;;  %v7044_v25 = vmul.f32 0.036000773, %v6474_v38  ;;  %v7047_v50 = vmul.f32 0.10936069, %v6474_v38 }
 0x21a   :  { %v2847_v3 = vadd.f32 %v2672_v19, %v2363_v37  ;;  %v7050_v24 = vmul.f32 0.0010283801, %v6474_v38  ;;  %v7053_v56 = vmul.f32 0.21300554, %v6474_v38  ;;  %v7056_v19 = vmul.f32 0.26601171, %v6474_v38 }
 0x21b   :  { %v4013_v15 = vadd.f32 %v3933_v30, %v6912_v62  ;;  %v1707_v1 = vrot.slane %v7044_v25, 2  ;;  %v2191_v2 = vrot.slane %v7047_v50, 3  ;;  %v7062_v37 = vpop.f32.mrb[36].mxu0  ;;  %v3803_v38 = vrot.slane %v7047_v50, 7 }
 0x21c   :  { %v3331_v48 = vadd.f32 %v3156_v52, %v2847_v3  ;;  %v2675_v35 = vrot.slane %v7053_v56, 4  ;;  %v3159_v49 = vrot.slane %v7056_v19, 5  ;;  %v3481_v22 = vrot.slane %v7053_v56, 6 }
 0x21d   :  { %v871_v62 = vmul.f32 0.0010283801, %v6493_v0  ;;  %v1435_v30 = vmul.f32 0.036000773, %v6493_v0  ;;  %v1919_v41 = vmul.f32 0.10936069, %v6493_v0 }
 0x21e   :  { %v3653_v17 = vadd.f32 %v3478_v12, %v3331_v48  ;;  %v951_v12 = vmul.f32 0.007598758, %v6493_v0  ;;  %v7073_v48 = vmul.f32 %v8409_v60, %v8409_v60  ;;  %v2403_v5 = vmul.f32 0.21300554, %v6493_v0 }
 0x21f   :  { %v2887_v19 = vmul.f32 0.26601171, %v6493_v0  ;;  %v1621_v52 = vrot.slane %v1435_v30, 2  ;;  %v4284_v50 = vrot.slane %v871_v62, 2  ;;  %v8416_v7 = vrot.slane %v6909_v59, 1 }
 0x220   :  { %v3975_v3 = vadd.f32 %v3800_v31, %v3653_v17  ;;  %8415 = vst [vmem:[#allocation66_spill] sm:$0xff] %v7073_v48  ;;  %v1137_v56 = vrot.slane %v951_v12, 1  ;;  %v913_v31 = vmul.f32 0.0010283801, %v6513_v58  ;;  %v2105_v17 = vrot.slane %v1919_v41, 3  ;;  %v7086_v12 = vpop.f32.mrb[36].mxu1 }
 0x221   :  { %v2589_v33 = vrot.slane %v2403_v5, 4  ;;  %v3073_v36 = vrot.slane %v2887_v19, 5  ;;  %v3395_v43 = vrot.slane %v2403_v5, 6  ;;  %v8417_v11 = vrot.slane %v7021_v51, 1  ;;  %v7091_v19 = vpop.f32.mrb[37].mxu0 }
 0x222   :  { %v1138_v60 = vsel %vm1089_vm1, %v8416_v7, %v1137_v56  ;;  %v1624_v39 = vsel %vm1573_vm2, %v1621_v52, %v1623_v27  ;;  %v3717_v0 = vrot.slane %v1919_v41, 7  ;;  %v2108_v10 = vsel %vm2057_vm3, %v2105_v17, %v2107_v14  ;;  %8418 = vst [vmem:[#allocation67_spill] sm:$0xff] %v7091_v19 }
 0x223   :  { %v1140_v34 = vsel %vm1089_vm1, %v1137_v56, %v8417_v11  ;;  %v2592_v48 = vsel %vm2541_vm4, %v2589_v33, %v2591_v55  ;;  %v3076_v5 = vsel %vm3025_vm5, %v3073_v36, %v3075_v29  ;;  %v3398_v7 = vsel %vm3347_vm6, %v3395_v43, %v3397_v32 }
 0x224   :  { %v1355_v30 = vadd.f32 %v1140_v34, %v871_v62  ;;  %v3720_v59 = vsel %vm3669_vm7, %v3717_v0, %v3719_v28  ;;  %v4098_v40 = vadd.f32 %v4013_v15, %v1138_v60  ;;  %v8419_v11 = vrot.slane %v6922_v57, 2 }
 0x225   :  { %v993_v34 = vmul.f32 0.007598758, %v6513_v58  ;;  %v1477_v14 = vmul.f32 0.036000773, %v6513_v58  ;;  %v1961_v33 = vmul.f32 0.10936069, %v6513_v58  ;;  %v4055_v29 = vadd.f32 %v3975_v3, %v6939_v63 }
 0x226   :  { %v4285_v41 = vsel %vm1573_vm2, %v8419_v11, %v4284_v50  ;;  %v1839_v27 = vadd.f32 %v1624_v39, %v1355_v30  ;;  %v2445_v36 = vmul.f32 0.21300554, %v6513_v58  ;;  %v2929_v43 = vmul.f32 0.26601171, %v6513_v58  ;;  %v7116_v11 = vpop.f32.mrb[37].mxu1 }
 0x227   :  { %v7101_v55 = vadd.f32 %v4285_v41, %v4098_v40  ;;  %v1221_v28 = vrot.slane %v993_v34, 1  ;;  %v1705_v57 = vrot.slane %v1477_v14, 2  ;;  %v2189_v15 = vrot.slane %v1961_v33, 3  ;;  %8423 = vst [vmem:[#allocation69_spill] sm:$0xff] %v7116_v11  ;;  %v5447_v34 = vpop.f32.mrb[38].mxu1 }
 0x228   :  { %v2323_v32 = vadd.f32 %v2108_v10, %v1839_v27  ;;  %v2673_v52 = vrot.slane %v2445_v36, 4  ;;  %v3157_v39 = vrot.slane %v2929_v43, 5  ;;  %v3479_v62 = vrot.slane %v2445_v36, 6  ;;  %v8424_v36 = vld [vmem:[#allocation41_spill] sm:$0xff] }
 0x229   :  { %8420 = vst [vmem:[#allocation68_spill] sm:$0xff] %v7101_v55  ;;  %v3801_v56 = vrot.slane %v1961_v33, 7  ;;  %v8421_v17 = vrot.slane %v6930_v44, 1  ;;  %v8422_v60 = vrot.slane %v7041_v61, 1  ;;  %v1708_v58 = vsel %vm1573_vm2, %v1705_v57, %v1707_v1 }
 0x22a   :  { %v2807_v50 = vadd.f32 %v2592_v48, %v2323_v32  ;;  %v2192_v10 = vsel %vm2057_vm3, %v2189_v15, %v2191_v2  ;;  %v2676_v3 = vsel %vm2541_vm4, %v2673_v52, %v2675_v35  ;;  %v3160_v30 = vsel %vm3025_vm5, %v3157_v39, %v3159_v49 }
 0x22b   :  { %v1222_v40 = vsel %vm1089_vm1, %v8421_v17, %v1221_v28  ;;  %v1224_v0 = vsel %vm1089_vm1, %v1221_v28, %v8422_v60  ;;  %v3482_v44 = vsel %vm3347_vm6, %v3479_v62, %v3481_v22  ;;  %v3804_v41 = vsel %vm3669_vm7, %v3801_v56, %v3803_v38  ;;  %v8427_v60 = vld [vmem:[#allocation42_spill] sm:$0xff] }
 0x22c   :  { %v1397_v63 = vadd.f32 %v1224_v0, %v913_v31  ;;  %v3291_v48 = vadd.f32 %v3076_v5, %v2807_v50  ;;  %v4140_v27 = vadd.f32 %v4055_v29, %v1222_v40  ;;  %v4368_v33 = vrot.slane %v913_v31, 2 }
 0x22d   :  { %v7121_v1 = vmul.f32 0.0010283801, %v8424_v36  ;;  %v7124_v2 = vmul.f32 0.007598758, %v8424_v36  ;;  %v7127_v49 = vmul.f32 0.036000773, %v8424_v36 }
 0x22e   :  { %v1881_v14 = vadd.f32 %v1708_v58, %v1397_v63  ;;  %v3613_v35 = vadd.f32 %v3398_v7, %v3291_v48  ;;  %v7130_v5 = vmul.f32 0.10936069, %v8424_v36  ;;  %v2406_v22 = vmul.f32 0.21300554, %v8424_v36  ;;  %v8432_v7 = vld [vmem:[#allocation17_spill] sm:$0xff] }
 0x22f   :  { %v8425_v31 = vrot.slane %v6927_v54, 2  ;;  %v2890_v32 = vmul.f32 0.26601171, %v8424_v36  ;;  %v1627_v15 = vrot.slane %v7127_v49, 2  ;;  %v7148_v0 = vmul.f32 0.007598758, %v8427_v60 }
 0x230   :  { %v2365_v43 = vadd.f32 %v2192_v10, %v1881_v14  ;;  %v3935_v28 = vadd.f32 %v3720_v59, %v3613_v35  ;;  %v2111_v39 = vrot.slane %v7130_v5, 3  ;;  %v2595_v62 = vrot.slane %v2406_v22, 4  ;;  %v7172_v35 = vpop.f32.mrb[38].mxu0 }
 0x231   :  { %v4369_v29 = vsel %vm1573_vm2, %v8425_v31, %v4368_v33  ;;  %v3079_v56 = vrot.slane %v2890_v32, 5  ;;  %v3401_v54 = vrot.slane %v2406_v22, 6  ;;  %v3723_v17 = vrot.slane %v7130_v5, 7  ;;  %8430 = vst [vmem:[#allocation70_spill] sm:$0xff] %v7172_v35  ;;  %v8431_v32 = vld [vmem:[#allocation45_spill] sm:$0xff] }
 0x232   :  { %v7138_v57 = vadd.f32 %v4369_v29, %v4140_v27  ;;  %v2849_v52 = vadd.f32 %v2676_v3, %v2365_v43  ;;  %v7151_v58 = vmul.f32 0.036000773, %v8427_v60  ;;  %v7154_v63 = vmul.f32 0.10936069, %v8427_v60  ;;  %v8428_v27 = vld [vmem:[#allocation26_spill] sm:$0xff] }
 0x233   :  { %v7157_v10 = vmul.f32 0.0010283801, %v8427_v60  ;;  %v7160_v3 = vmul.f32 0.21300554, %v8427_v60  ;;  %v7163_v48 = vmul.f32 0.26601171, %v8427_v60  ;;  %v4015_v38 = vadd.f32 %v3935_v28, %v7031_v6 }
 0x234   :  { %8426 = vst [vmem:[#allocation41_spill] sm:$0xff] %v7138_v57  ;;  %v3333_v59 = vadd.f32 %v3160_v30, %v2849_v52  ;;  %v7167_v30 = vmul.f32 %v8428_v27, %v8428_v27  ;;  %v1711_v33 = vrot.slane %v7151_v58, 2  ;;  %v2195_v36 = vrot.slane %v7154_v63, 3 }
 0x235   :  { %v2679_v5 = vrot.slane %v7160_v3, 4  ;;  %v3163_v22 = vrot.slane %v7163_v48, 5  ;;  %v3485_v43 = vrot.slane %v7160_v3, 6  ;;  %v3807_v31 = vrot.slane %v7154_v63, 7 }
 0x236   :  { %8429 = vst [vmem:[#allocation42_spill] sm:$0xff] %v7167_v30  ;;  %v3655_v34 = vadd.f32 %v3482_v44, %v3333_v59  ;;  %v873_v52 = vmul.f32 0.0010283801, %v8431_v32  ;;  %v953_v44 = vmul.f32 0.007598758, %v8431_v32  ;;  %v8434_v57 = vrot.slane %v7021_v51, 1 }
 0x237   :  { %v1437_v59 = vmul.f32 0.036000773, %v8431_v32  ;;  %v1921_v60 = vmul.f32 0.10936069, %v8431_v32  ;;  %v2405_v50 = vmul.f32 0.21300554, %v8431_v32 }
 0x238   :  { %v3977_v29 = vadd.f32 %v3804_v41, %v3655_v34  ;;  %v2889_v40 = vmul.f32 0.26601171, %v8431_v32  ;;  %v1141_v48 = vrot.slane %v953_v44, 1  ;;  %v4288_v3 = vrot.slane %v873_v52, 2  ;;  %v7186_v41 = vpop.f32.mrb[39].mxu0 }
 0x239   :  { %v1625_v14 = vrot.slane %v1437_v59, 2  ;;  %v915_v63 = vmul.f32 0.0010283801, %v8432_v7  ;;  %8433 = vst [vmem:[#allocation45_spill] sm:$0xff] %v7186_v41  ;;  %v2109_v34 = vrot.slane %v1921_v60, 3  ;;  %v2593_v55 = vrot.slane %v2405_v50, 4 }
 0x23a   :  { %v3077_v27 = vrot.slane %v2889_v40, 5  ;;  %v3399_v9 = vrot.slane %v2405_v50, 6  ;;  %v1142_v30 = vsel %vm1089_vm1, %v8434_v57, %v1141_v48  ;;  %v8435_v35 = vrot.slane %v7124_v2, 1 }
 0x23b   :  { %v1628_v6 = vsel %vm1573_vm2, %v1625_v14, %v1627_v15  ;;  %v3721_v28 = vrot.slane %v1921_v60, 7  ;;  %v2112_v59 = vsel %vm2057_vm3, %v2109_v34, %v2111_v39  ;;  %v2596_v41 = vsel %vm2541_vm4, %v2593_v55, %v2595_v62 }
 0x23c   :  { %v1144_v32 = vsel %vm1089_vm1, %v1141_v48, %v8435_v35  ;;  %v3080_v11 = vsel %vm3025_vm5, %v3077_v27, %v3079_v56  ;;  %v3402_v50 = vsel %vm3347_vm6, %v3399_v9, %v3401_v54  ;;  %v4100_v40 = vadd.f32 %v4015_v38, %v1142_v30  ;;  %v7211_v38 = vpop.f32.mrb[40].mxu0 }
 0x23d   :  { %v1357_v44 = vadd.f32 %v1144_v32, %v873_v52  ;;  %v3724_v51 = vsel %vm3669_vm7, %v3721_v28, %v3723_v17  ;;  %v8436_v57 = vrot.slane %v7018_v42, 2  ;;  %v995_v15 = vmul.f32 0.007598758, %v8432_v7 }
 0x23e   :  { %v1479_v14 = vmul.f32 0.036000773, %v8432_v7  ;;  %v1963_v39 = vmul.f32 0.10936069, %v8432_v7  ;;  %v2447_v55 = vmul.f32 0.21300554, %v8432_v7  ;;  %v4057_v62 = vadd.f32 %v3977_v29, %v7044_v25 }
 0x23f   :  { %v4289_v19 = vsel %vm1573_vm2, %v8436_v57, %v4288_v3  ;;  %v1841_v35 = vadd.f32 %v1628_v6, %v1357_v44  ;;  %v2931_v9 = vmul.f32 0.26601171, %v8432_v7  ;;  %v1225_v56 = vrot.slane %v995_v15, 1 }
 0x240   :  { %v7206_v52 = vadd.f32 %v4289_v19, %v4100_v40  ;;  %v1709_v54 = vrot.slane %v1479_v14, 2  ;;  %v2193_v17 = vrot.slane %v1963_v39, 3  ;;  %v2677_v27 = vrot.slane %v2447_v55, 4 }
 0x241   :  { %v2325_v42 = vadd.f32 %v2112_v59, %v1841_v35  ;;  %v3161_v30 = vrot.slane %v2931_v9, 5  ;;  %v3483_v60 = vrot.slane %v2447_v55, 6  ;;  %v3805_v48 = vrot.slane %v1963_v39, 7  ;;  %v7223_v59 = vpop.f32.mrb[41].mxu0 }
 0x242   :  { %8437 = vst [vmem:[#allocation17_spill] sm:$0xff] %v7206_v52  ;;  %v8438_v19 = vrot.slane %v7041_v61, 1  ;;  %v8439_v32 = vrot.slane %v7148_v0, 1  ;;  %v1712_v25 = vsel %vm1573_vm2, %v1709_v54, %v1711_v33  ;;  %v2196_v6 = vsel %vm2057_vm3, %v2193_v17, %v2195_v36  ;;  %v8440_v33 = vld [vmem:[#allocation18_spill] sm:$0xff] }
 0x243   :  { %v2809_v3 = vadd.f32 %v2596_v41, %v2325_v42  ;;  %v2680_v28 = vsel %vm2541_vm4, %v2677_v27, %v2679_v5  ;;  %v3164_v44 = vsel %vm3025_vm5, %v3161_v30, %v3163_v22  ;;  %v3486_v61 = vsel %vm3347_vm6, %v3483_v60, %v3485_v43 }
 0x244   :  { %v1226_v34 = vsel %vm1089_vm1, %v8438_v19, %v1225_v56  ;;  %v1228_v7 = vsel %vm1089_vm1, %v1225_v56, %v8439_v32  ;;  %v3808_v40 = vsel %vm3669_vm7, %v3805_v48, %v3807_v31  ;;  %v4372_v14 = vrot.slane %v915_v63, 2 }
 0x245   :  { %v1399_v29 = vadd.f32 %v1228_v7, %v915_v63  ;;  %v3293_v41 = vadd.f32 %v3080_v11, %v2809_v3  ;;  %v4142_v57 = vadd.f32 %v4057_v62, %v1226_v34  ;;  %v7229_v39 = vmul.f32 0.007598758, %v8440_v33 }
 0x246   :  { %v7232_v5 = vmul.f32 0.036000773, %v8440_v33  ;;  %v1924_v22 = vmul.f32 0.10936069, %v8440_v33  ;;  %v2408_v11 = vmul.f32 0.21300554, %v8440_v33 }
 0x247   :  { %v1883_v15 = vadd.f32 %v1712_v25, %v1399_v29  ;;  %v3615_v36 = vadd.f32 %v3402_v50, %v3293_v41  ;;  %v8441_v43 = vrot.slane %v7050_v24, 2  ;;  %v7240_v9 = vmul.f32 0.0010283801, %v8440_v33 }
 0x248   :  { %v2892_v63 = vmul.f32 0.26601171, %v8440_v33  ;;  %v1147_v50 = vrot.slane %v7229_v39, 1  ;;  %v1631_v56 = vrot.slane %v7232_v5, 2  ;;  %v2115_v17 = vrot.slane %v1924_v22, 3 }
 0x249   :  { %v2367_v55 = vadd.f32 %v2196_v6, %v1883_v15  ;;  %v4373_v31 = vsel %vm1573_vm2, %v8441_v43, %v4372_v14  ;;  %v3937_v62 = vadd.f32 %v3724_v51, %v3615_v36  ;;  %v2599_v27 = vrot.slane %v2408_v11, 4 }
 0x24a   :  { %v7243_v42 = vadd.f32 %v4373_v31, %v4142_v57  ;;  %v3083_v30 = vrot.slane %v2892_v63, 5  ;;  %v3405_v60 = vrot.slane %v2408_v11, 6  ;;  %v3727_v48 = vrot.slane %v1924_v22, 7 }
 0x24b   :  { %v2851_v54 = vadd.f32 %v2680_v28, %v2367_v55  ;;  %v7250_v3 = vmul.f32 0.0010283801, %v6682_v47  ;;  %v7253_v51 = vmul.f32 0.007598758, %v6682_v47  ;;  %v7256_v34 = vmul.f32 0.036000773, %v6682_v47 }
 0x24c   :  { %8442 = vst [vmem:[#allocation18_spill] sm:$0xff] %v7243_v42  ;;  %v7259_v32 = vmul.f32 0.10936069, %v6682_v47  ;;  %v7263_v25 = vmul.f32 0.21300554, %v6682_v47  ;;  %v4017_v63 = vadd.f32 %v3937_v62, %v7127_v49  ;;  %v8443_v6 = vrot.slane %v7124_v2, 1 }
 0x24d   :  { %v3335_v19 = vadd.f32 %v3164_v44, %v2851_v54  ;;  %v7266_v29 = vmul.f32 0.26601171, %v6682_v47  ;;  %v1715_v41 = vrot.slane %v7256_v34, 2  ;;  %v875_v47 = vmul.f32 0.0010283801, %v6690_v8 }
 0x24e   :  { %v2199_v57 = vrot.slane %v7259_v32, 3  ;;  %v2683_v15 = vrot.slane %v7263_v25, 4  ;;  %v3489_v33 = vrot.slane %v7263_v25, 6  ;;  %v3811_v36 = vrot.slane %v7259_v32, 7 }
 0x24f   :  { %v3657_v28 = vadd.f32 %v3486_v61, %v3335_v19  ;;  %v3167_v14 = vrot.slane %v7266_v29, 5  ;;  %v955_v11 = vmul.f32 0.007598758, %v6690_v8  ;;  %v1439_v61 = vmul.f32 0.036000773, %v6690_v8 }
 0x250   :  { %v1923_v55 = vmul.f32 0.10936069, %v6690_v8  ;;  %v2407_v43 = vmul.f32 0.21300554, %v6690_v8  ;;  %v2891_v31 = vmul.f32 0.26601171, %v6690_v8 }
 0x251   :  { %v3979_v22 = vadd.f32 %v3808_v40, %v3657_v28  ;;  %v1145_v54 = vrot.slane %v955_v11, 1  ;;  %v1629_v19 = vrot.slane %v1439_v61, 2  ;;  %v4292_v25 = vrot.slane %v875_v47, 2  ;;  %v7284_v40 = vpop.f32.mrb[39].mxu1 }
 0x252   :  { %v917_v32 = vmul.f32 0.0010283801, %v6716_v23  ;;  %v2113_v29 = vrot.slane %v1923_v55, 3  ;;  %v2597_v28 = vrot.slane %v2407_v43, 4  ;;  %v3081_v24 = vrot.slane %v2891_v31, 5 }
 0x253   :  { %v3403_v7 = vrot.slane %v2407_v43, 6  ;;  %v1146_v35 = vsel %vm1089_vm1, %v8443_v6, %v1145_v54  ;;  %v1148_v8 = vsel %vm1089_vm1, %v1145_v54, %v1147_v50  ;;  %v1632_v49 = vsel %vm1573_vm2, %v1629_v19, %v1631_v56 }
 0x254   :  { %v3725_v62 = vrot.slane %v1923_v55, 7  ;;  %v1359_v11 = vadd.f32 %v1148_v8, %v875_v47  ;;  %v2116_v61 = vsel %vm2057_vm3, %v2113_v29, %v2115_v17  ;;  %v2600_v44 = vsel %vm2541_vm4, %v2597_v28, %v2599_v27 }
 0x255   :  { %v3084_v52 = vsel %vm3025_vm5, %v3081_v24, %v3083_v30  ;;  %v3406_v43 = vsel %vm3347_vm6, %v3403_v7, %v3405_v60  ;;  %v7298_v31 = vadd.f32 %v4017_v63, %v1146_v35  ;;  %v8445_v6 = vrot.slane %v7121_v1, 2 }
 0x256   :  { %v3728_v2 = vsel %vm3669_vm7, %v3725_v62, %v3727_v48  ;;  %v1843_v56 = vadd.f32 %v1632_v49, %v1359_v11  ;;  %v997_v47 = vmul.f32 0.007598758, %v6716_v23  ;;  %v1481_v17 = vmul.f32 0.036000773, %v6716_v23 }
 0x257   :  { %8444 = vst [vmem:[#allocation71_spill] sm:$0xff] %v7298_v31  ;;  %v7303_v54 = vsel %vm1573_vm2, %v8445_v6, %v4292_v25  ;;  %v1965_v27 = vmul.f32 0.10936069, %v6716_v23  ;;  %v2449_v30 = vmul.f32 0.21300554, %v6716_v23  ;;  %v4059_v60 = vadd.f32 %v3979_v22, %v7151_v58 }
 0x258   :  { %8446 = vst [vmem:[#allocation72_spill] sm:$0xff] %v7303_v54  ;;  %v2933_v24 = vmul.f32 0.26601171, %v6716_v23  ;;  %v4376_v35 = vrot.slane %v917_v32, 2  ;;  %v2327_v48 = vadd.f32 %v2116_v61, %v1843_v56  ;;  %v1229_v7 = vrot.slane %v997_v47, 1 }
 0x259   :  { %v1713_v1 = vrot.slane %v1481_v17, 2  ;;  %v2197_v55 = vrot.slane %v1965_v27, 3  ;;  %v2681_v63 = vrot.slane %v2449_v30, 4  ;;  %v3487_v25 = vrot.slane %v2449_v30, 6 }
 0x25a   :  { %v3165_v19 = vrot.slane %v2933_v24, 5  ;;  %v3809_v29 = vrot.slane %v1965_v27, 7  ;;  %v2811_v28 = vadd.f32 %v2600_v44, %v2327_v48  ;;  %v8447_v8 = vrot.slane %v7148_v0, 1  ;;  %v8450_v24 = vld [vmem:[#allocation48_spill] sm:$0xff] }
 0x25b   :  { %v8448_v62 = vrot.slane %v7253_v51, 1  ;;  %v1716_v58 = vsel %vm1573_vm2, %v1713_v1, %v1715_v41  ;;  %v2200_v11 = vsel %vm2057_vm3, %v2197_v55, %v2199_v57  ;;  %v2684_v61 = vsel %vm2541_vm4, %v2681_v63, %v2683_v15 }
 0x25c   :  { %v1230_v49 = vsel %vm1089_vm1, %v8447_v8, %v1229_v7  ;;  %v3168_v6 = vsel %vm3025_vm5, %v3165_v19, %v3167_v14  ;;  %v3295_v56 = vadd.f32 %v3084_v52, %v2811_v28  ;;  %v3490_v44 = vsel %vm3347_vm6, %v3487_v25, %v3489_v33 }
 0x25d   :  { %v1232_v23 = vsel %vm1089_vm1, %v1229_v7, %v8448_v62  ;;  %v3812_v0 = vsel %vm3669_vm7, %v3809_v29, %v3811_v36  ;;  %v4144_v47 = vadd.f32 %v4059_v60, %v1230_v49  ;;  %v8449_v27 = vrot.slane %v7157_v10, 2  ;;  %v8452_v29 = vld [vmem:[#allocation51_spill] sm:$0xff] }
 0x25e   :  { %v1401_v22 = vadd.f32 %v1232_v23, %v917_v32  ;;  %v7327_v41 = vmul.f32 0.0010283801, %v8450_v24  ;;  %v7330_v57 = vmul.f32 0.007598758, %v8450_v24  ;;  %v3617_v15 = vadd.f32 %v3406_v43, %v3295_v56  ;;  %v8453_v56 = vld [vmem:[#allocation52_spill] sm:$0xff] }
 0x25f   :  { %v4377_v30 = vsel %vm1573_vm2, %v8449_v27, %v4376_v35  ;;  %v7335_v52 = vmul.f32 0.036000773, %v8450_v24  ;;  %v1926_v14 = vmul.f32 0.10936069, %v8450_v24  ;;  %v2410_v10 = vmul.f32 0.21300554, %v8450_v24 }
 0x260   :  { %v1885_v17 = vadd.f32 %v1716_v58, %v1401_v22  ;;  %v7332_v32 = vadd.f32 %v4377_v30, %v4144_v47  ;;  %v8267_v36 = vrot.slane %v7330_v57, 1  ;;  %v2894_v60 = vmul.f32 0.26601171, %v8450_v24 }
 0x261   :  { %v3939_v35 = vadd.f32 %v3728_v2, %v3617_v15  ;;  %v1635_v48 = vrot.slane %v7335_v52, 2  ;;  %v2119_v7 = vrot.slane %v1926_v14, 3  ;;  %v3731_v1 = vrot.slane %v1926_v14, 7 }
 0x262   :  { %8451 = vst [vmem:[#allocation48_spill] sm:$0xff] %v7332_v32  ;;  %v2369_v33 = vadd.f32 %v2200_v11, %v1885_v17  ;;  %v2603_v55 = vrot.slane %v2410_v10, 4  ;;  %v3087_v63 = vrot.slane %v2894_v60, 5  ;;  %v3409_v19 = vrot.slane %v2410_v10, 6 }
 0x263   :  { %v7344_v28 = vmul.f32 0.0010283801, %v8452_v29  ;;  %v7347_v8 = vmul.f32 0.007598758, %v8452_v29  ;;  %v4019_v49 = vadd.f32 %v3939_v35, %v7232_v5  ;;  %v7351_v2 = vmul.f32 0.036000773, %v8452_v29 }
 0x264   :  { %v2853_v43 = vadd.f32 %v2684_v61, %v2369_v33  ;;  %v7354_v23 = vmul.f32 0.10936069, %v8452_v29  ;;  %v7357_v58 = vmul.f32 0.21300554, %v8452_v29  ;;  %v2936_v11 = vmul.f32 0.26601171, %v8452_v29 }
 0x265   :  { %v7363_v47 = vmul.f32 0.0010283801, %v8453_v56  ;;  %v957_v14 = vmul.f32 0.007598758, %v8453_v56  ;;  %v1441_v10 = vmul.f32 0.036000773, %v8453_v56 }
 0x266   :  { %v3337_v62 = vadd.f32 %v3168_v6, %v2853_v43  ;;  %v1719_v6 = vrot.slane %v7351_v2, 2  ;;  %v2203_v17 = vrot.slane %v7354_v23, 3  ;;  %v2687_v27 = vrot.slane %v7357_v58, 4 }
 0x267   :  { %v3171_v30 = vrot.slane %v2936_v11, 5  ;;  %v3493_v24 = vrot.slane %v7357_v58, 6  ;;  %v3815_v15 = vrot.slane %v7354_v23, 7  ;;  %v1925_v60 = vmul.f32 0.10936069, %v8453_v56 }
 0x268   :  { %v3659_v5 = vadd.f32 %v3490_v44, %v3337_v62  ;;  %v2409_v44 = vmul.f32 0.21300554, %v8453_v56  ;;  %v1149_v35 = vrot.slane %v957_v14, 1  ;;  %v2893_v43 = vmul.f32 0.26601171, %v8453_v56  ;;  %v8454_v62 = vld [vmem:[#allocation53_spill] sm:$0xff] }
 0x269   :  { %v919_v11 = vmul.f32 0.0010283801, %v8454_v62  ;;  %v1633_v25 = vrot.slane %v1441_v10, 2  ;;  %v2117_v58 = vrot.slane %v1925_v60, 3  ;;  %v3729_v14 = vrot.slane %v1925_v60, 7 }
 0x26a   :  { %v3981_v33 = vadd.f32 %v3812_v0, %v3659_v5  ;;  %v2601_v61 = vrot.slane %v2409_v44, 4  ;;  %v3407_v23 = vrot.slane %v2409_v44, 6  ;;  %v1150_v0 = vsel %vm1089_vm1, %v1147_v50, %v1149_v35 }
 0x26b   :  { %v1152_v5 = vsel %vm1089_vm1, %v1149_v35, %v8267_v36  ;;  %v3085_v22 = vrot.slane %v2893_v43, 5  ;;  %v1636_v29 = vsel %vm1573_vm2, %v1633_v25, %v1635_v48  ;;  %v2120_v32 = vsel %vm2057_vm3, %v2117_v58, %v2119_v7 }
 0x26c   :  { %v1361_v56 = vadd.f32 %v1152_v5, %v7363_v47  ;;  %v2604_v10 = vsel %vm2541_vm4, %v2601_v61, %v2603_v55  ;;  %v3410_v39 = vsel %vm3347_vm6, %v3407_v23, %v3409_v19  ;;  %v7390_v50 = vsel %vm3669_vm7, %v3729_v14, %v3731_v1 }
 0x26d   :  { %v3088_v44 = vsel %vm3025_vm5, %v3085_v22, %v3087_v63  ;;  %v7392_v21 = vadd.f32 %v4019_v49, %v1150_v0  ;;  %v999_v60 = vmul.f32 0.007598758, %v8454_v62  ;;  %v1483_v43 = vmul.f32 0.036000773, %v8454_v62 }
 0x26e   :  { %v1845_v35 = vadd.f32 %v1636_v29, %v1361_v56  ;;  %v1967_v48 = vmul.f32 0.10936069, %v8454_v62  ;;  %v2451_v7 = vmul.f32 0.21300554, %v8454_v62  ;;  %v2935_v55 = vmul.f32 0.26601171, %v8454_v62 }
 0x26f   :  { %8455 = vst [vmem:[#allocation51_spill] sm:$0xff] %v7392_v21  ;;  %v4061_v63 = vadd.f32 %v3981_v33, %v7256_v34  ;;  %v4380_v25 = vrot.slane %v919_v11, 2  ;;  %v1233_v22 = vrot.slane %v999_v60, 1  ;;  %v1717_v1 = vrot.slane %v1483_v43, 2 }
 0x270   :  { %v2329_v19 = vadd.f32 %v2120_v32, %v1845_v35  ;;  %v2201_v61 = vrot.slane %v1967_v48, 3  ;;  %v2685_v49 = vrot.slane %v2451_v7, 4  ;;  %v3169_v58 = vrot.slane %v2935_v55, 5 }
 0x271   :  { %v3491_v29 = vrot.slane %v2451_v7, 6  ;;  %v3813_v23 = vrot.slane %v1967_v48, 7  ;;  %v8456_v5 = vrot.slane %v7253_v51, 1  ;;  %v8457_v56 = vrot.slane %v7347_v8, 1 }
 0x272   :  { %v2813_v0 = vadd.f32 %v2604_v10, %v2329_v19  ;;  %v1720_v34 = vsel %vm1573_vm2, %v1717_v1, %v1719_v6  ;;  %v2204_v32 = vsel %vm2057_vm3, %v2201_v61, %v2203_v17  ;;  %v2688_v35 = vsel %vm2541_vm4, %v2685_v49, %v2687_v27 }
 0x273   :  { %v1234_v14 = vsel %vm1089_vm1, %v8456_v5, %v1233_v22  ;;  %v1236_v62 = vsel %vm1089_vm1, %v1233_v22, %v8457_v56  ;;  %v3172_v60 = vsel %vm3025_vm5, %v3169_v58, %v3171_v30  ;;  %v3494_v10 = vsel %vm3347_vm6, %v3491_v29, %v3493_v24  ;;  %v8462_v56 = vld [vmem:[#allocation37_spill] sm:$0xff] }
 0x274   :  { %v1403_v33 = vadd.f32 %v1236_v62, %v919_v11  ;;  %v3297_v43 = vadd.f32 %v3088_v44, %v2813_v0  ;;  %v3816_v51 = vsel %vm3669_vm7, %v3813_v23, %v3815_v15  ;;  %v4146_v48 = vadd.f32 %v4061_v63, %v1234_v14 }
 0x275   :  { %v8458_v55 = vrot.slane %v7250_v3, 2  ;;  %v7416_v6 = vmul.f32 0.0010283801, %v6841_v26  ;;  %v7419_v17 = vmul.f32 0.007598758, %v6841_v26  ;;  %v8463_v62 = vrot.slane %v8462_v56, 1 }
 0x276   :  { %v1887_v7 = vadd.f32 %v1720_v34, %v1403_v33  ;;  %v7421_v27 = vadd.f32 %v3410_v39, %v3297_v43  ;;  %v7426_v24 = vmul.f32 0.036000773, %v6841_v26  ;;  %v1928_v15 = vmul.f32 0.10936069, %v6841_v26 }
 0x277   :  { %v4381_v19 = vsel %vm1573_vm2, %v8458_v55, %v4380_v25  ;;  %v8269_v3 = vrot.slane %v7419_v17, 1  ;;  %v2412_v44 = vmul.f32 0.21300554, %v6841_v26  ;;  %v2896_v63 = vmul.f32 0.26601171, %v6841_v26  ;;  %v8460_v26 = vld [vmem:[#allocation14_spill] sm:$0xff] }
 0x278   :  { %v7423_v30 = vadd.f32 %v4381_v19, %v4146_v48  ;;  %v2371_v11 = vadd.f32 %v2204_v32, %v1887_v7  ;;  %v1639_v25 = vrot.slane %v7426_v24, 2  ;;  %v2123_v22 = vrot.slane %v1928_v15, 3 }
 0x279   :  { %v3735_v1 = vrot.slane %v1928_v15, 7  ;;  %v2607_v49 = vrot.slane %v2412_v44, 4  ;;  %v3091_v58 = vrot.slane %v2896_v63, 5  ;;  %v3413_v29 = vrot.slane %v2412_v44, 6 }
 0x27a   :  { %8459 = vst [vmem:[#allocation52_spill] sm:$0xff] %v7423_v30  ;;  %v2855_v61 = vadd.f32 %v2688_v35, %v2371_v11  ;;  %v7435_v23 = vmul.f32 0.0010283801, %v6872_v20  ;;  %v7438_v0 = vmul.f32 0.007598758, %v6872_v20  ;;  %v8461_v14 = vrot.slane %v8460_v26, 1 }
 0x27b   :  { %v7441_v5 = vmul.f32 0.036000773, %v6872_v20  ;;  %v7451_v32 = vmul.f32 0.10936069, %v6872_v20  ;;  %v2454_v35 = vmul.f32 0.21300554, %v6872_v20 }
 0x27c   :  { %v7448_v34 = vsel %vm1089_vm1, %v8463_v62, %v8461_v14  ;;  %v3339_v33 = vadd.f32 %v3172_v60, %v2855_v61  ;;  %v2938_v43 = vmul.f32 0.26601171, %v6872_v20  ;;  %v7459_v19 = vmul.f32 0.0010283801, %v6890_v4 }
 0x27d   :  { %v1723_v7 = vrot.slane %v7441_v5, 2  ;;  %v2207_v11 = vrot.slane %v7451_v32, 3  ;;  %v2691_v60 = vrot.slane %v2454_v35, 4  ;;  %v3497_v63 = vrot.slane %v2454_v35, 6 }
 0x27e   :  { %v3661_v15 = vadd.f32 %v3494_v10, %v3339_v33  ;;  %v3175_v44 = vrot.slane %v2938_v43, 5  ;;  %v3819_v61 = vrot.slane %v7451_v32, 7  ;;  %v959_v26 = vmul.f32 0.007598758, %v6890_v4 }
 0x27f   :  { %v1443_v20 = vmul.f32 0.036000773, %v6890_v4  ;;  %v1927_v56 = vmul.f32 0.10936069, %v6890_v4  ;;  %v2411_v62 = vmul.f32 0.21300554, %v6890_v4 }
 0x280   :  { %v3983_v14 = vadd.f32 %v3816_v51, %v3661_v15  ;;  %v2895_v55 = vmul.f32 0.26601171, %v6890_v4  ;;  %v1153_v39 = vrot.slane %v959_v26, 1  ;;  %v921_v43 = vmul.f32 0.0010283801, %v6906_v16 }
 0x281   :  { %v1637_v10 = vrot.slane %v1443_v20, 2  ;;  %v2121_v35 = vrot.slane %v1927_v56, 3  ;;  %v2605_v36 = vrot.slane %v2411_v62, 4  ;;  %v3411_v48 = vrot.slane %v2411_v62, 6 }
 0x282   :  { %v3089_v32 = vrot.slane %v2895_v55, 5  ;;  %v1156_v51 = vsel %vm1089_vm1, %v1153_v39, %v8269_v3  ;;  %v3733_v30 = vrot.slane %v1927_v56, 7  ;;  %v1001_v42 = vmul.f32 0.007598758, %v6906_v16 }
 0x283   :  { %v1640_v15 = vsel %vm1573_vm2, %v1637_v10, %v1639_v25  ;;  %v1363_v4 = vadd.f32 %v1156_v51, %v7459_v19  ;;  %v2124_v26 = vsel %vm2057_vm3, %v2121_v35, %v2123_v22  ;;  %v2608_v20 = vsel %vm2541_vm4, %v2605_v36, %v2607_v49 }
 0x284   :  { %v3092_v33 = vsel %vm3025_vm5, %v3089_v32, %v3091_v58  ;;  %v3414_v55 = vsel %vm3347_vm6, %v3411_v48, %v3413_v29  ;;  %v3736_v62 = vsel %vm3669_vm7, %v3733_v30, %v3735_v1  ;;  %v1237_v21 = vrot.slane %v1001_v42, 1 }
 0x285   :  { %v1485_v3 = vmul.f32 0.036000773, %v6906_v16  ;;  %v1847_v54 = vadd.f32 %v1640_v15, %v1363_v4  ;;  %v1969_v25 = vmul.f32 0.10936069, %v6906_v16  ;;  %v2453_v56 = vmul.f32 0.21300554, %v6906_v16 }
 0x286   :  { %v2937_v10 = vmul.f32 0.26601171, %v6906_v16  ;;  %v8464_v22 = vrot.slane %v7347_v8, 1  ;;  %v8465_v49 = vrot.slane %v7438_v0, 1  ;;  %v4063_v42 = vadd.f32 %v3983_v14, %v7351_v2 }
 0x287   :  { %v1721_v29 = vrot.slane %v1485_v3, 2  ;;  %v2331_v30 = vadd.f32 %v2124_v26, %v1847_v54  ;;  %v2205_v48 = vrot.slane %v1969_v25, 3  ;;  %v2689_v35 = vrot.slane %v2453_v56, 4 }
 0x288   :  { %v1238_v36 = vsel %vm1089_vm1, %v8464_v22, %v1237_v21  ;;  %v1240_v58 = vsel %vm1089_vm1, %v1237_v21, %v8465_v49  ;;  %v3173_v51 = vrot.slane %v2937_v10, 5  ;;  %v3495_v15 = vrot.slane %v2453_v56, 6 }
 0x289   :  { %v1405_v1 = vadd.f32 %v1240_v58, %v921_v43  ;;  %v1724_v32 = vsel %vm1573_vm2, %v1721_v29, %v1723_v7  ;;  %v3817_v16 = vrot.slane %v1969_v25, 7  ;;  %v2815_v4 = vadd.f32 %v2608_v20, %v2331_v30 }
 0x28a   :  { %v2208_v22 = vsel %vm2057_vm3, %v2205_v48, %v2207_v11  ;;  %v2692_v31 = vsel %vm2541_vm4, %v2689_v35, %v2691_v60  ;;  %v3176_v21 = vsel %vm3025_vm5, %v3173_v51, %v3175_v44  ;;  %v3498_v3 = vsel %vm3347_vm6, %v3495_v15, %v3497_v63 }
 0x28b   :  { %v1889_v8 = vadd.f32 %v1724_v32, %v1405_v1  ;;  %v3820_v54 = vsel %vm3669_vm7, %v3817_v16, %v3819_v61  ;;  %v7498_v2 = vadd.f32 %v4063_v42, %v1238_v36  ;;  %v3299_v14 = vadd.f32 %v3092_v33, %v2815_v4 }
 0x28c   :  { %v4384_v7 = vrot.slane %v921_v43, 2  ;;  %v7501_v56 = vmul.f32 0.0010283801, %v6932_v53  ;;  %v7504_v20 = vmul.f32 0.007598758, %v6932_v53  ;;  %v8467_v44 = vrot.slane %v7330_v57, 1 }
 0x28d   :  { %8466 = vst [vmem:[#allocation53_spill] sm:$0xff] %v7498_v2  ;;  %v2373_v26 = vadd.f32 %v2208_v22, %v1889_v8  ;;  %v7507_v11 = vmul.f32 0.036000773, %v6932_v53  ;;  %v1930_v60 = vmul.f32 0.10936069, %v6932_v53  ;;  %v3621_v61 = vadd.f32 %v3414_v55, %v3299_v14 }
 0x28e   :  { %v7513_v63 = vsel %vm1089_vm1, %v8467_v44, %v1153_v39  ;;  %v8468_v43 = vrot.slane %v7344_v28, 2  ;;  %v2414_v10 = vmul.f32 0.21300554, %v6932_v53  ;;  %v1159_v36 = vrot.slane %v7504_v20, 1 }
 0x28f   :  { %v2857_v33 = vadd.f32 %v2692_v31, %v2373_v26  ;;  %v1643_v49 = vrot.slane %v7507_v11, 2  ;;  %v2127_v58 = vrot.slane %v1930_v60, 3  ;;  %v2898_v29 = vmul.f32 0.26601171, %v6932_v53 }
 0x290   :  { %v7518_v25 = vsel %vm1573_vm2, %v8468_v43, %v4384_v7  ;;  %v3943_v57 = vadd.f32 %v3736_v62, %v3621_v61  ;;  %v2611_v39 = vrot.slane %v2414_v10, 4  ;;  %v3417_v30 = vrot.slane %v2414_v10, 6  ;;  %v8470_v43 = vld [vmem:[#allocation13_spill] sm:$0xff]  ;;  %v8471_v10 = vld [vmem:[#allocation12_spill] sm:$0xff] }
 0x291   :  { %8469 = vst [vmem:[#allocation14_spill] sm:$0xff] %v7518_v25  ;;  %v3341_v42 = vadd.f32 %v3176_v21, %v2857_v33  ;;  %v3095_v55 = vrot.slane %v2898_v29, 5  ;;  %v3739_v31 = vrot.slane %v1930_v60, 7  ;;  %v7526_v1 = vmul.f32 0.0010283801, %v6980_v45 }
 0x292   :  { %v7529_v35 = vmul.f32 0.007598758, %v6980_v45  ;;  %v7532_v32 = vmul.f32 0.036000773, %v6980_v45  ;;  %v7535_v53 = vmul.f32 0.10936069, %v6980_v45  ;;  %v4023_v16 = vadd.f32 %v3943_v57, %v7426_v24 }
 0x293   :  { %v3663_v48 = vadd.f32 %v3498_v3, %v3341_v42  ;;  %v7538_v62 = vmul.f32 0.21300554, %v6980_v45  ;;  %v7541_v51 = vmul.f32 0.26601171, %v6980_v45  ;;  %v881_v7 = vmul.f32 0.0010283801, %v6998_v46 }
 0x294   :  { %v1727_v22 = vrot.slane %v7532_v32, 2  ;;  %v2211_v21 = vrot.slane %v7535_v53, 3  ;;  %v961_v60 = vmul.f32 0.007598758, %v6998_v46  ;;  %v1445_v24 = vmul.f32 0.036000773, %v6998_v46 }
 0x295   :  { %v3985_v4 = vadd.f32 %v3820_v54, %v3663_v48  ;;  %v2695_v3 = vrot.slane %v7538_v62, 4  ;;  %v3179_v14 = vrot.slane %v7541_v51, 5  ;;  %v3501_v26 = vrot.slane %v7538_v62, 6 }
 0x296   :  { %v1929_v44 = vmul.f32 0.10936069, %v6998_v46  ;;  %v2413_v61 = vmul.f32 0.21300554, %v6998_v46  ;;  %v2897_v33 = vmul.f32 0.26601171, %v6998_v46  ;;  %v7561_v29 = vadd.f32 %v8471_v10, %v8470_v43 }
 0x297   :  { %v4065_v54 = vadd.f32 %v3985_v4, %v7441_v5  ;;  %v1157_v57 = vrot.slane %v961_v60, 1  ;;  %v1641_v42 = vrot.slane %v1445_v24, 2  ;;  %v4304_v48 = vrot.slane %v881_v7, 2 }
 0x298   :  { %v7564_v62 = vmul.f32 0.0010283801, %v7023_v18  ;;  %v2125_v51 = vrot.slane %v1929_v44, 3  ;;  %v2609_v15 = vrot.slane %v2413_v61, 4  ;;  %v3093_v28 = vrot.slane %v2897_v33, 5 }
 0x299   :  { %v3415_v5 = vrot.slane %v2413_v61, 6  ;;  %v8472_v4 = vrot.slane %v7419_v17, 1  ;;  %v1160_v46 = vsel %vm1089_vm1, %v1157_v57, %v1159_v36  ;;  %v1644_v43 = vsel %vm1573_vm2, %v1641_v42, %v1643_v49 }
 0x29a   :  { %v3737_v60 = vrot.slane %v1929_v44, 7  ;;  %v1365_v24 = vadd.f32 %v1160_v46, %v881_v7  ;;  %v2128_v10 = vsel %vm2057_vm3, %v2125_v51, %v2127_v58  ;;  %v2612_v8 = vsel %vm2541_vm4, %v2609_v15, %v2611_v39 }
 0x29b   :  { %v1158_v45 = vsel %vm1089_vm1, %v8472_v4, %v1157_v57  ;;  %v3096_v25 = vsel %vm3025_vm5, %v3093_v28, %v3095_v55  ;;  %v3418_v61 = vsel %vm3347_vm6, %v3415_v5, %v3417_v30  ;;  %v8473_v4 = vrot.slane %v7416_v6, 2 }
 0x29c   :  { %v3740_v17 = vsel %vm3669_vm7, %v3737_v60, %v3739_v31  ;;  %v4108_v33 = vadd.f32 %v4023_v16, %v1158_v45  ;;  %v1849_v57 = vadd.f32 %v1644_v43, %v1365_v24  ;;  %v1003_v49 = vmul.f32 0.007598758, %v7023_v18 }
 0x29d   :  { %v4305_v2 = vsel %vm1573_vm2, %v8473_v4, %v4304_v48  ;;  %v1487_v7 = vmul.f32 0.036000773, %v7023_v18  ;;  %v1971_v58 = vmul.f32 0.10936069, %v7023_v18  ;;  %v2455_v39 = vmul.f32 0.21300554, %v7023_v18 }
 0x29e   :  { %v7584_v44 = vadd.f32 %v4305_v2, %v4108_v33  ;;  %v2939_v30 = vmul.f32 0.26601171, %v7023_v18  ;;  %v2333_v31 = vadd.f32 %v2128_v10, %v1849_v57  ;;  %v1241_v28 = vrot.slane %v1003_v49, 1 }
 0x29f   :  { %v1725_v6 = vrot.slane %v1487_v7, 2  ;;  %v2209_v15 = vrot.slane %v1971_v58, 3  ;;  %v2693_v45 = vrot.slane %v2455_v39, 4  ;;  %v3499_v48 = vrot.slane %v2455_v39, 6 }
 0x2a0   :  { %8474 = vst [vmem:[#allocation37_spill] sm:$0xff] %v7584_v44  ;;  %v3177_v42 = vrot.slane %v2939_v30, 5  ;;  %v2817_v51 = vadd.f32 %v2612_v8, %v2333_v31  ;;  %v8475_v2 = vrot.slane %v7438_v0, 1  ;;  %v8476_v46 = vrot.slane %v7529_v35, 1 }
 0x2a1   :  { %v1728_v43 = vsel %vm1573_vm2, %v1725_v6, %v1727_v22  ;;  %v2212_v24 = vsel %vm2057_vm3, %v2209_v15, %v2211_v21  ;;  %v2696_v10 = vsel %vm2541_vm4, %v2693_v45, %v2695_v3  ;;  %v3502_v8 = vsel %vm3347_vm6, %v3499_v48, %v3501_v26 }
 0x2a2   :  { %v1242_v5 = vsel %vm1089_vm1, %v8475_v2, %v1241_v28  ;;  %v1244_v18 = vsel %vm1089_vm1, %v1241_v28, %v8476_v46  ;;  %v3180_v33 = vsel %vm3025_vm5, %v3177_v42, %v3179_v14  ;;  %v3301_v4 = vadd.f32 %v3096_v25, %v2817_v51  ;;  %v8479_v46 = vld [vmem:[#allocation67_spill] sm:$0xff] }
 0x2a3   :  { %v1407_v60 = vadd.f32 %v1244_v18, %v7564_v62  ;;  %v3821_v0 = vrot.slane %v1971_v58, 7  ;;  %v7603_v57 = vadd.f32 %v4065_v54, %v1242_v5  ;;  %v7606_v7 = vmul.f32 0.0010283801, %v7062_v37 }
 0x2a4   :  { %v7609_v22 = vmul.f32 0.007598758, %v7062_v37  ;;  %v7612_v39 = vmul.f32 0.036000773, %v7062_v37  ;;  %v3623_v21 = vadd.f32 %v3418_v61, %v3301_v4  ;;  %v8478_v3 = vrot.slane %v7535_v53, 7 }
 0x2a5   :  { %8477 = vst [vmem:[#allocation13_spill] sm:$0xff] %v7603_v57  ;;  %v1891_v49 = vadd.f32 %v1728_v43, %v1407_v60  ;;  %v1932_v14 = vmul.f32 0.10936069, %v7062_v37  ;;  %v2416_v26 = vmul.f32 0.21300554, %v7062_v37 }
 0x2a6   :  { %v3824_v25 = vsel %vm3669_vm7, %v3821_v0, %v8478_v3  ;;  %v1163_v58 = vrot.slane %v7609_v22, 1  ;;  %v1647_v30 = vrot.slane %v7612_v39, 2  ;;  %v2900_v31 = vmul.f32 0.26601171, %v7062_v37 }
 0x2a7   :  { %v2375_v54 = vadd.f32 %v2212_v24, %v1891_v49  ;;  %v3945_v28 = vadd.f32 %v3740_v17, %v3623_v21  ;;  %v2131_v6 = vrot.slane %v1932_v14, 3  ;;  %v2615_v15 = vrot.slane %v2416_v26, 4 }
 0x2a8   :  { %v3421_v45 = vrot.slane %v2416_v26, 6  ;;  %v3099_v42 = vrot.slane %v2900_v31, 5  ;;  %v3743_v53 = vrot.slane %v1932_v14, 7  ;;  %v7624_v51 = vmul.f32 0.10936069, %v7086_v12 }
 0x2a9   :  { %v2859_v61 = vadd.f32 %v2696_v10, %v2375_v54  ;;  %v7627_v2 = vmul.f32 0.21300554, %v7086_v12  ;;  %v7630_v5 = vmul.f32 0.26601171, %v7086_v12  ;;  %v4025_v37 = vadd.f32 %v3945_v28, %v7507_v11 }
 0x2aa   :  { %v883_v18 = vmul.f32 0.0010283801, %v8479_v46  ;;  %v963_v43 = vmul.f32 0.007598758, %v8479_v46  ;;  %v1447_v60 = vmul.f32 0.036000773, %v8479_v46  ;;  %v7646_v54 = vadd.f32 %v7390_v50, %v7421_v27 }
 0x2ab   :  { %v3343_v17 = vadd.f32 %v3180_v33, %v2859_v61  ;;  %v2215_v24 = vrot.slane %v7624_v51, 3  ;;  %v1931_v33 = vmul.f32 0.10936069, %v8479_v46  ;;  %v2415_v14 = vmul.f32 0.21300554, %v8479_v46 }
 0x2ac   :  { %v1161_v3 = vrot.slane %v963_v43, 1  ;;  %v1645_v11 = vrot.slane %v1447_v60, 2  ;;  %v2899_v26 = vmul.f32 0.26601171, %v8479_v46  ;;  %v4308_v27 = vrot.slane %v883_v18, 2 }
 0x2ad   :  { %v3665_v49 = vadd.f32 %v3502_v8, %v3343_v17  ;;  %v2129_v43 = vrot.slane %v1931_v33, 3  ;;  %v2613_v60 = vrot.slane %v2415_v14, 4  ;;  %v3419_v16 = vrot.slane %v2415_v14, 6 }
 0x2ae   :  { %v1162_v8 = vsel %vm1089_vm1, %v1159_v36, %v1161_v3  ;;  %v1164_v28 = vsel %vm1089_vm1, %v1161_v3, %v1163_v58  ;;  %v1648_v61 = vsel %vm1573_vm2, %v1645_v11, %v1647_v30  ;;  %v3097_v46 = vrot.slane %v2899_v26, 5  ;;  %v8481_v26 = vld [vmem:[#allocation69_spill] sm:$0xff] }
 0x2af   :  { %v7648_v31 = vadd.f32 %v3824_v25, %v3665_v49  ;;  %v1367_v17 = vadd.f32 %v1164_v28, %v883_v18  ;;  %v3741_v55 = vrot.slane %v1931_v33, 7  ;;  %v4110_v50 = vadd.f32 %v4025_v37, %v1162_v8  ;;  %v8487_v8 = vld [vmem:[#allocation45_spill] sm:$0xff] }
 0x2b0   :  { %v2132_v49 = vsel %vm2057_vm3, %v2129_v43, %v2131_v6  ;;  %v2616_v20 = vsel %vm2541_vm4, %v2613_v60, %v2615_v15  ;;  %v3100_v36 = vsel %vm3025_vm5, %v3097_v46, %v3099_v42  ;;  %v3422_v21 = vsel %vm3347_vm6, %v3419_v16, %v3421_v45  ;;  %v8483_v45 = vld [vmem:[#allocation38_spill] sm:$0xff] }
 0x2b1   :  { %v1851_v25 = vadd.f32 %v1648_v61, %v1367_v17  ;;  %v3744_v3 = vsel %vm3669_vm7, %v3741_v55, %v3743_v53  ;;  %v8480_v30 = vrot.slane %v7501_v56, 2  ;;  %v7666_v14 = vmul.f32 0.0010283801, %v8481_v26 }
 0x2b2   :  { %v7671_v6 = vmul.f32 0.007598758, %v8481_v26  ;;  %v7674_v15 = vmul.f32 0.036000773, %v8481_v26  ;;  %v7677_v16 = vmul.f32 0.10936069, %v8481_v26  ;;  %v7687_v42 = vadd.f32 %v7561_v29, %v8483_v45 }
 0x2b3   :  { %v4309_v11 = vsel %vm1573_vm2, %v8480_v30, %v4308_v27  ;;  %v2335_v37 = vadd.f32 %v2132_v49, %v1851_v25  ;;  %v7680_v55 = vmul.f32 0.21300554, %v8481_v26  ;;  %v7683_v56 = vmul.f32 0.26601171, %v8481_v26  ;;  %v8486_v30 = vld [vmem:[#allocation70_spill] sm:$0xff] }
 0x2b4   :  { %v7668_v18 = vadd.f32 %v4309_v11, %v4110_v50  ;;  %v8270_v28 = vrot.slane %v7671_v6, 1  ;;  %v2213_v17 = vrot.slane %v7677_v16, 3  ;;  %v8485_v29 = vrot.slane %v7529_v35, 1 }
 0x2b5   :  { %v2819_v53 = vadd.f32 %v2616_v20, %v2335_v37  ;;  %v7710_v11 = vmul.f32 0.0010283801, %v8486_v30  ;;  %v7713_v26 = vmul.f32 0.007598758, %v8486_v30  ;;  %v1934_v37 = vmul.f32 0.10936069, %v8486_v30 }
 0x2b6   :  { %8482 = vst [vmem:[#allocation12_spill] sm:$0xff] %v7668_v18  ;;  %v7702_v27 = vsel %vm1089_vm1, %v8485_v29, %v8270_v28  ;;  %v7707_v20 = vsel %vm2057_vm3, %v2213_v17, %v2215_v24  ;;  %v2418_v45 = vmul.f32 0.21300554, %v8486_v30  ;;  %v885_v49 = vmul.f32 0.0010283801, %v8487_v8 }
 0x2b7   :  { %v3303_v50 = vadd.f32 %v3100_v36, %v2819_v53  ;;  %v7716_v36 = vmul.f32 0.036000773, %v8486_v30  ;;  %v2902_v53 = vmul.f32 0.26601171, %v8486_v30  ;;  %v2135_v28 = vrot.slane %v1934_v37, 3 }
 0x2b8   :  { %v2619_v25 = vrot.slane %v2418_v45, 4  ;;  %v3425_v0 = vrot.slane %v2418_v45, 6  ;;  %v1449_v60 = vmul.f32 0.036000773, %v8487_v8  ;;  %v1933_v30 = vmul.f32 0.10936069, %v8487_v8 }
 0x2b9   :  { %v3625_v35 = vadd.f32 %v3422_v21, %v3303_v50  ;;  %v1651_v24 = vrot.slane %v7716_v36, 2  ;;  %v3103_v46 = vrot.slane %v2902_v53, 5  ;;  %v3747_v21 = vrot.slane %v1934_v37, 7 }
 0x2ba   :  { %v965_v50 = vmul.f32 0.007598758, %v8487_v8  ;;  %v2417_v4 = vmul.f32 0.21300554, %v8487_v8  ;;  %v2901_v43 = vmul.f32 0.26601171, %v8487_v8 }
 0x2bb   :  { %v3947_v61 = vadd.f32 %v3744_v3, %v3625_v35  ;;  %v1649_v48 = vrot.slane %v1449_v60, 2  ;;  %v4312_v3 = vrot.slane %v885_v49, 2  ;;  %v888_v35 = vmul.f32 0.0010283801, %v7211_v38 }
 0x2bc   :  { %v1165_v10 = vrot.slane %v965_v50, 1  ;;  %v2133_v53 = vrot.slane %v1933_v30, 3  ;;  %v2617_v45 = vrot.slane %v2417_v4, 4  ;;  %v3101_v37 = vrot.slane %v2901_v43, 5 }
 0x2bd   :  { %v4027_v17 = vadd.f32 %v3947_v61, %v7612_v39  ;;  %v3423_v29 = vrot.slane %v2417_v4, 6  ;;  %v8488_v18 = vrot.slane %v7713_v26, 1  ;;  %v1652_v8 = vsel %vm1573_vm2, %v1649_v48, %v1651_v24 }
 0x2be   :  { %v1166_v33 = vsel %vm1089_vm1, %v1163_v58, %v1165_v10  ;;  %v3745_v39 = vrot.slane %v1933_v30, 7  ;;  %v2136_v60 = vsel %vm2057_vm3, %v2133_v53, %v2135_v28  ;;  %v2620_v50 = vsel %vm2541_vm4, %v2617_v45, %v2619_v25  ;;  %v8492_v45 = vld [vmem:[#allocation11_spill] sm:$0xff] }
 0x2bf   :  { %v1168_v13 = vsel %vm1089_vm1, %v1165_v10, %v8488_v18  ;;  %v3104_v44 = vsel %vm3025_vm5, %v3101_v37, %v3103_v46  ;;  %v3426_v4 = vsel %vm3347_vm6, %v3423_v29, %v3425_v0  ;;  %v4112_v43 = vadd.f32 %v4027_v17, %v1166_v33 }
 0x2c0   :  { %v1369_v61 = vadd.f32 %v1168_v13, %v885_v49  ;;  %v3748_v22 = vsel %vm3669_vm7, %v3745_v39, %v3747_v21  ;;  %v8489_v58 = vrot.slane %v7606_v7, 2  ;;  %v968_v48 = vmul.f32 0.007598758, %v7211_v38 }
 0x2c1   :  { %v7749_v13 = vmul.f32 0.036000773, %v7211_v38  ;;  %v1936_v18 = vmul.f32 0.10936069, %v7211_v38  ;;  %v2420_v46 = vmul.f32 0.21300554, %v7211_v38 }
 0x2c2   :  { %v4313_v57 = vsel %vm1573_vm2, %v8489_v58, %v4312_v3  ;;  %v1853_v10 = vadd.f32 %v1652_v8, %v1369_v61  ;;  %v2904_v0 = vmul.f32 0.26601171, %v7211_v38  ;;  %v4318_v25 = vrot.slane %v888_v35, 2  ;;  %v8495_v38 = vld [vmem:[#allocation10_spill] sm:$0xff] }
 0x2c3   :  { %v7752_v28 = vadd.f32 %v4313_v57, %v4112_v43  ;;  %v1171_v49 = vrot.slane %v968_v48, 1  ;;  %v1655_v7 = vrot.slane %v7749_v13, 2  ;;  %v2139_v29 = vrot.slane %v1936_v18, 3 }
 0x2c4   :  { %v2337_v33 = vadd.f32 %v2136_v60, %v1853_v10  ;;  %v2623_v21 = vrot.slane %v2420_v46, 4  ;;  %v3107_v30 = vrot.slane %v2904_v0, 5  ;;  %v3429_v3 = vrot.slane %v2420_v46, 6 }
 0x2c5   :  { %8490 = vst [vmem:[#allocation67_spill] sm:$0xff] %v7752_v28  ;;  %v8493_v57 = vrot.slane %v8492_v45, 1  ;;  %v3751_v8 = vrot.slane %v1936_v18, 7  ;;  %v8496_v35 = vrot.slane %v8495_v38, 2  ;;  %v887_v61 = vmul.f32 0.0010283801, %v7223_v59 }
 0x2c6   :  { %v2821_v53 = vadd.f32 %v2620_v50, %v2337_v33  ;;  %v967_v60 = vmul.f32 0.007598758, %v7223_v59  ;;  %v1451_v43 = vmul.f32 0.036000773, %v7223_v59  ;;  %v8498_v58 = vrot.slane %v7627_v2, 4 }
 0x2c7   :  { %v7762_v37 = vsel %vm1089_vm1, %v1171_v49, %v8493_v57  ;;  %v7767_v39 = vsel %vm1573_vm2, %v4318_v25, %v8496_v35  ;;  %v8499_v50 = vrot.slane %v7680_v55, 4  ;;  %v1935_v18 = vmul.f32 0.10936069, %v7223_v59 }
 0x2c8   :  { %8494 = vst [vmem:[#allocation69_spill] sm:$0xff] %v7762_v37  ;;  %8497 = vst [vmem:[#allocation38_spill] sm:$0xff] %v7767_v39  ;;  %v3305_v48 = vadd.f32 %v3104_v44, %v2821_v53  ;;  %v2419_v46 = vmul.f32 0.21300554, %v7223_v59  ;;  %v2903_v0 = vmul.f32 0.26601171, %v7223_v59 }
 0x2c9   :  { %v7777_v10 = vsel %vm2541_vm4, %v8499_v50, %v8498_v58  ;;  %v1169_v25 = vrot.slane %v967_v60, 1  ;;  %v1653_v33 = vrot.slane %v1451_v43, 2  ;;  %v4316_v45 = vrot.slane %v887_v61, 2 }
 0x2ca   :  { %v926_v57 = vmul.f32 0.0010283801, %v7086_v12  ;;  %v3627_v38 = vadd.f32 %v3426_v4, %v3305_v48  ;;  %v2137_v35 = vrot.slane %v1935_v18, 3  ;;  %v2621_v17 = vrot.slane %v2419_v46, 4 }
 0x2cb   :  { %v3105_v24 = vrot.slane %v2903_v0, 5  ;;  %v8500_v28 = vrot.slane %v7713_v26, 1  ;;  %v1172_v44 = vsel %vm1089_vm1, %v1169_v25, %v1171_v49  ;;  %v1656_v53 = vsel %vm1573_vm2, %v1653_v33, %v1655_v7 }
 0x2cc   :  { %v3427_v50 = vrot.slane %v2419_v46, 6  ;;  %v1371_v39 = vadd.f32 %v1172_v44, %v887_v61  ;;  %v2140_v59 = vsel %vm2057_vm3, %v2137_v35, %v2139_v29  ;;  %v2624_v60 = vsel %vm2541_vm4, %v2621_v17, %v2623_v21 }
 0x2cd   :  { %v1170_v58 = vsel %vm1089_vm1, %v8500_v28, %v1169_v25  ;;  %v3108_v43 = vsel %vm3025_vm5, %v3105_v24, %v3107_v30  ;;  %v3749_v48 = vrot.slane %v1935_v18, 7  ;;  %v3949_v0 = vadd.f32 %v3748_v22, %v3627_v38 }
 0x2ce   :  { %v3430_v4 = vsel %vm3347_vm6, %v3427_v50, %v3429_v3  ;;  %v8501_v26 = vrot.slane %v7710_v11, 2  ;;  %v1855_v37 = vadd.f32 %v1656_v53, %v1371_v39  ;;  %v1006_v49 = vmul.f32 0.007598758, %v7086_v12 }
 0x2cf   :  { %v1007_v7 = vmul.f32 0.007598758, %v7284_v40  ;;  %v7798_v61 = vmul.f32 0.036000773, %v7086_v12  ;;  %v3752_v29 = vsel %vm3669_vm7, %v3749_v48, %v3751_v8  ;;  %v4029_v24 = vadd.f32 %v3949_v0, %v7716_v36  ;;  %v8516_v48 = vld [vmem:[#allocation42_spill] sm:$0xff] }
 0x2d0   :  { %v4317_v28 = vsel %vm1573_vm2, %v8501_v26, %v4316_v45  ;;  %v8502_v17 = vrot.slane %v7630_v5, 5  ;;  %v8503_v22 = vrot.slane %v7683_v56, 5  ;;  %v8504_v21 = vrot.slane %v7627_v2, 6 }
 0x2d1   :  { %v8505_v30 = vrot.slane %v7680_v55, 6  ;;  %v2339_v39 = vadd.f32 %v2140_v59, %v1855_v37  ;;  %v1247_v18 = vrot.slane %v1006_v49, 1  ;;  %v1249_v12 = vrot.slane %v1007_v7, 1  ;;  %v8517_v49 = vld [vmem:[#allocation22_spill] sm:$0xff]  ;;  %v8518_v7 = vld [vmem:[#allocation27_spill] sm:$0xff] }
 0x2d2   :  { %v3184_v11 = vsel %vm3025_vm5, %v8503_v22, %v8502_v17  ;;  %v1731_v46 = vrot.slane %v7798_v61, 2  ;;  %v4114_v8 = vadd.f32 %v4029_v24, %v1170_v58  ;;  %v8506_v36 = vrot.slane %v7624_v51, 7  ;;  %v8519_v17 = vld [vmem:[#allocation57_spill] sm:$0xff] }
 0x2d3   :  { %v3506_v3 = vsel %vm3347_vm6, %v8505_v30, %v8504_v21  ;;  %v8507_v5 = vrot.slane %v7677_v16, 7  ;;  %v4021_v25 = vadd.f32 %v7646_v54, %v7335_v52  ;;  %v4090_v2 = vadd.f32 %v7687_v42, %v7448_v34  ;;  %v8510_v42 = vld [vmem:[#allocation44_spill] sm:$0xff]  ;;  %v8521_v30 = vld [vmem:[#allocation9_spill] sm:$0xff] }
 0x2d4   :  { %v2823_v55 = vadd.f32 %v2624_v60, %v2339_v39  ;;  %v8508_v37 = vrot.slane %v7671_v6, 1  ;;  %v1250_v45 = vsel %vm1089_vm1, %v1247_v18, %v1249_v12  ;;  %v8509_v38 = vrot.slane %v7674_v15, 2  ;;  %v8512_v6 = vld [vmem:[#allocation36_spill] sm:$0xff] }
 0x2d5   :  { %v3828_v56 = vsel %vm3669_vm7, %v8507_v5, %v8506_v36  ;;  %v7829_v16 = vadd.f32 %v4317_v28, %v4114_v8  ;;  %v4106_v52 = vadd.f32 %v4021_v25, %v7513_v63  ;;  %v4156_v54 = vmul.f32 0.0010283801, %v7284_v40  ;;  %v8525_v36 = vld [vmem:[#allocation29_spill] sm:$0xff] }
 0x2d6   :  { %v1248_v33 = vsel %vm1089_vm1, %v8508_v37, %v1247_v18  ;;  %v1732_v51 = vsel %vm1573_vm2, %v8509_v38, %v1731_v46  ;;  %v3307_v34 = vadd.f32 %v3108_v43, %v2823_v55  ;;  %v8511_v58 = vrot.slane %v8510_v42, 2  ;;  %v8523_v18 = vld [vmem:[#allocation32_spill] sm:$0xff]  ;;  %v8526_v25 = vld [vmem:[#allocation65_spill] sm:$0xff]  ;;  %v8535_v42 = vld [vmem:[#allocation23_spill] sm:$0xff] }
 0x2d7   :  { %v1409_v35 = vadd.f32 %v1248_v33, %v7666_v14  ;;  %v8513_v44 = vrot.slane %v8512_v6, 2  ;;  %v8514_v50 = vrot.slane %v7459_v19, 2  ;;  %v8515_v15 = vrot.slane %v7327_v41, 2  ;;  %v8520_v19 = vld [vmem:[#allocation62_spill] sm:$0xff]  ;;  %v8529_v33 = vld [vmem:[#allocation24_spill] sm:$0xff] }
 0x2d8   :  { %v4394_v60 = vrot.slane %v926_v57, 2  ;;  %v4396_v26 = vrot.slane %v4156_v54, 2  ;;  %v3629_v43 = vadd.f32 %v3430_v4, %v3307_v34  ;;  %v4037_v24 = vadd.f32 %v8518_v7, %v8517_v49  ;;  %v8531_v38 = vld [vmem:[#allocation16_spill] sm:$0xff]  ;;  %v8539_v6 = vld [vmem:[#allocation50_spill] sm:$0xff] }
 0x2d9   :  { %v4269_v53 = vsel %vm1573_vm2, %v8513_v44, %v8511_v58  ;;  %v4301_v59 = vsel %vm1573_vm2, %v8515_v15, %v8514_v50  ;;  %v1893_v63 = vadd.f32 %v1732_v51, %v1409_v35  ;;  %v4053_v22 = vadd.f32 %v8520_v19, %v8519_v17  ;;  %v8533_v54 = vld [vmem:[#allocation28_spill] sm:$0xff]  ;;  %v8537_v58 = vld [vmem:[#allocation59_spill] sm:$0xff]  ;;  %v8543_v15 = vld [vmem:[#allocation58_spill] sm:$0xff] }
 0x2da   :  { %v7846_v40 = vadd.f32 %v4269_v53, %v4090_v2  ;;  %v7848_v28 = vadd.f32 %v4301_v59, %v4106_v52  ;;  %v4397_v57 = vsel %vm1573_vm2, %v4394_v60, %v4396_v26  ;;  %v4067_v21 = vadd.f32 %v7648_v31, %v7532_v32  ;;  %v8541_v53 = vld [vmem:[#allocation63_spill] sm:$0xff]  ;;  %v8549_v17 = vld [vmem:[#allocation34_spill] sm:$0xff] }
 0x2db   :  { %v2377_v41 = vadd.f32 %v7707_v20, %v1893_v63  ;;  %v8522_v39 = vrot.slane %v8521_v30, 2  ;;  %v8524_v12 = vrot.slane %v8523_v18, 2  ;;  %v3951_v46 = vadd.f32 %v3752_v29, %v3629_v43  ;;  %v8550_v19 = vld [vmem:[#allocation35_spill] sm:$0xff]  ;;  %v8552_v30 = vld [vmem:[#allocation40_spill] sm:$0xff] }
 0x2dc   :  { %v7865_v8 = vmul.f32 %v7848_v28, %v7846_v40  ;;  %v4122_v5 = vadd.f32 %v4037_v24, %v8525_v36  ;;  %v4138_v20 = vadd.f32 %v4053_v22, %v8526_v25  ;;  %v4152_v55 = vadd.f32 %v4067_v21, %v7702_v27  ;;  %v8554_v18 = vld [vmem:[#allocation72_spill] sm:$0xff]  ;;  %v8556_v36 = vld [vmem:[#allocation19_spill] sm:$0xff] }
 0x2dd   :  { %v4265_v4 = vsel %vm1573_vm2, %v8524_v12, %v8522_v39  ;;  %v2861_v2 = vadd.f32 %v7777_v10, %v2377_v41  ;;  %v8527_v32 = vrot.slane %v7363_v47, 2  ;;  %v8528_v31 = vrot.slane %v7240_v9, 2  ;;  %v8551_v41 = vld [vmem:[#allocation69_spill] sm:$0xff]  ;;  %v8555_v12 = vld [vmem:[#allocation51_spill] sm:$0xff]  ;;  %v8557_v25 = vld [vmem:[#allocation20_spill] sm:$0xff] }
 0x2de   :  { %v8530_v29 = vrot.slane %v8529_v33, 2  ;;  %v8532_v51 = vrot.slane %v8531_v38, 2  ;;  %v4031_v52 = vadd.f32 %v3951_v46, %v7749_v13  ;;  %v8534_v34 = vrot.slane %v8533_v54, 2  ;;  %v8563_v54 = vld [vmem:[#allocation53_spill] sm:$0xff] }
 0x2df   :  { %v4297_v37 = vsel %vm1573_vm2, %v8528_v31, %v8527_v32  ;;  %v8536_v10 = vrot.slane %v8535_v42, 2  ;;  %v8538_v47 = vrot.slane %v8537_v58, 2  ;;  %v8540_v9 = vrot.slane %v8539_v6, 2  ;;  %v8559_v31 = vld [vmem:[#allocation38_spill] sm:$0xff]  ;;  %v8566_v58 = vld [vmem:[#allocation64_spill] sm:$0xff] }
 0x2e0   :  { %v4329_v35 = vsel %vm1573_vm2, %v8532_v51, %v8530_v29  ;;  %v8542_v50 = vrot.slane %v8541_v53, 2  ;;  %v8544_v59 = vrot.slane %v8543_v15, 2  ;;  %v3345_v63 = vadd.f32 %v3184_v11, %v2861_v2  ;;  %v8553_v11 = vld [vmem:[#allocation71_spill] sm:$0xff] }
 0x2e1   :  { %v4333_v27 = vsel %vm1573_vm2, %v8536_v10, %v8534_v34  ;;  %v4361_v44 = vsel %vm1573_vm2, %v8540_v9, %v8538_v47  ;;  %v8545_v13 = vrot.slane %v7564_v62, 2  ;;  %v8546_v26 = vrot.slane %v7435_v23, 2  ;;  %v8560_v29 = vld [vmem:[#allocation55_spill] sm:$0xff]  ;;  %v8564_v34 = vld [vmem:[#allocation14_spill] sm:$0xff]  ;;  %v8567_v9 = vld [vmem:[#allocation41_spill] sm:$0xff] }
 0x2e2   :  { %v4365_v60 = vsel %vm1573_vm2, %v8544_v59, %v8542_v50  ;;  %v8547_v49 = vrot.slane %v7666_v14, 2  ;;  %v8548_v7 = vrot.slane %v7526_v1, 2  ;;  %v4490_v22 = vadd.f32 %v8550_v19, %v8549_v17  ;;  %v8558_v1 = vld [vmem:[#allocation25_spill] sm:$0xff]  ;;  %v8562_v51 = vld [vmem:[#allocation31_spill] sm:$0xff] }
 0x2e3   :  { %v4389_v43 = vsel %vm1573_vm2, %v8546_v26, %v8545_v13  ;;  %v4116_v21 = vadd.f32 %v4031_v52, %v8551_v41  ;;  %v4492_v39 = vadd.f32 %v4265_v4, %v8552_v30  ;;  %v4506_v62 = vadd.f32 %v8554_v18, %v8553_v11  ;;  %v8561_v4 = vld [vmem:[#allocation56_spill] sm:$0xff]  ;;  %v8571_v50 = vld [vmem:[#allocation15_spill] sm:$0xff]  ;;  %v8574_v26 = vld [vmem:[#allocation26_spill] sm:$0xff] }
 0x2e4   :  { %v4393_v24 = vsel %vm1573_vm2, %v8548_v7, %v8547_v49  ;;  %v4508_v23 = vadd.f32 %v4297_v37, %v8555_v12  ;;  %v3667_v46 = vadd.f32 %v3506_v3, %v3345_v63  ;;  %v7916_v14 = vadd.f32 %v8557_v25, %v8556_v36  ;;  %v8573_v63 = vld [vmem:[#allocation30_spill] sm:$0xff] }
 0x2e5   :  { %v7919_v2 = vadd.f32 %v4329_v35, %v8558_v1  ;;  %v7921_v32 = vadd.f32 %v4333_v27, %v4122_v5  ;;  %v7924_v33 = vadd.f32 %v8559_v31, %v4116_v21  ;;  %v7928_v38 = vadd.f32 %v8561_v4, %v8560_v29  ;;  %v8565_v35 = vld [vmem:[#allocation13_spill] sm:$0xff] }
 0x2e6   :  { %v7931_v52 = vadd.f32 %v4361_v44, %v8562_v51  ;;  %v7933_v3 = vadd.f32 %v4365_v60, %v4138_v20  ;;  %v3989_v37 = vadd.f32 %v3828_v56, %v3667_v46  ;;  %v4552_v42 = vadd.f32 %v8564_v34, %v8563_v54  ;;  %v8568_v44 = vld [vmem:[#allocation8_spill] sm:$0xff]  ;;  %v8570_v56 = vld [vmem:[#allocation18_spill] sm:$0xff] }
 0x2e7   :  { %v7938_v10 = vadd.f32 %v4389_v43, %v8565_v35  ;;  %v7940_v5 = vadd.f32 %v4393_v24, %v4152_v55  ;;  %v4560_v27 = vlaneseq  ;;  %v7944_v47 = vmul.f32 %v8566_v58, %v8566_v58  ;;  %v8575_v43 = vld [vmem:[#allocation68_spill] sm:$0xff] }
 0x2e8   :  { %v4069_v6 = vadd.f32 %v3989_v37, %v7798_v61  ;;  %v8569_v20 = vsub.f32 %v8567_v9, %v8568_v44  ;;  %v8572_v15 = vsub.f32 %v8570_v56, %v8571_v50  ;;  %v7957_v55 = vmul.f32 %v8573_v63, %v8573_v63  ;;  %v8576_v61 = vld [vmem:[#allocation17_spill] sm:$0xff]  ;;  %v8585_v56 = vld [vmem:[#allocation43_spill] sm:$0xff] }
 0x2e9   :  { %v7953_v60 = vshrl.u32 %v4560_v27, 7  ;;  %v7961_v49 = vmul.f32 %v8575_v43, %v8574_v26  ;;  %v7965_v7 = vmul.f32 %v8576_v61, %v8573_v63  ;;  %v7967_v24 = vmul.f32 %v4506_v62, %v4490_v22  ;;  %v8595_v27 = vld [vmem:[#allocation47_spill] sm:$0xff] }
 0x2ea   :  { %v4881_v53 = vmul.f32 2.0, %v8569_v20  ;;  %v4883_v59 = vmul.f32 2.0, %v8572_v15  ;;  %v4154_v13 = vadd.f32 %v4069_v6, %v1250_v45  ;;  %v7978_v45 = vmul.f32 %v4490_v22, %v4490_v22 }
 0x2eb   :  { %v7970_v17 = vadd.s32 16, %v7953_v60  ;;  %v7973_v19 = vadd.s32 32, %v7953_v60  ;;  %v7976_v41 = vadd.s32 48, %v7953_v60  ;;  %v7981_v30 = vadd.s32 64, %v7953_v60 }
 0x2ec   :  { %v4558_v21 = vadd.f32 %v4397_v57, %v4154_v13  ;;  %v7984_v11 = vadd.s32 80, %v7953_v60  ;;  %v7987_v18 = vadd.s32 96, %v7953_v60  ;;  %v7992_v12 = vadd.s32 112, %v7953_v60  ;;  %v8588_v13 = vld [vmem:[#allocation21_spill] sm:$0xff] }
 0x2ed   :  { %8577 = vst [vmem:[#allocation70_spill] sm:$0xff] %v7981_v30  ;;  %v7994_v46 = vmul.f32 %v4492_v39, %v4492_v39  ;;  %v7998_v22 = vmul.f32 %v7846_v40, %v7846_v40  ;;  %v8002_v57 = vmul.f32 %v8575_v43, %v8575_v43  ;;  %v8007_v25 = vmul.f32 %v8576_v61, %v8576_v61  ;;  %v8590_v43 = vld [vmem:[#allocation52_spill] sm:$0xff]  ;;  %v8600_v30 = vld [vmem:[#allocation39_spill] sm:$0xff] }
 0x2ee   :  { %8578 = vst [vmem:[#allocation45_spill] sm:$0xff] %v7984_v11  ;;  %8579 = vst [vmem:[#allocation11_spill] sm:$0xff] %v7987_v18  ;;  %v4879_v36 = vsub.f32 %v4558_v21, %v7865_v8  ;;  %v8009_v1 = vmul.f32 %v4506_v62, %v4506_v62  ;;  %v8011_v31 = vmul.f32 %v4508_v23, %v4508_v23  ;;  %v4581_v29 = vand.u32 15, %v7953_v60  ;;  %v8586_v60 = vld [vmem:[#allocation46_spill] sm:$0xff]  ;;  %v8597_v18 = vld [vmem:[#allocation12_spill] sm:$0xff] }
 0x2ef   :  { %8580 = vst [vmem:[#allocation10_spill] sm:$0xff] %v7992_v12  ;;  %8581 = vst [vmem:[#allocation44_spill] sm:$0xff] %v7994_v46  ;;  %v4595_v4 = vand.u32 15, %v7970_v17  ;;  %v8018_v51 = vmul.f32 %v7848_v28, %v7848_v28  ;;  %v4829_v58 = vmul.f32 %v4508_v23, %v4492_v39  ;;  %v4841_v6 = vsub.f32 %v7924_v33, %v7957_v55  ;;  %v8587_v39 = vld [vmem:[#allocation49_spill] sm:$0xff] }
 0x2f0   :  { %8582 = vst [vmem:[#allocation36_spill] sm:$0xff] %v7998_v22  ;;  %8583 = vst [vmem:[#allocation42_spill] sm:$0xff] %v8011_v31  ;;  %v4895_v35 = vmul.f32 2.0, %v4879_v36  ;;  %v4843_v28 = vsub.f32 %v7916_v14, %v7978_v45  ;;  %v4845_v9 = vsub.f32 %v7919_v2, %v7994_v46  ;;  %v4847_v20 = vsub.f32 %v7921_v32, %v7998_v22  ;;  %v8589_v32 = vld [vmem:[#allocation48_spill] sm:$0xff]  ;;  %v8598_v11 = vld [vmem:[#allocation61_spill] sm:$0xff] }
 0x2f1   :  { %8584 = vst [vmem:[#allocation22_spill] sm:$0xff] %v8018_v51  ;;  %v4853_v15 = vsub.f32 %v8585_v56, %v7944_v47  ;;  %v4855_v63 = vsub.f32 %v8586_v60, %v8002_v57  ;;  %v4857_v23 = vsub.f32 %v8587_v39, %v8007_v25  ;;  %v4859_v33 = vsub.f32 %v7928_v38, %v8009_v1  ;;  %v8591_v56 = vld [vmem:[#allocation37_spill] sm:$0xff]  ;;  %v8592_v60 = vld [vmem:[#allocation60_spill] sm:$0xff] }
 0x2f2   :  { %v4861_v14 = vsub.f32 %v7931_v52, %v8011_v31  ;;  %v4863_v2 = vsub.f32 %v7933_v3, %v8018_v51  ;;  %v4869_v26 = vsub.f32 %v8589_v32, %v8588_v13  ;;  %v4871_v61 = vsub.f32 %v8590_v43, %v7961_v49  ;;  %v8594_v39 = vld [vmem:[#allocation33_spill] sm:$0xff]  ;;  %v8601_v51 = vld [vmem:[#allocation54_spill] sm:$0xff] }
 0x2f3   :  { %v4873_v17 = vsub.f32 %v4552_v42, %v7965_v7  ;;  %v4875_v21 = vsub.f32 %v7938_v10, %v7967_v24  ;;  %v4877_v36 = vsub.f32 %v7940_v5, %v4829_v58  ;;  %v4897_v38 = vstv %s7989_s2 }
 0x2f4   :  { %v8593_v52 = vsub.f32 %v8591_v56, %v8592_v60  ;;  %v8596_v3 = vsub.f32 %v8594_v39, %v8595_v27  ;;  %v4885_v34 = vmul.f32 2.0, %v4869_v26  ;;  %v4887_v32 = vmul.f32 2.0, %v4871_v61 }
 0x2f5   :  { %v4889_v54 = vmul.f32 2.0, %v4873_v17  ;;  %v4898_v37 = vadd.f32 %v4897_v38, %v4881_v53  ;;  %v4891_v42 = vmul.f32 2.0, %v4875_v21  ;;  %v4893_v43 = vmul.f32 2.0, %v4877_v36  ;;  %v8603_v17 = vld [vmem:[#allocation67_spill] sm:$0xff]  ;;  %v8604_v53 = vld [vmem:[#allocation66_spill] sm:$0xff] }
 0x2f6   :  { %v4914_v62 = vadd.f32 %v8596_v3, %v8593_v52  ;;  %v4900_v40 = vadd.f32 %v4897_v38, %v4883_v59  ;;  %v4912_v10 = vadd.f32 %v4897_v38, %v4895_v35  ;;  %v4902_v0 = vadd.f32 %v4897_v38, %v4885_v34 }
 0x2f7   :  { %v4904_v5 = vadd.f32 %v4897_v38, %v4887_v32  ;;  %v4906_v12 = vadd.f32 %v4897_v38, %v4889_v54  ;;  %v8599_v56 = vsub.f32 %v8597_v18, %v8598_v11  ;;  %v8602_v39 = vsub.f32 %v8600_v30, %v8601_v51 }
 0x2f8   :  { %v4908_v26 = vadd.f32 %v4897_v38, %v4891_v42  ;;  %v4910_v61 = vadd.f32 %v4897_v38, %v4893_v43  ;;  %v8605_v3 = vsub.f32 %v8603_v17, %v8604_v53  ;;  %v8606_v59 = vsub.f32 %v7829_v16, %v8516_v48 }
 0x2f9   :  { %v4916_v52 = vadd.f32 %v8602_v39, %v8599_v56  ;;  %v4922_v34 = vadd.f32 %v4857_v23, %v4841_v6  ;;  %v4924_v21 = vadd.f32 %v4859_v33, %v4843_v28  ;;  %v4926_v54 = vadd.f32 %v4861_v14, %v4845_v9 }
 0x2fa   :  { %v4918_v22 = vadd.f32 %v4853_v15, %v8605_v3  ;;  %v4920_v35 = vadd.f32 %v4855_v63, %v8606_v59  ;;  %v4928_v36 = vadd.f32 %v4863_v2, %v4847_v20  ;;  %v4930_v32 = vadd.f32 %v4914_v62, %v4897_v38 }
 0x2fb   :  { %v4932_v18 = vadd.f32 %v4916_v52, %v4897_v38  ;;  %v4938_v30 = vadd.f32 %v4922_v34, %v4897_v38  ;;  %v4940_v42 = vadd.f32 %v4924_v21, %v4897_v38  ;;  %v4942_v43 = vadd.f32 %v4926_v54, %v4897_v38 }
 0x2fc   :  { %v4934_v31 = vadd.f32 %v4918_v22, %v4897_v38  ;;  %v4936_v46 = vadd.f32 %v4920_v35, %v4897_v38  ;;  %v4944_v56 = vadd.f32 %v4928_v36, %v4897_v38  ;;  %v4946_v39 = vmul.f32 2.0, %v8568_v44  ;;  %v8617_v35 = vld [vmem:[#allocation44_spill] sm:$0xff] }
 0x2fd   :  { %v4948_v15 = vmul.f32 2.0, %v8571_v50  ;;  %v4950_v16 = vmul.f32 2.0, %v8588_v13  ;;  %v4952_v6 = vmul.f32 2.0, %v7961_v49  ;;  %vm8078_vm8 = vcmp.lt.s32.totalorder %v4581_v29, 6 }
 0x2fe   :  { %vm8082_vm9 = vcmp.lt.s32.totalorder %v4595_v4, 6  ;;  %v4954_v62 = vmul.f32 2.0, %v7965_v7  ;;  %v4956_v9 = vmul.f32 2.0, %v7967_v24  ;;  %v4958_v20 = vmul.f32 2.0, %v4829_v58 }
 0x2ff   :  { %v4960_v44 = vmul.f32 2.0, %v7865_v8  ;;  %v8611_v50 = vand.u32 15, %v7973_v19  ;;  %v4962_v49 = vstv %s8060_s13  ;;  %v4995_v29 = vadd.f32 %v8595_v27, %v8592_v60 }
 0x300   :  { %v4997_v4 = vadd.f32 %v8601_v51, %v8598_v11  ;;  %v4999_v7 = vadd.f32 %v7944_v47, %v8604_v53  ;;  %v8614_v24 = vand.u32 15, %v7976_v41  ;;  %v4963_v19 = vadd.f32 %v4962_v49, %v4946_v39 }
 0x301   :  { %vm8091_vm10 = vcmp.lt.s32.totalorder %v8611_v50, 6  ;;  %v4965_v58 = vadd.f32 %v4962_v49, %v4948_v15  ;;  %v4967_v23 = vadd.f32 %v4962_v49, %v4950_v16  ;;  %v4969_v33 = vadd.f32 %v4962_v49, %v4952_v6  ;;  %v8621_v16 = vld [vmem:[#allocation70_spill] sm:$0xff] }
 0x302   :  { %vm8104_vm11 = vcmp.lt.s32.totalorder %v8614_v24, 6  ;;  %v4971_v14 = vadd.f32 %v4962_v49, %v4954_v62  ;;  %v4973_v2 = vadd.f32 %v4962_v49, %v4956_v9  ;;  %v4975_v13 = vadd.f32 %v4962_v49, %v4958_v20  ;;  %v8633_v50 = vld [vmem:[#allocation10_spill] sm:$0xff] }
 0x303   :  { %v4977_v27 = vadd.f32 %v4962_v49, %v4960_v44  ;;  %v4979_v38 = vmul.f32 %v4963_v19, %v4898_v37  ;;  %v4981_v60 = vmul.f32 %v4965_v58, %v4900_v40  ;;  %v4983_v11 = vmul.f32 %v4967_v23, %v4902_v0  ;;  %v8618_v37 = vld [vmem:[#allocation42_spill] sm:$0xff]  ;;  %v8619_v0 = vld [vmem:[#allocation36_spill] sm:$0xff] }
 0x304   :  { %v4985_v51 = vmul.f32 %v4969_v33, %v4904_v5  ;;  %v4987_v52 = vmul.f32 %v4971_v14, %v4906_v12  ;;  %v4989_v47 = vmul.f32 %v4973_v2, %v4908_v26  ;;  %v8108_v17 = vmul.f32 %v4975_v13, %v4910_v61  ;;  %v8620_v5 = vld [vmem:[#allocation22_spill] sm:$0xff] }
 0x305   :  { %v8110_v41 = vmul.f32 %v4977_v27, %v4912_v10  ;;  %v5001_v53 = vadd.f32 %v8002_v57, %v8516_v48  ;;  %v5003_v3 = vadd.f32 %v8007_v25, %v7957_v55  ;;  %v5005_v59 = vadd.f32 %v8009_v1, %v7978_v45 }
 0x306   :  { %v5007_v40 = vadd.f32 %v8618_v37, %v8617_v35  ;;  %v5009_v12 = vadd.f32 %v8620_v5, %v8619_v0  ;;  %v5011_v26 = vadd.f32 %v4995_v29, %v4962_v49  ;;  %v5013_v61 = vadd.f32 %v4997_v4, %v4962_v49 }
 0x307   :  { %v5015_v34 = vadd.f32 %v4999_v7, %v4962_v49  ;;  %v5017_v10 = vadd.f32 %v5001_v53, %v4962_v49  ;;  %v5019_v21 = vadd.f32 %v5003_v3, %v4962_v49  ;;  %v5021_v54 = vadd.f32 %v5005_v59, %v4962_v49 }
 0x308   :  { %v5023_v36 = vadd.f32 %v5007_v40, %v4962_v49  ;;  %v5025_v48 = vadd.f32 %v5009_v12, %v4962_v49  ;;  %v5027_v57 = vmul.f32 %v5011_v26, %v4930_v32  ;;  %v5029_v39 = vmul.f32 %v5013_v61, %v4932_v18  ;;  %v8625_v32 = vld [vmem:[#allocation45_spill] sm:$0xff] }
 0x309   :  { %v5031_v55 = vmul.f32 %v5015_v34, %v4934_v31  ;;  %v5033_v25 = vmul.f32 %v5017_v10, %v4936_v46  ;;  %v5035_v15 = vmul.f32 %v5019_v21, %v4938_v30  ;;  %v5037_v45 = vmul.f32 %v5021_v54, %v4940_v42  ;;  %v8629_v30 = vld [vmem:[#allocation11_spill] sm:$0xff] }
 0x30a   :  { %v5039_v1 = vmul.f32 %v5023_v36, %v4942_v43  ;;  %v8622_v6 = vand.u32 15, %v8621_v16  ;;  %v5041_v9 = vmul.f32 %v5025_v48, %v4944_v56  ;;  %v5043_v20 = vsel %vm8078_vm8, %v5027_v57, 1.0 }
 0x30b   :  { %v5045_v44 = vsel %vm8082_vm9, %v5029_v39, 1.0  ;;  %v8626_v18 = vand.u32 15, %v8625_v32  ;;  %v5047_v31 = vsel %vm8091_vm10, %v5031_v55, 1.0  ;;  %v8630_v42 = vand.u32 15, %v8629_v30 }
 0x30c   :  { %vm8124_vm12 = vcmp.lt.s32.totalorder %v8622_v6, 6  ;;  %v5049_v56 = vsel %vm8104_vm11, %v5033_v25, 1.0  ;;  %5461 = vrcp.f32 %v5043_v20  ;;  %v8634_v49 = vand.u32 15, %v8633_v50 }
 0x30d   :  { %vm8134_vm13 = vcmp.lt.s32.totalorder %v8626_v18, 6  ;;  %vm8142_vm14 = vcmp.lt.s32.totalorder %v8630_v42, 6  ;;  %v5051_v4 = vsel %vm8124_vm12, %v5035_v15, 1.0  ;;  %5463 = vrcp.f32 %v5045_v44 }
 0x30e   :  { %vm8150_vm15 = vcmp.lt.s32.totalorder %v8634_v49, 6  ;;  %v5053_v7 = vsel %vm8134_vm13, %v5037_v45, 1.0  ;;  %5465 = vrcp.f32 %v5047_v31  ;;  %v5055_v24 = vsel %vm8142_vm14, %v5039_v1, 1.0 }
 0x30f   :  { %5467 = vrcp.f32 %v5049_v56  ;;  %v5057_v19 = vsel %vm8150_vm15, %v5041_v9, 1.0 }
 0x310   :  { %5469 = vrcp.f32 %v5051_v4 }
 0x311   :  { %5471 = vrcp.f32 %v5053_v7 }
 0x312   :  { %5473 = vrcp.f32 %v5055_v24 }
 0x313   :  { %5475 = vrcp.f32 %v5057_v19 }
 0x316   :  { %v5462_v58 = vpop.eup %5461 }
 0x317   :  { %v5464_v23 = vpop.eup %5463  ;;  %v5060_v33 = vmul.f32 %v5462_v58, %v4979_v38 }
 0x318   :  { %v5466_v14 = vpop.eup %5465  ;;  %v5064_v2 = vmul.f32 %v5464_v23, %v4981_v60 }
 0x319   :  { %v5468_v13 = vpop.eup %5467  ;;  %v5068_v27 = vmul.f32 %v5466_v14, %v4983_v11  ;;  %v5091_v53 = vsel %vm8078_vm8, %v5060_v33, 0.0 }
 0x31a   :  { %v5470_v3 = vpop.eup %5469  ;;  %v5072_v59 = vmul.f32 %v5468_v13, %v4985_v51  ;;  %v5093_v35 = vsel %vm8082_vm9, %v5064_v2, 0.0  ;;  %v5108_v38 = vsel %vm5107_vm0, %v5091_v53, 0.0 }
 0x31b   :  { %v5472_v37 = vpop.eup %5471  ;;  %v5076_v40 = vmul.f32 %v5470_v3, %v4987_v52  ;;  %v5095_v0 = vsel %vm8091_vm10, %v5068_v27, 0.0  ;;  %v5111_v60 = vsel %vm5107_vm0, %v5093_v35, 0.0 }
 0x31c   :  { %v5474_v5 = vpop.eup %5473  ;;  %v5080_v11 = vmul.f32 %v5472_v37, %v4989_v47  ;;  %v5097_v28 = vsel %vm8104_vm11, %v5072_v59, 0.0  ;;  %v5112_v12 = vadd.f32 %v5111_v60, %v5108_v38  ;;  %v5115_v51 = vsel %vm5107_vm0, %v5095_v0, 0.0 }
 0x31d   :  { %v5476_v22 = vpop.eup %5475  ;;  %v5084_v26 = vmul.f32 %v5474_v5, %v8108_v17  ;;  %v5099_v52 = vsel %vm8124_vm12, %v5076_v40, 0.0  ;;  %v5119_v63 = vsel %vm5107_vm0, %v5097_v28, 0.0 }
 0x31e   :  { %v5088_v61 = vmul.f32 %v5476_v22, %v8110_v41  ;;  %v5116_v34 = vadd.f32 %v5115_v51, %v5112_v12  ;;  %v5123_v10 = vsel %vm5107_vm0, %v5099_v52, 0.0  ;;  %v5101_v8 = vsel %vm8134_vm13, %v5080_v11, 0.0 }
 0x31f   :  { %v5103_v21 = vsel %vm8142_vm14, %v5084_v26, 0.0  ;;  %v5127_v17 = vsel %vm5107_vm0, %v5101_v8, 0.0 }
 0x320   :  { %v5120_v47 = vadd.f32 %v5119_v63, %v5116_v34  ;;  %v5105_v36 = vsel %vm8150_vm15, %v5088_v61, 0.0  ;;  %v5131_v57 = vsel %vm5107_vm0, %v5103_v21, 0.0 }
 0x321   :  { %v5135_v39 = vsel %vm5107_vm0, %v5105_v36, 0.0 }
 0x322   :  { %v5124_v54 = vadd.f32 %v5123_v10, %v5120_v47 }
 0x324   :  { %v5128_v48 = vadd.f32 %v5127_v17, %v5124_v54 }
 0x326   :  { %v5132_v41 = vadd.f32 %v5131_v57, %v5128_v48 }
 0x328   :  { %v5136_v55 = vadd.f32 %v5135_v39, %v5132_v41 }
 0x32a   :  { %5139 = vadd.xlane.f32.xlu0 %v5136_v55 }
 0x3b7   :  { %v5140_v25 = vpop.xlane.xlu0 %5139 }
 0x3b8   :  { %v5141_v15 = vrot.slane %v5140_v25, 4 }
 0x3ba   :  { %v5142_v45 = vadd.f32 %v5141_v15, %v5140_v25 }
 0x3bc   :  { %v5143_v1 = vrot.slane %v5142_v45, 2 }
 0x3be   :  { %v5144_v16 = vadd.f32 %v5143_v1, %v5142_v45 }
 0x3c0   :  { %v5145_v6 = vrot.slane %v5144_v16, 1 }
 0x3c2   :  { %v5146_v62 = vadd.f32 %v5145_v6, %v5144_v16 }
 0x3c4   :  { %5454 = vpush %v5146_v62 }
 0x3f5   :  { %s5455_s14 = spop %5454 }
 0x3f6   :  { %v5148_v9 = vstv %s5455_s14 }
 0x3f7   :  { %5149 = vst [vmem:[%s8195_s4] sm:$0xff] %v5148_v9 }
 0x3f8   :  { %5154 = vsyncpa [#allocation3], 1 }
 0x3f9   :  { %5155 = vsyncpa [#allocation4], 1 }

</bundles_post_ra>
